<compile_context>
chip_gen: v7x
topology: tpu7x:2x2x1
jax: 0.10.0
libtpu: 0.0.40
codegen_flags: <defaults>
</compile_context>

<pallas_src>
import functools

import jax
import jax.numpy as jnp
from jax import lax
from jax.experimental import pallas as pl
from jax.experimental.pallas import tpu as pltpu


# ------------------------------------------------------------------
# Config (small, deterministic)
# ------------------------------------------------------------------
class Config:
    num_channels = 4
    embed_dim = 32
    img_size = 16
    patch_size = 4
    depths = (1, 1)
    d_state = 8
    expand = 2
    window_size = 2
    use_local_ssm = True
    use_global_ssm = True
    window_interaction = True


# ------------------------------------------------------------------
# In-kernel math helpers (Mosaic-safe, stable formulations)
# ------------------------------------------------------------------
def _sigmoid(x):
    # stable: sigmoid(x) = 0.5 * (1 + tanh(x / 2)); tanh runs on the EUP slot.
    return 0.5 * (jnp.tanh(0.5 * x) + 1.0)


def _softplus(x):
    # numerically safe: max(x, 0) + log(1 + exp(-|x|))
    return jnp.maximum(x, 0.0) + jnp.log(1.0 + jnp.exp(-jnp.abs(x)))


def _gelu(x):
    # tanh approximation (EUP-friendly)
    return 0.5 * x * (1.0 + jnp.tanh(0.7978845608028654 * (x + 0.044715 * x * x * x)))


def _layernorm(x, g, b):
    mu = jnp.mean(x, axis=-1, keepdims=True)
    var = jnp.mean(jnp.square(x - mu), axis=-1, keepdims=True)
    return (x - mu) * lax.rsqrt(var + 1e-5) * g + b


# ------------------------------------------------------------------
# Kernel-internal building blocks
# ------------------------------------------------------------------
def _ssm_forward(x, ln_g, ln_b, w_in, b_in, w_xp, b_xp, A, D_skip, w_out, b_out,
                 *, seq_len, n_groups, n_state):
    """Mamba-style SSM sub-block on a (M=L*G, C) token slab; returns x + out."""
    L, G, N = seq_len, n_groups, n_state
    d_inner = w_in.shape[-1] // 2

    xn = _layernorm(x, ln_g[...], ln_b[...])
    xn_b = xn.astype(jnp.bfloat16)

    # ---- fused in_proj: [x_branch | gate] in one lane-dense matmul ----
    proj = jnp.dot(xn_b, w_in[...], preferred_element_type=jnp.float32) + b_in[...]
    x_in = proj[:, :d_inner]
    z = proj[:, d_inner:]
    u = x_in * _sigmoid(x_in)                       # SiLU
    u_b = u.astype(jnp.bfloat16)

    # ---- fused x_proj: [dt | B | C] in one matmul ----
    # TODO(synk): reference Mamba uses a low-rank dt_rank->dt_proj path; a
    # single fused dt projection is used here (submodule source unavailable).
    xp = jnp.dot(u_b, w_xp[...], preferred_element_type=jnp.float32) + b_xp[...]
    dt = _softplus(xp[:, :d_inner])                 # (M, d_inner)
    b_all = xp[:, d_inner:d_inner + N]              # (M, N)
    c_all = xp[:, d_inner + N:d_inner + 2 * N]      # (M, N)

    # ---- hoisted per-sequence precompute (one EUP exp, one broadcast each) ----
    A_f = A[...].astype(jnp.float32)                                  # (N, d_inner)
    dA_all = jnp.exp(dt[:, None, :] * A_f[None, :, :])                # (M, N, d_inner)
    dBu_all = (dt * u)[:, None, :] * b_all[:, :, None]                # (M, N, d_inner)

    # ---- unrolled selective scan; states stay in values (no masked stores) ----
    h = jnp.zeros((G, N, d_inner), jnp.float32)
    hs = []
    for t in range(L):                              # L is small & static
        sl = slice(t * G, (t + 1) * G)
        h = dA_all[sl] * h + dBu_all[sl]
        hs.append(h)
    h_all = jnp.concatenate(hs, axis=0)             # (M, N, d_inner)
    y = jnp.sum(h_all * c_all[:, :, None], axis=1)  # (M, d_inner)

    # ---- D skip, output gate, out_proj, residual ----
    y = y + D_skip[...] * u
    y = y * (z * _sigmoid(z))
    out = jnp.dot(y.astype(jnp.bfloat16), w_out[...],
                  preferred_element_type=jnp.float32) + b_out[...]
    return x + out


def _win_forward(x, pool, asn, ln_g, ln_b, w1, b1, w2, b2):
    """WindowInteraction: LN -> window mean-pool -> MLP -> broadcast -> residual."""
    xn = _layernorm(x, ln_g[...], ln_b[...])
    pooled = jnp.dot(pool[...], xn.astype(jnp.bfloat16),
                     preferred_element_type=jnp.float32)              # (nW, C)
    h1 = _gelu(jnp.dot(pooled.astype(jnp.bfloat16), w1[...],
                       preferred_element_type=jnp.float32) + b1[...])
    h2 = jnp.dot(h1.astype(jnp.bfloat16), w2[...],
                 preferred_element_type=jnp.float32) + b2[...]
    up = jnp.dot(asn[...], h2.astype(jnp.bfloat16),
                 preferred_element_type=jnp.float32)                  # (HW, C)
    return x + up


# ------------------------------------------------------------------
# Pallas kernels
# ------------------------------------------------------------------
def _patch_embed_kernel(p_ref, w_ref, b_ref, pe_ref, o_ref):
    """patches @ W + bias + positional encoding, fused (one batch per program)."""
    acc = jnp.dot(p_ref[...].astype(jnp.bfloat16), w_ref[...],
                  preferred_element_type=jnp.float32)
    o_ref[...] = acc + b_ref[...] + pe_ref[...]


def _ln_linear_kernel(x_ref, g_ref, b_ref, w_ref, o_ref):
    """LayerNorm + Linear (no bias), fused.  Used for PatchMerging."""
    xn = _layernorm(x_ref[...].astype(jnp.float32), g_ref[...], b_ref[...])
    o_ref[...] = jnp.dot(xn.astype(jnp.bfloat16), w_ref[...],
                         preferred_element_type=jnp.float32)


def _fused_block_kernel(
        x_ref, p_c2l_ref, p_l2c_ref, pool_ref, asn_ref,
        l_ln_g, l_ln_b, l_w_in, l_b_in, l_w_xp, l_b_xp, l_A, l_D, l_w_out, l_b_out,
        g_ln_g, g_ln_b, g_w_in, g_b_in, g_w_xp, g_b_xp, g_A, g_D, g_w_out, g_b_out,
        w_ln_g, w_ln_b, w_w1, w_b1, w_w2, w_b2,
        o_ref, *, hw, n_win, win_len, n_state, use_local, use_global, use_win):
    """One full block (local SSM + global SSM + window interaction), fused.

    x_ref holds one batch element's tokens in raster (global-scan) order.
    Window (un)partition is done in-kernel with tiny permutation matmuls, so
    the whole block runs out of VMEM with a single HBM read and write.
    """
    x = x_ref[...].astype(jnp.float32)                       # (HW, C)

    if use_local:
        xl = jnp.dot(p_c2l_ref[...], x, preferred_element_type=jnp.float32)
        yl = _ssm_forward(xl, l_ln_g, l_ln_b, l_w_in, l_b_in, l_w_xp, l_b_xp,
                          l_A, l_D, l_w_out, l_b_out,
                          seq_len=win_len, n_groups=n_win, n_state=n_state)
        x = jnp.dot(p_l2c_ref[...], yl, preferred_element_type=jnp.float32)

    if use_global:
        x = _ssm_forward(x, g_ln_g, g_ln_b, g_w_in, g_b_in, g_w_xp, g_b_xp,
                         g_A, g_D, g_w_out, g_b_out,
                         seq_len=hw, n_groups=1, n_state=n_state)

    if use_win:
        x = _win_forward(x, pool_ref, asn_ref,
                         w_ln_g, w_ln_b, w_w1, w_b1, w_w2, w_b2)

    o_ref[...] = x


# ------------------------------------------------------------------
# Pallas wrappers
# ------------------------------------------------------------------
def _full_spec(a):
    nd = a.ndim
    return pl.BlockSpec(a.shape, lambda b, _nd=nd: (0,) * _nd)


def pallas_patch_embed(patches, w, b, pos_pe):
    # patches: (B, HW, K); pos_pe: (HW, E) added inside the kernel (no tiling).
    B, HW, K = patches.shape
    E = w.shape[1]
    return pl.pallas_call(
        _patch_embed_kernel,
        out_shape=jax.ShapeDtypeStruct((B, HW, E), jnp.float32),
        grid=(B,),
        in_specs=[pl.BlockSpec((None, HW, K), lambda i: (i, 0, 0)),
                  _full_spec(w), _full_spec(b), _full_spec(pos_pe)],
        out_specs=pl.BlockSpec((None, HW, E), lambda i: (i, 0, 0)),
        compiler_params=pltpu.CompilerParams(dimension_semantics=("parallel",)),
    )(patches.astype(jnp.float32), w, b, pos_pe)


def pallas_fused_block(x, blk, lay, cfg, Hc, Wc):
    # x: (B, HW, C) tokens in raster order per batch element.
    B, HW, C = x.shape
    ws = cfg.window_size
    nW = (Hc // ws) * (Wc // ws)

    def ssm_args(p):
        return [p["ln_g"], p["ln_b"], p["w_in"], p["b_in"], p["w_xp"], p["b_xp"],
                p["A"], p["D"], p["w_out"], p["b_out"]]

    inputs = [x, lay["P_c2l"], lay["P_l2c"], lay["pool"], lay["asn"]]
    inputs += ssm_args(blk["local"]) + ssm_args(blk["global"])
    inputs += [blk["win"]["ln_g"], blk["win"]["ln_b"],
               blk["win"]["w1"], blk["win"]["b1"],
               blk["win"]["w2"], blk["win"]["b2"]]

    x_spec = pl.BlockSpec((None, HW, C), lambda b: (b, 0, 0))
    in_specs = [x_spec] + [_full_spec(a) for a in inputs[1:]]

    kernel = functools.partial(
        _fused_block_kernel,
        hw=HW, n_win=nW, win_len=ws * ws, n_state=cfg.d_state,
        use_local=cfg.use_local_ssm,
        use_global=cfg.use_global_ssm,
        use_win=cfg.window_interaction)

    return pl.pallas_call(
        kernel,
        out_shape=jax.ShapeDtypeStruct((B, HW, C), jnp.float32),
        grid=(B,),
        in_specs=in_specs,
        out_specs=x_spec,
        input_output_aliases={0: 0},          # in-place residual update
        compiler_params=pltpu.CompilerParams(
            dimension_semantics=("parallel",),
            vmem_limit_bytes=32 * 1024 * 1024),
    )(*inputs)


def pallas_patch_merging(x, p, Hc, Wc):
    B, HW, C = x.shape
    xs = x.reshape(B, Hc, Wc, C)
    x0 = xs[:, 0::2, 0::2]
    x1 = xs[:, 1::2, 0::2]
    x2 = xs[:, 0::2, 1::2]
    x3 = xs[:, 1::2, 1::2]
    xc = jnp.concatenate([x0, x1, x2, x3], axis=-1).reshape(B, HW // 4, 4 * C)
    Mrows = HW // 4
    return pl.pallas_call(
        _ln_linear_kernel,
        out_shape=jax.ShapeDtypeStruct((B, Mrows, 2 * C), jnp.float32),
        grid=(B,),
        in_specs=[pl.BlockSpec((None, Mrows, 4 * C), lambda i: (i, 0, 0)),
                  _full_spec(p["ln_g"]), _full_spec(p["ln_b"]), _full_spec(p["w"])],
        out_specs=pl.BlockSpec((None, Mrows, 2 * C), lambda i: (i, 0, 0)),
        compiler_params=pltpu.CompilerParams(dimension_semantics=("parallel",)),
    )(xc, p["ln_g"], p["ln_b"], p["w"])


# ------------------------------------------------------------------
# Static layout matrices (per stage; constants folded by XLA)
# ------------------------------------------------------------------
def _build_layout(Hc, Wc, ws):
    HW = Hc * Wc
    nW = (Hc // ws) * (Wc // ws)
    j = jnp.arange(HW)
    h, w = j // Wc, j % Wc
    wy, dy = h // ws, h % ws
    wx, dx = w // ws, w % ws
    wid = wy * (Wc // ws) + wx                       # window id of each raster token
    li = (dy * ws + dx) * nW + wid                   # scan-major local row index
    P_c2l = (li[None, :] == jnp.arange(HW)[:, None]).astype(jnp.float32)   # (HW, HW)
    pool = ((wid[None, :] == jnp.arange(nW)[:, None]).astype(jnp.float32)
            / float(ws * ws)).astype(jnp.bfloat16)                         # (nW, HW)
    asn = (wid[:, None] == jnp.arange(nW)[None, :]).astype(jnp.bfloat16)   # (HW, nW)
    return dict(P_c2l=P_c2l, P_l2c=P_c2l.T, pool=pool, asn=asn)


def pos_encoding_2d(H, W, C):
    c_h = C // 2
    c_w = C - c_h

    def pe_1d(n, c):
        pos = jnp.arange(n, dtype=jnp.float32)[:, None]
        i = jnp.arange((c + 1) // 2, dtype=jnp.float32)[None, :]
        div = jnp.exp(-jnp.log(10000.0) * (2.0 * i) / c)
        ang = pos * div
        pe = jnp.zeros((n, c), jnp.float32)
        pe = pe.at[:, 0::2].set(jnp.sin(ang)[:, :(c + 1) // 2])
        pe = pe.at[:, 1::2].set(jnp.cos(ang)[:, :c // 2])
        return pe

    pe_h = pe_1d(H, c_h)
    pe_w = pe_1d(W, c_w)
    pe = jnp.concatenate(
        [jnp.broadcast_to(pe_h[:, None, :], (H, W, c_h)),
         jnp.broadcast_to(pe_w[None, :, :], (H, W, c_w))], axis=-1)
    return pe  # (H, W, C)


# ------------------------------------------------------------------
# Parameter initialisation (deterministic; MXU weights stored bf16)
# ------------------------------------------------------------------
def _init_ssm_params(key, dim, cfg):
    d_inner = cfg.expand * dim
    N = cfg.d_state
    k = jax.random.split(key, 6)
    s = 0.02
    bf = jnp.bfloat16
    w_inx = s * jax.random.normal(k[0], (dim, d_inner))
    w_inz = s * jax.random.normal(k[1], (dim, d_inner))
    w_dt = s * jax.random.normal(k[2], (d_inner, d_inner))
    w_bc = s * jax.random.normal(k[4], (d_inner, 2 * N))
    dt_bias = -2.0 + 0.1 * jax.random.normal(k[3], (1, d_inner))
    a_log = jnp.log(jnp.broadcast_to(
        jnp.arange(1, N + 1, dtype=jnp.float32)[:, None], (N, d_inner)))
    return dict(
        ln_g=jnp.ones((1, dim), jnp.float32),
        ln_b=jnp.zeros((1, dim), jnp.float32),
        # fused in_proj: [x-branch | gate]
        w_in=jnp.concatenate([w_inx, w_inz], axis=1).astype(bf),
        b_in=jnp.zeros((1, 2 * d_inner), jnp.float32),
        # fused x_proj: [dt | B | C]
        w_xp=jnp.concatenate([w_dt, w_bc], axis=1).astype(bf),
        b_xp=jnp.concatenate(
            [dt_bias, jnp.zeros((1, 2 * N))], axis=1).astype(jnp.float32),
        # A precomputed (constant at inference)
        A=(-jnp.exp(a_log)).astype(jnp.float32),
        D=jnp.ones((1, d_inner), jnp.float32),
        w_out=(s * jax.random.normal(k[5], (d_inner, dim))).astype(bf),
        b_out=jnp.zeros((1, dim), jnp.float32),
    )


def _init_win_params(key, dim):
    k = jax.random.split(key, 2)
    s = 0.02
    bf = jnp.bfloat16
    return dict(
        ln_g=jnp.ones((1, dim), jnp.float32),
        ln_b=jnp.zeros((1, dim), jnp.float32),
        w1=(s * jax.random.normal(k[0], (dim, dim))).astype(bf),
        b1=jnp.zeros((1, dim), jnp.float32),
        w2=(s * jax.random.normal(k[1], (dim, dim))).astype(bf),
        b2=jnp.zeros((1, dim), jnp.float32),
    )


def _init_merge_params(key, dim):
    return dict(
        ln_g=jnp.ones((1, 4 * dim), jnp.float32),
        ln_b=jnp.zeros((1, 4 * dim), jnp.float32),
        w=(0.02 * jax.random.normal(key, (4 * dim, 2 * dim))).astype(jnp.bfloat16),
    )


def build_params(cfg, key):
    keys = jax.random.split(key, 64)
    ki = iter(range(64))
    ps = cfg.patch_size
    E, Cin = cfg.embed_dim, cfg.num_channels
    Hp = Wp = cfg.img_size // ps
    w_conv = 0.02 * jax.random.normal(keys[next(ki)], (E, Cin, ps, ps), jnp.float32)
    params = dict(
        pe_w=w_conv.reshape(E, Cin * ps * ps).T.astype(jnp.bfloat16),   # (K, E)
        pe_b=jnp.zeros((1, E), jnp.float32),
        pos_pe=pos_encoding_2d(Hp, Wp, E).reshape(Hp * Wp, E),
        stages=[],
    )
    dim = E
    Hc, Wc = Hp, Wp
    for i, depth in enumerate(cfg.depths):
        stage = dict(blocks=[], layout=_build_layout(Hc, Wc, cfg.window_size))
        for _ in range(depth):
            blk = dict(
                local=_init_ssm_params(keys[next(ki)], dim, cfg),
                glob=None,
            )
            blk["global"] = _init_ssm_params(keys[next(ki)], dim, cfg)
            blk["win"] = _init_win_params(keys[next(ki)], dim)
            del blk["glob"]
            stage["blocks"].append(blk)
        if i < len(cfg.depths) - 1:
            stage["merge"] = _init_merge_params(keys[next(ki)], dim)
            dim *= 2
        params["stages"].append(stage)
        if i < len(cfg.depths) - 1:
            Hc, Wc = Hc // 2, Wc // 2
    return params


# ------------------------------------------------------------------
# Full forward
# ------------------------------------------------------------------
def mamba_its_forward(params, x_nchw, cfg):
    B, Cin, H, W = x_nchw.shape
    ps = cfg.patch_size
    Hp, Wp = H // ps, W // ps

    # Patch extraction (layout plumbing) + fused embed / bias / pos-encoding.
    p = x_nchw.reshape(B, Cin, Hp, ps, Wp, ps)
    p = jnp.transpose(p, (0, 2, 4, 1, 3, 5)).reshape(B, Hp * Wp, Cin * ps * ps)
    x = pallas_patch_embed(p, params["pe_w"], params["pe_b"], params["pos_pe"])
    # x: (B, HW, E) tokens in raster order per batch element.

    Hc, Wc = Hp, Wp
    for i, depth in enumerate(cfg.depths):
        stage = params["stages"][i]
        for d in range(depth):
            x = pallas_fused_block(x, stage["blocks"][d], stage["layout"],
                                   cfg, Hc, Wc)
        if i < len(cfg.depths) - 1:
            x = pallas_patch_merging(x, stage["merge"], Hc, Wc)
            Hc, Wc = Hc // 2, Wc // 2
    return x   # (B, L, C) tokens


# ------------------------------------------------------------------
if __name__ == "__main__":
    cfg = Config()
    key = jax.random.PRNGKey(0)
    kp, kx = jax.random.split(key)
    params = build_params(cfg, kp)
    x = jax.random.normal(
        kx, (2, cfg.num_channels, cfg.img_size, cfg.img_size), jnp.float32)

    fwd = jax.jit(lambda p, inp: mamba_its_forward(p, inp, cfg))
    out = jax.block_until_ready(fwd(params, x))
    assert out.shape == (2, 4, 2 * cfg.embed_dim), out.shape
    assert bool(jnp.all(jnp.isfinite(out)))
    print("KERNEL_OK")
</pallas_src>

<mosaic_0001>
module attributes {stable_mosaic.version = 11 : i64} {
  func.func @_patch_embed_kernel(%arg0: i32, %arg1: memref<1x16x64xf32, #tpu.memory_space<vmem>>, %arg2: memref<64x32xbf16, #tpu.memory_space<vmem>>, %arg3: memref<1x32xf32, #tpu.memory_space<vmem>>, %arg4: memref<16x32xf32, #tpu.memory_space<vmem>>, %arg5: memref<1x16x32xf32, #tpu.memory_space<vmem>>) attributes {dimension_semantics = [#tpu.dimension_semantics<parallel>], iteration_bounds = array<i64: 2>, scalar_prefetch = 0 : i64, scratch_operands = 0 : i64, tpu.core_type = #tpu.core_type<tc>, window_params = [{transform_indices = @transform_0, window_bounds = array<i64: 1, 16, 64>}, {pipeline_mode = #tpu.pipeline_mode<synchronous>, transform_indices = @transform_1, window_bounds = array<i64: 64, 32>}, {pipeline_mode = #tpu.pipeline_mode<synchronous>, transform_indices = @transform_2, window_bounds = array<i64: 1, 32>}, {pipeline_mode = #tpu.pipeline_mode<synchronous>, transform_indices = @transform_3, window_bounds = array<i64: 16, 32>}, {transform_indices = @transform_4, window_bounds = array<i64: 1, 16, 32>}]} {
    %c0 = arith.constant 0 : index
    %c0_0 = arith.constant 0 : index
    %c0_1 = arith.constant 0 : index
    %0 = vector.load %arg1[%c0, %c0_0, %c0_1] : memref<1x16x64xf32, #tpu.memory_space<vmem>>, vector<1x16x64xf32>
    %1 = vector.shape_cast %0 : vector<1x16x64xf32> to vector<16x64xf32>
    %2 = arith.truncf %1 : vector<16x64xf32> to vector<16x64xbf16>
    %c0_2 = arith.constant 0 : index
    %c0_3 = arith.constant 0 : index
    %3 = vector.load %arg2[%c0_2, %c0_3] : memref<64x32xbf16, #tpu.memory_space<vmem>>, vector<64x32xbf16>
    %cst = arith.constant dense<0.000000e+00> : vector<16x32xf32>
    %4 = tpu.matmul %2, %3, %cst {dimension_numbers = #tpu.dot_dimension_numbers<[1], [0], [0], [1], [0, 0, 1, 1], [], []>} : vector<16x64xbf16>, vector<64x32xbf16>, vector<16x32xf32> -> vector<16x32xf32>
    %c0_4 = arith.constant 0 : index
    %c0_5 = arith.constant 0 : index
    %5 = vector.load %arg3[%c0_4, %c0_5] : memref<1x32xf32, #tpu.memory_space<vmem>>, vector<1x32xf32>
    %6 = vector.broadcast %5 : vector<1x32xf32> to vector<16x32xf32>
    %7 = arith.addf %4, %6 : vector<16x32xf32>
    %c0_6 = arith.constant 0 : index
    %c0_7 = arith.constant 0 : index
    %8 = vector.load %arg4[%c0_6, %c0_7] : memref<16x32xf32, #tpu.memory_space<vmem>>, vector<16x32xf32>
    %9 = arith.addf %7, %8 : vector<16x32xf32>
    %c0_8 = arith.constant 0 : index
    %c0_9 = arith.constant 0 : index
    %c0_10 = arith.constant 0 : index
    %10 = vector.load %arg5[%c0_8, %c0_9, %c0_10] : memref<1x16x32xf32, #tpu.memory_space<vmem>>, vector<1x16x32xf32>
    %11 = vector.shape_cast %10 : vector<1x16x32xf32> to vector<16x32xf32>
    %12 = vector.shape_cast %9 : vector<16x32xf32> to vector<1x16x32xf32>
    tpu.vector_store %arg5[%c0_8, %c0_9, %c0_10], %12 {strides = array<i32>} : memref<1x16x32xf32, #tpu.memory_space<vmem>>, vector<1x16x32xf32>,
    return
  }
  func.func @transform_0(%arg0: i32) -> (i32, i32, i32) {
    %c0_i32 = arith.constant 0 : i32
    %c0_i32_0 = arith.constant 0 : i32
    %c0_i32_1 = arith.constant 0 : i32
    return %arg0, %c0_i32, %c0_i32_0 : i32, i32, i32
  }
  func.func @transform_1(%arg0: i32) -> (i32, i32) {
    %c0_i32 = arith.constant 0 : i32
    %c0_i32_0 = arith.constant 0 : i32
    %c0_i32_1 = arith.constant 0 : i32
    return %c0_i32, %c0_i32_0 : i32, i32
  }
  func.func @transform_2(%arg0: i32) -> (i32, i32) {
    %c0_i32 = arith.constant 0 : i32
    %c0_i32_0 = arith.constant 0 : i32
    %c0_i32_1 = arith.constant 0 : i32
    return %c0_i32, %c0_i32_0 : i32, i32
  }
  func.func @transform_3(%arg0: i32) -> (i32, i32) {
    %c0_i32 = arith.constant 0 : i32
    %c0_i32_0 = arith.constant 0 : i32
    %c0_i32_1 = arith.constant 0 : i32
    return %c0_i32, %c0_i32_0 : i32, i32
  }
  func.func @transform_4(%arg0: i32) -> (i32, i32, i32) {
    %c0_i32 = arith.constant 0 : i32
    %c0_i32_0 = arith.constant 0 : i32
    %c0_i32_1 = arith.constant 0 : i32
    return %arg0, %c0_i32, %c0_i32_0 : i32, i32, i32
  }
}

module attributes {stable_mosaic.version = 11 : i64} {
  func.func @_fused_block_kernel(%arg0: i32, %arg1: memref<1x16x32xf32, #tpu.memory_space<vmem>>, %arg2: memref<16x16xf32, #tpu.memory_space<vmem>>, %arg3: memref<16x16xf32, #tpu.memory_space<vmem>>, %arg4: memref<4x16xbf16, #tpu.memory_space<vmem>>, %arg5: memref<16x4xbf16, #tpu.memory_space<vmem>>, %arg6: memref<1x32xf32, #tpu.memory_space<vmem>>, %arg7: memref<1x32xf32, #tpu.memory_space<vmem>>, %arg8: memref<32x128xbf16, #tpu.memory_space<vmem>>, %arg9: memref<1x128xf32, #tpu.memory_space<vmem>>, %arg10: memref<64x80xbf16, #tpu.memory_space<vmem>>, %arg11: memref<1x80xf32, #tpu.memory_space<vmem>>, %arg12: memref<8x64xf32, #tpu.memory_space<vmem>>, %arg13: memref<1x64xf32, #tpu.memory_space<vmem>>, %arg14: memref<64x32xbf16, #tpu.memory_space<vmem>>, %arg15: memref<1x32xf32, #tpu.memory_space<vmem>>, %arg16: memref<1x32xf32, #tpu.memory_space<vmem>>, %arg17: memref<1x32xf32, #tpu.memory_space<vmem>>, %arg18: memref<32x128xbf16, #tpu.memory_space<vmem>>, %arg19: memref<1x128xf32, #tpu.memory_space<vmem>>, %arg20: memref<64x80xbf16, #tpu.memory_space<vmem>>, %arg21: memref<1x80xf32, #tpu.memory_space<vmem>>, %arg22: memref<8x64xf32, #tpu.memory_space<vmem>>, %arg23: memref<1x64xf32, #tpu.memory_space<vmem>>, %arg24: memref<64x32xbf16, #tpu.memory_space<vmem>>, %arg25: memref<1x32xf32, #tpu.memory_space<vmem>>, %arg26: memref<1x32xf32, #tpu.memory_space<vmem>>, %arg27: memref<1x32xf32, #tpu.memory_space<vmem>>, %arg28: memref<32x32xbf16, #tpu.memory_space<vmem>>, %arg29: memref<1x32xf32, #tpu.memory_space<vmem>>, %arg30: memref<32x32xbf16, #tpu.memory_space<vmem>>, %arg31: memref<1x32xf32, #tpu.memory_space<vmem>>, %arg32: memref<1x16x32xf32, #tpu.memory_space<vmem>>) attributes {dimension_semantics = [#tpu.dimension_semantics<parallel>], iteration_bounds = array<i64: 2>, scalar_prefetch = 0 : i64, scratch_operands = 0 : i64, tpu.core_type = #tpu.core_type<tc>, window_params = [{transform_indices = @transform_0, window_bounds = array<i64: 1, 16, 32>}, {pipeline_mode = #tpu.pipeline_mode<synchronous>, transform_indices = @transform_1, window_bounds = array<i64: 16, 16>}, {pipeline_mode = #tpu.pipeline_mode<synchronous>, transform_indices = @transform_2, window_bounds = array<i64: 16, 16>}, {pipeline_mode = #tpu.pipeline_mode<synchronous>, transform_indices = @transform_3, window_bounds = array<i64: 4, 16>}, {pipeline_mode = #tpu.pipeline_mode<synchronous>, transform_indices = @transform_4, window_bounds = array<i64: 16, 4>}, {pipeline_mode = #tpu.pipeline_mode<synchronous>, transform_indices = @transform_5, window_bounds = array<i64: 1, 32>}, {pipeline_mode = #tpu.pipeline_mode<synchronous>, transform_indices = @transform_6, window_bounds = array<i64: 1, 32>}, {pipeline_mode = #tpu.pipeline_mode<synchronous>, transform_indices = @transform_7, window_bounds = array<i64: 32, 128>}, {pipeline_mode = #tpu.pipeline_mode<synchronous>, transform_indices = @transform_8, window_bounds = array<i64: 1, 128>}, {pipeline_mode = #tpu.pipeline_mode<synchronous>, transform_indices = @transform_9, window_bounds = array<i64: 64, 80>}, {pipeline_mode = #tpu.pipeline_mode<synchronous>, transform_indices = @transform_10, window_bounds = array<i64: 1, 80>}, {pipeline_mode = #tpu.pipeline_mode<synchronous>, transform_indices = @transform_11, window_bounds = array<i64: 8, 64>}, {pipeline_mode = #tpu.pipeline_mode<synchronous>, transform_indices = @transform_12, window_bounds = array<i64: 1, 64>}, {pipeline_mode = #tpu.pipeline_mode<synchronous>, transform_indices = @transform_13, window_bounds = array<i64: 64, 32>}, {pipeline_mode = #tpu.pipeline_mode<synchronous>, transform_indices = @transform_14, window_bounds = array<i64: 1, 32>}, {pipeline_mode = #tpu.pipeline_mode<synchronous>, transform_indices = @transform_15, window_bounds = array<i64: 1, 32>}, {pipeline_mode = #tpu.pipeline_mode<synchronous>, transform_indices = @transform_16, window_bounds = array<i64: 1, 32>}, {pipeline_mode = #tpu.pipeline_mode<synchronous>, transform_indices = @transform_17, window_bounds = array<i64: 32, 128>}, {pipeline_mode = #tpu.pipeline_mode<synchronous>, transform_indices = @transform_18, window_bounds = array<i64: 1, 128>}, {pipeline_mode = #tpu.pipeline_mode<synchronous>, transform_indices = @transform_19, window_bounds = array<i64: 64, 80>}, {pipeline_mode = #tpu.pipeline_mode<synchronous>, transform_indices = @transform_20, window_bounds = array<i64: 1, 80>}, {pipeline_mode = #tpu.pipeline_mode<synchronous>, transform_indices = @transform_21, window_bounds = array<i64: 8, 64>}, {pipeline_mode = #tpu.pipeline_mode<synchronous>, transform_indices = @transform_22, window_bounds = array<i64: 1, 64>}, {pipeline_mode = #tpu.pipeline_mode<synchronous>, transform_indices = @transform_23, window_bounds = array<i64: 64, 32>}, {pipeline_mode = #tpu.pipeline_mode<synchronous>, transform_indices = @transform_24, window_bounds = array<i64: 1, 32>}, {pipeline_mode = #tpu.pipeline_mode<synchronous>, transform_indices = @transform_25, window_bounds = array<i64: 1, 32>}, {pipeline_mode = #tpu.pipeline_mode<synchronous>, transform_indices = @transform_26, window_bounds = array<i64: 1, 32>}, {pipeline_mode = #tpu.pipeline_mode<synchronous>, transform_indices = @transform_27, window_bounds = array<i64: 32, 32>}, {pipeline_mode = #tpu.pipeline_mode<synchronous>, transform_indices = @transform_28, window_bounds = array<i64: 1, 32>}, {pipeline_mode = #tpu.pipeline_mode<synchronous>, transform_indices = @transform_29, window_bounds = array<i64: 32, 32>}, {pipeline_mode = #tpu.pipeline_mode<synchronous>, transform_indices = @transform_30, window_bounds = array<i64: 1, 32>}, {transform_indices = @transform_31, window_bounds = array<i64: 1, 16, 32>}]} {
    %c0 = arith.constant 0 : index
    %c0_0 = arith.constant 0 : index
    %c0_1 = arith.constant 0 : index
    %0 = vector.load %arg1[%c0, %c0_0, %c0_1] : memref<1x16x32xf32, #tpu.memory_space<vmem>>, vector<1x16x32xf32>
    %1 = vector.shape_cast %0 : vector<1x16x32xf32> to vector<16x32xf32>
    %c0_2 = arith.constant 0 : index
    %c0_3 = arith.constant 0 : index
    %2 = vector.load %arg2[%c0_2, %c0_3] : memref<16x16xf32, #tpu.memory_space<vmem>>, vector<16x16xf32>
    %cst = arith.constant dense<0.000000e+00> : vector<16x32xf32>
    %3 = tpu.matmul %2, %1, %cst {dimension_numbers = #tpu.dot_dimension_numbers<[1], [0], [0], [1], [0, 0, 1, 1], [], []>} : vector<16x16xf32>, vector<16x32xf32>, vector<16x32xf32> -> vector<16x32xf32>
    %c0_4 = arith.constant 0 : index
    %c0_5 = arith.constant 0 : index
    %4 = vector.load %arg6[%c0_4, %c0_5] : memref<1x32xf32, #tpu.memory_space<vmem>>, vector<1x32xf32>
    %c0_6 = arith.constant 0 : index
    %c0_7 = arith.constant 0 : index
    %5 = vector.load %arg7[%c0_6, %c0_7] : memref<1x32xf32, #tpu.memory_space<vmem>>, vector<1x32xf32>
    %cst_8 = arith.constant dense<0.000000e+00> : vector<16xf32>
    %6 = vector.multi_reduction <add>, %3, %cst_8 [1] : vector<16x32xf32> to vector<16xf32>
    %7 = vector.shape_cast %6 : vector<16xf32> to vector<16x1xf32>
    %cst_9 = arith.constant 3.200000e+01 : f32
    %8 = vector.broadcast %cst_9 : f32 to vector<16x1xf32>
    %9 = arith.divf %7, %8 : vector<16x1xf32>
    %10 = vector.broadcast %9 : vector<16x1xf32> to vector<16x32xf32>
    %11 = arith.subf %3, %10 : vector<16x32xf32>
    %12 = arith.mulf %11, %11 : vector<16x32xf32>
    %cst_10 = arith.constant dense<0.000000e+00> : vector<16xf32>
    %13 = vector.multi_reduction <add>, %12, %cst_10 [1] : vector<16x32xf32> to vector<16xf32>
    %14 = vector.shape_cast %13 : vector<16xf32> to vector<16x1xf32>
    %cst_11 = arith.constant 3.200000e+01 : f32
    %15 = vector.broadcast %cst_11 : f32 to vector<16x1xf32>
    %16 = arith.divf %14, %15 : vector<16x1xf32>
    %17 = vector.broadcast %9 : vector<16x1xf32> to vector<16x32xf32>
    %18 = arith.subf %3, %17 : vector<16x32xf32>
    %cst_12 = arith.constant 9.99999974E-6 : f32
    %19 = vector.broadcast %cst_12 : f32 to vector<16x1xf32>
    %20 = arith.addf %16, %19 : vector<16x1xf32>
    %21 = math.rsqrt %20 : vector<16x1xf32>
    %22 = vector.broadcast %21 : vector<16x1xf32> to vector<16x32xf32>
    %23 = arith.mulf %18, %22 : vector<16x32xf32>
    %24 = vector.broadcast %4 : vector<1x32xf32> to vector<16x32xf32>
    %25 = arith.mulf %23, %24 : vector<16x32xf32>
    %26 = vector.broadcast %5 : vector<1x32xf32> to vector<16x32xf32>
    %27 = arith.addf %25, %26 : vector<16x32xf32>
    %28 = arith.truncf %27 : vector<16x32xf32> to vector<16x32xbf16>
    %c0_13 = arith.constant 0 : index
    %c0_14 = arith.constant 0 : index
    %29 = vector.load %arg8[%c0_13, %c0_14] : memref<32x128xbf16, #tpu.memory_space<vmem>>, vector<32x128xbf16>
    %cst_15 = arith.constant dense<0.000000e+00> : vector<16x128xf32>
    %30 = tpu.matmul %28, %29, %cst_15 {dimension_numbers = #tpu.dot_dimension_numbers<[1], [0], [0], [1], [0, 0, 1, 1], [], []>} : vector<16x32xbf16>, vector<32x128xbf16>, vector<16x128xf32> -> vector<16x128xf32>
    %c0_16 = arith.constant 0 : index
    %c0_17 = arith.constant 0 : index
    %31 = vector.load %arg9[%c0_16, %c0_17] : memref<1x128xf32, #tpu.memory_space<vmem>>, vector<1x128xf32>
    %32 = vector.broadcast %31 : vector<1x128xf32> to vector<16x128xf32>
    %33 = arith.addf %30, %32 : vector<16x128xf32>
    %34 = vector.extract_strided_slice %33 {offsets = [0, 0], sizes = [16, 64], strides = [1, 1]} : vector<16x128xf32> to vector<16x64xf32>
    %35 = vector.extract_strided_slice %33 {offsets = [0, 64], sizes = [16, 64], strides = [1, 1]} : vector<16x128xf32> to vector<16x64xf32>
    %cst_18 = arith.constant 5.000000e-01 : f32
    %36 = vector.broadcast %cst_18 : f32 to vector<16x64xf32>
    %37 = arith.mulf %36, %34 : vector<16x64xf32>
    %38 = math.tanh %37 : vector<16x64xf32>
    %cst_19 = arith.constant 1.000000e+00 : f32
    %39 = vector.broadcast %cst_19 : f32 to vector<16x64xf32>
    %40 = arith.addf %38, %39 : vector<16x64xf32>
    %cst_20 = arith.constant 5.000000e-01 : f32
    %41 = vector.broadcast %cst_20 : f32 to vector<16x64xf32>
    %42 = arith.mulf %41, %40 : vector<16x64xf32>
    %43 = arith.mulf %34, %42 : vector<16x64xf32>
    %44 = arith.truncf %43 : vector<16x64xf32> to vector<16x64xbf16>
    %c0_21 = arith.constant 0 : index
    %c0_22 = arith.constant 0 : index
    %45 = vector.load %arg10[%c0_21, %c0_22] : memref<64x80xbf16, #tpu.memory_space<vmem>>, vector<64x80xbf16>
    %cst_23 = arith.constant dense<0.000000e+00> : vector<16x80xf32>
    %46 = tpu.matmul %44, %45, %cst_23 {dimension_numbers = #tpu.dot_dimension_numbers<[1], [0], [0], [1], [0, 0, 1, 1], [], []>} : vector<16x64xbf16>, vector<64x80xbf16>, vector<16x80xf32> -> vector<16x80xf32>
    %c0_24 = arith.constant 0 : index
    %c0_25 = arith.constant 0 : index
    %47 = vector.load %arg11[%c0_24, %c0_25] : memref<1x80xf32, #tpu.memory_space<vmem>>, vector<1x80xf32>
    %48 = vector.broadcast %47 : vector<1x80xf32> to vector<16x80xf32>
    %49 = arith.addf %46, %48 : vector<16x80xf32>
    %50 = vector.extract_strided_slice %49 {offsets = [0, 0], sizes = [16, 64], strides = [1, 1]} : vector<16x80xf32> to vector<16x64xf32>
    %cst_26 = arith.constant 0.000000e+00 : f32
    %51 = vector.broadcast %cst_26 : f32 to vector<16x64xf32>
    %52 = arith.maximumf %50, %51 : vector<16x64xf32>
    %53 = math.absf %50 : vector<16x64xf32>
    %cst_27 = arith.constant 0.000000e+00 : f32
    %54 = vector.broadcast %cst_27 : f32 to vector<16x64xf32>
    %55 = arith.subf %54, %53 : vector<16x64xf32>
    %56 = math.exp %55 : vector<16x64xf32>
    %cst_28 = arith.constant 1.000000e+00 : f32
    %57 = vector.broadcast %cst_28 : f32 to vector<16x64xf32>
    %58 = arith.addf %57, %56 : vector<16x64xf32>
    %59 = math.log %58 : vector<16x64xf32>
    %60 = arith.addf %52, %59 : vector<16x64xf32>
    %61 = vector.extract_strided_slice %49 {offsets = [0, 64], sizes = [16, 8], strides = [1, 1]} : vector<16x80xf32> to vector<16x8xf32>
    %62 = vector.extract_strided_slice %49 {offsets = [0, 72], sizes = [16, 8], strides = [1, 1]} : vector<16x80xf32> to vector<16x8xf32>
    %c0_29 = arith.constant 0 : index
    %c0_30 = arith.constant 0 : index
    %63 = vector.load %arg12[%c0_29, %c0_30] : memref<8x64xf32, #tpu.memory_space<vmem>>, vector<8x64xf32>
    %64 = vector.shape_cast %60 : vector<16x64xf32> to vector<16x1x64xf32>
    %65 = vector.shape_cast %63 : vector<8x64xf32> to vector<1x8x64xf32>
    %66 = vector.broadcast %64 : vector<16x1x64xf32> to vector<16x8x64xf32>
    %67 = vector.broadcast %65 : vector<1x8x64xf32> to vector<16x8x64xf32>
    %68 = arith.mulf %66, %67 : vector<16x8x64xf32>
    %69 = math.exp %68 : vector<16x8x64xf32>
    %70 = arith.mulf %60, %43 : vector<16x64xf32>
    %71 = vector.shape_cast %70 : vector<16x64xf32> to vector<16x1x64xf32>
    %72 = vector.shape_cast %61 : vector<16x8xf32> to vector<16x8x1xf32>
    %73 = vector.broadcast %71 : vector<16x1x64xf32> to vector<16x8x64xf32>
    %74 = vector.broadcast %72 : vector<16x8x1xf32> to vector<16x8x64xf32>
    %75 = arith.mulf %73, %74 : vector<16x8x64xf32>
    %cst_31 = arith.constant 0.000000e+00 : f32
    %76 = vector.broadcast %cst_31 : f32 to vector<4x8x64xf32>
    %77 = vector.extract_strided_slice %69 {offsets = [0, 0, 0], sizes = [4, 8, 64], strides = [1, 1, 1]} : vector<16x8x64xf32> to vector<4x8x64xf32>
    %78 = arith.mulf %77, %76 : vector<4x8x64xf32>
    %79 = vector.extract_strided_slice %75 {offsets = [0, 0, 0], sizes = [4, 8, 64], strides = [1, 1, 1]} : vector<16x8x64xf32> to vector<4x8x64xf32>
    %80 = arith.addf %78, %79 : vector<4x8x64xf32>
    %81 = vector.extract_strided_slice %69 {offsets = [4, 0, 0], sizes = [4, 8, 64], strides = [1, 1, 1]} : vector<16x8x64xf32> to vector<4x8x64xf32>
    %82 = arith.mulf %81, %80 : vector<4x8x64xf32>
    %83 = vector.extract_strided_slice %75 {offsets = [4, 0, 0], sizes = [4, 8, 64], strides = [1, 1, 1]} : vector<16x8x64xf32> to vector<4x8x64xf32>
    %84 = arith.addf %82, %83 : vector<4x8x64xf32>
    %85 = vector.extract_strided_slice %69 {offsets = [8, 0, 0], sizes = [4, 8, 64], strides = [1, 1, 1]} : vector<16x8x64xf32> to vector<4x8x64xf32>
    %86 = arith.mulf %85, %84 : vector<4x8x64xf32>
    %87 = vector.extract_strided_slice %75 {offsets = [8, 0, 0], sizes = [4, 8, 64], strides = [1, 1, 1]} : vector<16x8x64xf32> to vector<4x8x64xf32>
    %88 = arith.addf %86, %87 : vector<4x8x64xf32>
    %89 = vector.extract_strided_slice %69 {offsets = [12, 0, 0], sizes = [4, 8, 64], strides = [1, 1, 1]} : vector<16x8x64xf32> to vector<4x8x64xf32>
    %90 = arith.mulf %89, %88 : vector<4x8x64xf32>
    %91 = vector.extract_strided_slice %75 {offsets = [12, 0, 0], sizes = [4, 8, 64], strides = [1, 1, 1]} : vector<16x8x64xf32> to vector<4x8x64xf32>
    %92 = arith.addf %90, %91 : vector<4x8x64xf32>
    %93 = tpu.concatenate %80, %84, %88, %92 in 0 : vector<4x8x64xf32>, vector<4x8x64xf32>, vector<4x8x64xf32>, vector<4x8x64xf32> -> vector<16x8x64xf32>
    %94 = vector.shape_cast %62 : vector<16x8xf32> to vector<16x8x1xf32>
    %95 = vector.broadcast %94 : vector<16x8x1xf32> to vector<16x8x64xf32>
    %96 = arith.mulf %93, %95 : vector<16x8x64xf32>
    %cst_32 = arith.constant dense<0.000000e+00> : vector<16x64xf32>
    %97 = vector.multi_reduction <add>, %96, %cst_32 [1] : vector<16x8x64xf32> to vector<16x64xf32>
    %c0_33 = arith.constant 0 : index
    %c0_34 = arith.constant 0 : index
    %98 = vector.load %arg13[%c0_33, %c0_34] : memref<1x64xf32, #tpu.memory_space<vmem>>, vector<1x64xf32>
    %99 = vector.broadcast %98 : vector<1x64xf32> to vector<16x64xf32>
    %100 = arith.mulf %99, %43 : vector<16x64xf32>
    %101 = arith.addf %97, %100 : vector<16x64xf32>
    %cst_35 = arith.constant 5.000000e-01 : f32
    %102 = vector.broadcast %cst_35 : f32 to vector<16x64xf32>
    %103 = arith.mulf %102, %35 : vector<16x64xf32>
    %104 = math.tanh %103 : vector<16x64xf32>
    %cst_36 = arith.constant 1.000000e+00 : f32
    %105 = vector.broadcast %cst_36 : f32 to vector<16x64xf32>
    %106 = arith.addf %104, %105 : vector<16x64xf32>
    %cst_37 = arith.constant 5.000000e-01 : f32
    %107 = vector.broadcast %cst_37 : f32 to vector<16x64xf32>
    %108 = arith.mulf %107, %106 : vector<16x64xf32>
    %109 = arith.mulf %35, %108 : vector<16x64xf32>
    %110 = arith.mulf %101, %109 : vector<16x64xf32>
    %111 = arith.truncf %110 : vector<16x64xf32> to vector<16x64xbf16>
    %c0_38 = arith.constant 0 : index
    %c0_39 = arith.constant 0 : index
    %112 = vector.load %arg14[%c0_38, %c0_39] : memref<64x32xbf16, #tpu.memory_space<vmem>>, vector<64x32xbf16>
    %cst_40 = arith.constant dense<0.000000e+00> : vector<16x32xf32>
    %113 = tpu.matmul %111, %112, %cst_40 {dimension_numbers = #tpu.dot_dimension_numbers<[1], [0], [0], [1], [0, 0, 1, 1], [], []>} : vector<16x64xbf16>, vector<64x32xbf16>, vector<16x32xf32> -> vector<16x32xf32>
    %c0_41 = arith.constant 0 : index
    %c0_42 = arith.constant 0 : index
    %114 = vector.load %arg15[%c0_41, %c0_42] : memref<1x32xf32, #tpu.memory_space<vmem>>, vector<1x32xf32>
    %115 = vector.broadcast %114 : vector<1x32xf32> to vector<16x32xf32>
    %116 = arith.addf %113, %115 : vector<16x32xf32>
    %117 = arith.addf %3, %116 : vector<16x32xf32>
    %c0_43 = arith.constant 0 : index
    %c0_44 = arith.constant 0 : index
    %118 = vector.load %arg3[%c0_43, %c0_44] : memref<16x16xf32, #tpu.memory_space<vmem>>, vector<16x16xf32>
    %cst_45 = arith.constant dense<0.000000e+00> : vector<16x32xf32>
    %119 = tpu.matmul %118, %117, %cst_45 {dimension_numbers = #tpu.dot_dimension_numbers<[1], [0], [0], [1], [0, 0, 1, 1], [], []>} : vector<16x16xf32>, vector<16x32xf32>, vector<16x32xf32> -> vector<16x32xf32>
    %c0_46 = arith.constant 0 : index
    %c0_47 = arith.constant 0 : index
    %120 = vector.load %arg16[%c0_46, %c0_47] : memref<1x32xf32, #tpu.memory_space<vmem>>, vector<1x32xf32>
    %c0_48 = arith.constant 0 : index
    %c0_49 = arith.constant 0 : index
    %121 = vector.load %arg17[%c0_48, %c0_49] : memref<1x32xf32, #tpu.memory_space<vmem>>, vector<1x32xf32>
    %cst_50 = arith.constant dense<0.000000e+00> : vector<16xf32>
    %122 = vector.multi_reduction <add>, %119, %cst_50 [1] : vector<16x32xf32> to vector<16xf32>
    %123 = vector.shape_cast %122 : vector<16xf32> to vector<16x1xf32>
    %cst_51 = arith.constant 3.200000e+01 : f32
    %124 = vector.broadcast %cst_51 : f32 to vector<16x1xf32>
    %125 = arith.divf %123, %124 : vector<16x1xf32>
    %126 = vector.broadcast %125 : vector<16x1xf32> to vector<16x32xf32>
    %127 = arith.subf %119, %126 : vector<16x32xf32>
    %128 = arith.mulf %127, %127 : vector<16x32xf32>
    %cst_52 = arith.constant dense<0.000000e+00> : vector<16xf32>
    %129 = vector.multi_reduction <add>, %128, %cst_52 [1] : vector<16x32xf32> to vector<16xf32>
    %130 = vector.shape_cast %129 : vector<16xf32> to vector<16x1xf32>
    %cst_53 = arith.constant 3.200000e+01 : f32
    %131 = vector.broadcast %cst_53 : f32 to vector<16x1xf32>
    %132 = arith.divf %130, %131 : vector<16x1xf32>
    %133 = vector.broadcast %125 : vector<16x1xf32> to vector<16x32xf32>
    %134 = arith.subf %119, %133 : vector<16x32xf32>
    %cst_54 = arith.constant 9.99999974E-6 : f32
    %135 = vector.broadcast %cst_54 : f32 to vector<16x1xf32>
    %136 = arith.addf %132, %135 : vector<16x1xf32>
    %137 = math.rsqrt %136 : vector<16x1xf32>
    %138 = vector.broadcast %137 : vector<16x1xf32> to vector<16x32xf32>
    %139 = arith.mulf %134, %138 : vector<16x32xf32>
    %140 = vector.broadcast %120 : vector<1x32xf32> to vector<16x32xf32>
    %141 = arith.mulf %139, %140 : vector<16x32xf32>
    %142 = vector.broadcast %121 : vector<1x32xf32> to vector<16x32xf32>
    %143 = arith.addf %141, %142 : vector<16x32xf32>
    %144 = arith.truncf %143 : vector<16x32xf32> to vector<16x32xbf16>
    %c0_55 = arith.constant 0 : index
    %c0_56 = arith.constant 0 : index
    %145 = vector.load %arg18[%c0_55, %c0_56] : memref<32x128xbf16, #tpu.memory_space<vmem>>, vector<32x128xbf16>
    %cst_57 = arith.constant dense<0.000000e+00> : vector<16x128xf32>
    %146 = tpu.matmul %144, %145, %cst_57 {dimension_numbers = #tpu.dot_dimension_numbers<[1], [0], [0], [1], [0, 0, 1, 1], [], []>} : vector<16x32xbf16>, vector<32x128xbf16>, vector<16x128xf32> -> vector<16x128xf32>
    %c0_58 = arith.constant 0 : index
    %c0_59 = arith.constant 0 : index
    %147 = vector.load %arg19[%c0_58, %c0_59] : memref<1x128xf32, #tpu.memory_space<vmem>>, vector<1x128xf32>
    %148 = vector.broadcast %147 : vector<1x128xf32> to vector<16x128xf32>
    %149 = arith.addf %146, %148 : vector<16x128xf32>
    %150 = vector.extract_strided_slice %149 {offsets = [0, 0], sizes = [16, 64], strides = [1, 1]} : vector<16x128xf32> to vector<16x64xf32>
    %151 = vector.extract_strided_slice %149 {offsets = [0, 64], sizes = [16, 64], strides = [1, 1]} : vector<16x128xf32> to vector<16x64xf32>
    %cst_60 = arith.constant 5.000000e-01 : f32
    %152 = vector.broadcast %cst_60 : f32 to vector<16x64xf32>
    %153 = arith.mulf %152, %150 : vector<16x64xf32>
    %154 = math.tanh %153 : vector<16x64xf32>
    %cst_61 = arith.constant 1.000000e+00 : f32
    %155 = vector.broadcast %cst_61 : f32 to vector<16x64xf32>
    %156 = arith.addf %154, %155 : vector<16x64xf32>
    %cst_62 = arith.constant 5.000000e-01 : f32
    %157 = vector.broadcast %cst_62 : f32 to vector<16x64xf32>
    %158 = arith.mulf %157, %156 : vector<16x64xf32>
    %159 = arith.mulf %150, %158 : vector<16x64xf32>
    %160 = arith.truncf %159 : vector<16x64xf32> to vector<16x64xbf16>
    %c0_63 = arith.constant 0 : index
    %c0_64 = arith.constant 0 : index
    %161 = vector.load %arg20[%c0_63, %c0_64] : memref<64x80xbf16, #tpu.memory_space<vmem>>, vector<64x80xbf16>
    %cst_65 = arith.constant dense<0.000000e+00> : vector<16x80xf32>
    %162 = tpu.matmul %160, %161, %cst_65 {dimension_numbers = #tpu.dot_dimension_numbers<[1], [0], [0], [1], [0, 0, 1, 1], [], []>} : vector<16x64xbf16>, vector<64x80xbf16>, vector<16x80xf32> -> vector<16x80xf32>
    %c0_66 = arith.constant 0 : index
    %c0_67 = arith.constant 0 : index
    %163 = vector.load %arg21[%c0_66, %c0_67] : memref<1x80xf32, #tpu.memory_space<vmem>>, vector<1x80xf32>
    %164 = vector.broadcast %163 : vector<1x80xf32> to vector<16x80xf32>
    %165 = arith.addf %162, %164 : vector<16x80xf32>
    %166 = vector.extract_strided_slice %165 {offsets = [0, 0], sizes = [16, 64], strides = [1, 1]} : vector<16x80xf32> to vector<16x64xf32>
    %cst_68 = arith.constant 0.000000e+00 : f32
    %167 = vector.broadcast %cst_68 : f32 to vector<16x64xf32>
    %168 = arith.maximumf %166, %167 : vector<16x64xf32>
    %169 = math.absf %166 : vector<16x64xf32>
    %cst_69 = arith.constant 0.000000e+00 : f32
    %170 = vector.broadcast %cst_69 : f32 to vector<16x64xf32>
    %171 = arith.subf %170, %169 : vector<16x64xf32>
    %172 = math.exp %171 : vector<16x64xf32>
    %cst_70 = arith.constant 1.000000e+00 : f32
    %173 = vector.broadcast %cst_70 : f32 to vector<16x64xf32>
    %174 = arith.addf %173, %172 : vector<16x64xf32>
    %175 = math.log %174 : vector<16x64xf32>
    %176 = arith.addf %168, %175 : vector<16x64xf32>
    %177 = vector.extract_strided_slice %165 {offsets = [0, 64], sizes = [16, 8], strides = [1, 1]} : vector<16x80xf32> to vector<16x8xf32>
    %178 = vector.extract_strided_slice %165 {offsets = [0, 72], sizes = [16, 8], strides = [1, 1]} : vector<16x80xf32> to vector<16x8xf32>
    %c0_71 = arith.constant 0 : index
    %c0_72 = arith.constant 0 : index
    %179 = vector.load %arg22[%c0_71, %c0_72] : memref<8x64xf32, #tpu.memory_space<vmem>>, vector<8x64xf32>
    %180 = vector.shape_cast %176 : vector<16x64xf32> to vector<16x1x64xf32>
    %181 = vector.shape_cast %179 : vector<8x64xf32> to vector<1x8x64xf32>
    %182 = vector.broadcast %180 : vector<16x1x64xf32> to vector<16x8x64xf32>
    %183 = vector.broadcast %181 : vector<1x8x64xf32> to vector<16x8x64xf32>
    %184 = arith.mulf %182, %183 : vector<16x8x64xf32>
    %185 = math.exp %184 : vector<16x8x64xf32>
    %186 = arith.mulf %176, %159 : vector<16x64xf32>
    %187 = vector.shape_cast %186 : vector<16x64xf32> to vector<16x1x64xf32>
    %188 = vector.shape_cast %177 : vector<16x8xf32> to vector<16x8x1xf32>
    %189 = vector.broadcast %187 : vector<16x1x64xf32> to vector<16x8x64xf32>
    %190 = vector.broadcast %188 : vector<16x8x1xf32> to vector<16x8x64xf32>
    %191 = arith.mulf %189, %190 : vector<16x8x64xf32>
    %cst_73 = arith.constant 0.000000e+00 : f32
    %192 = vector.broadcast %cst_73 : f32 to vector<1x8x64xf32>
    %193 = vector.extract_strided_slice %185 {offsets = [0, 0, 0], sizes = [1, 8, 64], strides = [1, 1, 1]} : vector<16x8x64xf32> to vector<1x8x64xf32>
    %194 = arith.mulf %193, %192 : vector<1x8x64xf32>
    %195 = vector.extract_strided_slice %191 {offsets = [0, 0, 0], sizes = [1, 8, 64], strides = [1, 1, 1]} : vector<16x8x64xf32> to vector<1x8x64xf32>
    %196 = arith.addf %194, %195 : vector<1x8x64xf32>
    %197 = vector.extract_strided_slice %185 {offsets = [1, 0, 0], sizes = [1, 8, 64], strides = [1, 1, 1]} : vector<16x8x64xf32> to vector<1x8x64xf32>
    %198 = arith.mulf %197, %196 : vector<1x8x64xf32>
    %199 = vector.extract_strided_slice %191 {offsets = [1, 0, 0], sizes = [1, 8, 64], strides = [1, 1, 1]} : vector<16x8x64xf32> to vector<1x8x64xf32>
    %200 = arith.addf %198, %199 : vector<1x8x64xf32>
    %201 = vector.extract_strided_slice %185 {offsets = [2, 0, 0], sizes = [1, 8, 64], strides = [1, 1, 1]} : vector<16x8x64xf32> to vector<1x8x64xf32>
    %202 = arith.mulf %201, %200 : vector<1x8x64xf32>
    %203 = vector.extract_strided_slice %191 {offsets = [2, 0, 0], sizes = [1, 8, 64], strides = [1, 1, 1]} : vector<16x8x64xf32> to vector<1x8x64xf32>
    %204 = arith.addf %202, %203 : vector<1x8x64xf32>
    %205 = vector.extract_strided_slice %185 {offsets = [3, 0, 0], sizes = [1, 8, 64], strides = [1, 1, 1]} : vector<16x8x64xf32> to vector<1x8x64xf32>
    %206 = arith.mulf %205, %204 : vector<1x8x64xf32>
    %207 = vector.extract_strided_slice %191 {offsets = [3, 0, 0], sizes = [1, 8, 64], strides = [1, 1, 1]} : vector<16x8x64xf32> to vector<1x8x64xf32>
    %208 = arith.addf %206, %207 : vector<1x8x64xf32>
    %209 = vector.extract_strided_slice %185 {offsets = [4, 0, 0], sizes = [1, 8, 64], strides = [1, 1, 1]} : vector<16x8x64xf32> to vector<1x8x64xf32>
    %210 = arith.mulf %209, %208 : vector<1x8x64xf32>
    %211 = vector.extract_strided_slice %191 {offsets = [4, 0, 0], sizes = [1, 8, 64], strides = [1, 1, 1]} : vector<16x8x64xf32> to vector<1x8x64xf32>
    %212 = arith.addf %210, %211 : vector<1x8x64xf32>
    %213 = vector.extract_strided_slice %185 {offsets = [5, 0, 0], sizes = [1, 8, 64], strides = [1, 1, 1]} : vector<16x8x64xf32> to vector<1x8x64xf32>
    %214 = arith.mulf %213, %212 : vector<1x8x64xf32>
    %215 = vector.extract_strided_slice %191 {offsets = [5, 0, 0], sizes = [1, 8, 64], strides = [1, 1, 1]} : vector<16x8x64xf32> to vector<1x8x64xf32>
    %216 = arith.addf %214, %215 : vector<1x8x64xf32>
    %217 = vector.extract_strided_slice %185 {offsets = [6, 0, 0], sizes = [1, 8, 64], strides = [1, 1, 1]} : vector<16x8x64xf32> to vector<1x8x64xf32>
    %218 = arith.mulf %217, %216 : vector<1x8x64xf32>
    %219 = vector.extract_strided_slice %191 {offsets = [6, 0, 0], sizes = [1, 8, 64], strides = [1, 1, 1]} : vector<16x8x64xf32> to vector<1x8x64xf32>
    %220 = arith.addf %218, %219 : vector<1x8x64xf32>
    %221 = vector.extract_strided_slice %185 {offsets = [7, 0, 0], sizes = [1, 8, 64], strides = [1, 1, 1]} : vector<16x8x64xf32> to vector<1x8x64xf32>
    %222 = arith.mulf %221, %220 : vector<1x8x64xf32>
    %223 = vector.extract_strided_slice %191 {offsets = [7, 0, 0], sizes = [1, 8, 64], strides = [1, 1, 1]} : vector<16x8x64xf32> to vector<1x8x64xf32>
    %224 = arith.addf %222, %223 : vector<1x8x64xf32>
    %225 = vector.extract_strided_slice %185 {offsets = [8, 0, 0], sizes = [1, 8, 64], strides = [1, 1, 1]} : vector<16x8x64xf32> to vector<1x8x64xf32>
    %226 = arith.mulf %225, %224 : vector<1x8x64xf32>
    %227 = vector.extract_strided_slice %191 {offsets = [8, 0, 0], sizes = [1, 8, 64], strides = [1, 1, 1]} : vector<16x8x64xf32> to vector<1x8x64xf32>
    %228 = arith.addf %226, %227 : vector<1x8x64xf32>
    %229 = vector.extract_strided_slice %185 {offsets = [9, 0, 0], sizes = [1, 8, 64], strides = [1, 1, 1]} : vector<16x8x64xf32> to vector<1x8x64xf32>
    %230 = arith.mulf %229, %228 : vector<1x8x64xf32>
    %231 = vector.extract_strided_slice %191 {offsets = [9, 0, 0], sizes = [1, 8, 64], strides = [1, 1, 1]} : vector<16x8x64xf32> to vector<1x8x64xf32>
    %232 = arith.addf %230, %231 : vector<1x8x64xf32>
    %233 = vector.extract_strided_slice %185 {offsets = [10, 0, 0], sizes = [1, 8, 64], strides = [1, 1, 1]} : vector<16x8x64xf32> to vector<1x8x64xf32>
    %234 = arith.mulf %233, %232 : vector<1x8x64xf32>
    %235 = vector.extract_strided_slice %191 {offsets = [10, 0, 0], sizes = [1, 8, 64], strides = [1, 1, 1]} : vector<16x8x64xf32> to vector<1x8x64xf32>
    %236 = arith.addf %234, %235 : vector<1x8x64xf32>
    %237 = vector.extract_strided_slice %185 {offsets = [11, 0, 0], sizes = [1, 8, 64], strides = [1, 1, 1]} : vector<16x8x64xf32> to vector<1x8x64xf32>
    %238 = arith.mulf %237, %236 : vector<1x8x64xf32>
    %239 = vector.extract_strided_slice %191 {offsets = [11, 0, 0], sizes = [1, 8, 64], strides = [1, 1, 1]} : vector<16x8x64xf32> to vector<1x8x64xf32>
    %240 = arith.addf %238, %239 : vector<1x8x64xf32>
    %241 = vector.extract_strided_slice %185 {offsets = [12, 0, 0], sizes = [1, 8, 64], strides = [1, 1, 1]} : vector<16x8x64xf32> to vector<1x8x64xf32>
    %242 = arith.mulf %241, %240 : vector<1x8x64xf32>
    %243 = vector.extract_strided_slice %191 {offsets = [12, 0, 0], sizes = [1, 8, 64], strides = [1, 1, 1]} : vector<16x8x64xf32> to vector<1x8x64xf32>
    %244 = arith.addf %242, %243 : vector<1x8x64xf32>
    %245 = vector.extract_strided_slice %185 {offsets = [13, 0, 0], sizes = [1, 8, 64], strides = [1, 1, 1]} : vector<16x8x64xf32> to vector<1x8x64xf32>
    %246 = arith.mulf %245, %244 : vector<1x8x64xf32>
    %247 = vector.extract_strided_slice %191 {offsets = [13, 0, 0], sizes = [1, 8, 64], strides = [1, 1, 1]} : vector<16x8x64xf32> to vector<1x8x64xf32>
    %248 = arith.addf %246, %247 : vector<1x8x64xf32>
    %249 = vector.extract_strided_slice %185 {offsets = [14, 0, 0], sizes = [1, 8, 64], strides = [1, 1, 1]} : vector<16x8x64xf32> to vector<1x8x64xf32>
    %250 = arith.mulf %249, %248 : vector<1x8x64xf32>
    %251 = vector.extract_strided_slice %191 {offsets = [14, 0, 0], sizes = [1, 8, 64], strides = [1, 1, 1]} : vector<16x8x64xf32> to vector<1x8x64xf32>
    %252 = arith.addf %250, %251 : vector<1x8x64xf32>
    %253 = vector.extract_strided_slice %185 {offsets = [15, 0, 0], sizes = [1, 8, 64], strides = [1, 1, 1]} : vector<16x8x64xf32> to vector<1x8x64xf32>
    %254 = arith.mulf %253, %252 : vector<1x8x64xf32>
    %255 = vector.extract_strided_slice %191 {offsets = [15, 0, 0], sizes = [1, 8, 64], strides = [1, 1, 1]} : vector<16x8x64xf32> to vector<1x8x64xf32>
    %256 = arith.addf %254, %255 : vector<1x8x64xf32>
    %257 = tpu.concatenate %196, %200, %204, %208, %212, %216, %220, %224, %228, %232, %236, %240, %244, %248, %252, %256 in 0 : vector<1x8x64xf32>, vector<1x8x64xf32>, vector<1x8x64xf32>, vector<1x8x64xf32>, vector<1x8x64xf32>, vector<1x8x64xf32>, vector<1x8x64xf32>, vector<1x8x64xf32>, vector<1x8x64xf32>, vector<1x8x64xf32>, vector<1x8x64xf32>, vector<1x8x64xf32>, vector<1x8x64xf32>, vector<1x8x64xf32>, vector<1x8x64xf32>, vector<1x8x64xf32> -> vector<16x8x64xf32>
    %258 = vector.shape_cast %178 : vector<16x8xf32> to vector<16x8x1xf32>
    %259 = vector.broadcast %258 : vector<16x8x1xf32> to vector<16x8x64xf32>
    %260 = arith.mulf %257, %259 : vector<16x8x64xf32>
    %cst_74 = arith.constant dense<0.000000e+00> : vector<16x64xf32>
    %261 = vector.multi_reduction <add>, %260, %cst_74 [1] : vector<16x8x64xf32> to vector<16x64xf32>
    %c0_75 = arith.constant 0 : index
    %c0_76 = arith.constant 0 : index
    %262 = vector.load %arg23[%c0_75, %c0_76] : memref<1x64xf32, #tpu.memory_space<vmem>>, vector<1x64xf32>
    %263 = vector.broadcast %262 : vector<1x64xf32> to vector<16x64xf32>
    %264 = arith.mulf %263, %159 : vector<16x64xf32>
    %265 = arith.addf %261, %264 : vector<16x64xf32>
    %cst_77 = arith.constant 5.000000e-01 : f32
    %266 = vector.broadcast %cst_77 : f32 to vector<16x64xf32>
    %267 = arith.mulf %266, %151 : vector<16x64xf32>
    %268 = math.tanh %267 : vector<16x64xf32>
    %cst_78 = arith.constant 1.000000e+00 : f32
    %269 = vector.broadcast %cst_78 : f32 to vector<16x64xf32>
    %270 = arith.addf %268, %269 : vector<16x64xf32>
    %cst_79 = arith.constant 5.000000e-01 : f32
    %271 = vector.broadcast %cst_79 : f32 to vector<16x64xf32>
    %272 = arith.mulf %271, %270 : vector<16x64xf32>
    %273 = arith.mulf %151, %272 : vector<16x64xf32>
    %274 = arith.mulf %265, %273 : vector<16x64xf32>
    %275 = arith.truncf %274 : vector<16x64xf32> to vector<16x64xbf16>
    %c0_80 = arith.constant 0 : index
    %c0_81 = arith.constant 0 : index
    %276 = vector.load %arg24[%c0_80, %c0_81] : memref<64x32xbf16, #tpu.memory_space<vmem>>, vector<64x32xbf16>
    %cst_82 = arith.constant dense<0.000000e+00> : vector<16x32xf32>
    %277 = tpu.matmul %275, %276, %cst_82 {dimension_numbers = #tpu.dot_dimension_numbers<[1], [0], [0], [1], [0, 0, 1, 1], [], []>} : vector<16x64xbf16>, vector<64x32xbf16>, vector<16x32xf32> -> vector<16x32xf32>
    %c0_83 = arith.constant 0 : index
    %c0_84 = arith.constant 0 : index
    %278 = vector.load %arg25[%c0_83, %c0_84] : memref<1x32xf32, #tpu.memory_space<vmem>>, vector<1x32xf32>
    %279 = vector.broadcast %278 : vector<1x32xf32> to vector<16x32xf32>
    %280 = arith.addf %277, %279 : vector<16x32xf32>
    %281 = arith.addf %119, %280 : vector<16x32xf32>
    %c0_85 = arith.constant 0 : index
    %c0_86 = arith.constant 0 : index
    %282 = vector.load %arg26[%c0_85, %c0_86] : memref<1x32xf32, #tpu.memory_space<vmem>>, vector<1x32xf32>
    %c0_87 = arith.constant 0 : index
    %c0_88 = arith.constant 0 : index
    %283 = vector.load %arg27[%c0_87, %c0_88] : memref<1x32xf32, #tpu.memory_space<vmem>>, vector<1x32xf32>
    %cst_89 = arith.constant dense<0.000000e+00> : vector<16xf32>
    %284 = vector.multi_reduction <add>, %281, %cst_89 [1] : vector<16x32xf32> to vector<16xf32>
    %285 = vector.shape_cast %284 : vector<16xf32> to vector<16x1xf32>
    %cst_90 = arith.constant 3.200000e+01 : f32
    %286 = vector.broadcast %cst_90 : f32 to vector<16x1xf32>
    %287 = arith.divf %285, %286 : vector<16x1xf32>
    %288 = vector.broadcast %287 : vector<16x1xf32> to vector<16x32xf32>
    %289 = arith.subf %281, %288 : vector<16x32xf32>
    %290 = arith.mulf %289, %289 : vector<16x32xf32>
    %cst_91 = arith.constant dense<0.000000e+00> : vector<16xf32>
    %291 = vector.multi_reduction <add>, %290, %cst_91 [1] : vector<16x32xf32> to vector<16xf32>
    %292 = vector.shape_cast %291 : vector<16xf32> to vector<16x1xf32>
    %cst_92 = arith.constant 3.200000e+01 : f32
    %293 = vector.broadcast %cst_92 : f32 to vector<16x1xf32>
    %294 = arith.divf %292, %293 : vector<16x1xf32>
    %295 = vector.broadcast %287 : vector<16x1xf32> to vector<16x32xf32>
    %296 = arith.subf %281, %295 : vector<16x32xf32>
    %cst_93 = arith.constant 9.99999974E-6 : f32
    %297 = vector.broadcast %cst_93 : f32 to vector<16x1xf32>
    %298 = arith.addf %294, %297 : vector<16x1xf32>
    %299 = math.rsqrt %298 : vector<16x1xf32>
    %300 = vector.broadcast %299 : vector<16x1xf32> to vector<16x32xf32>
    %301 = arith.mulf %296, %300 : vector<16x32xf32>
    %302 = vector.broadcast %282 : vector<1x32xf32> to vector<16x32xf32>
    %303 = arith.mulf %301, %302 : vector<16x32xf32>
    %304 = vector.broadcast %283 : vector<1x32xf32> to vector<16x32xf32>
    %305 = arith.addf %303, %304 : vector<16x32xf32>
    %c0_94 = arith.constant 0 : index
    %c0_95 = arith.constant 0 : index
    %306 = vector.load %arg4[%c0_94, %c0_95] : memref<4x16xbf16, #tpu.memory_space<vmem>>, vector<4x16xbf16>
    %307 = arith.truncf %305 : vector<16x32xf32> to vector<16x32xbf16>
    %cst_96 = arith.constant dense<0.000000e+00> : vector<4x32xf32>
    %308 = tpu.matmul %306, %307, %cst_96 {dimension_numbers = #tpu.dot_dimension_numbers<[1], [0], [0], [1], [0, 0, 1, 1], [], []>} : vector<4x16xbf16>, vector<16x32xbf16>, vector<4x32xf32> -> vector<4x32xf32>
    %309 = arith.truncf %308 : vector<4x32xf32> to vector<4x32xbf16>
    %c0_97 = arith.constant 0 : index
    %c0_98 = arith.constant 0 : index
    %310 = vector.load %arg28[%c0_97, %c0_98] : memref<32x32xbf16, #tpu.memory_space<vmem>>, vector<32x32xbf16>
    %cst_99 = arith.constant dense<0.000000e+00> : vector<4x32xf32>
    %311 = tpu.matmul %309, %310, %cst_99 {dimension_numbers = #tpu.dot_dimension_numbers<[1], [0], [0], [1], [0, 0, 1, 1], [], []>} : vector<4x32xbf16>, vector<32x32xbf16>, vector<4x32xf32> -> vector<4x32xf32>
    %c0_100 = arith.constant 0 : index
    %c0_101 = arith.constant 0 : index
    %312 = vector.load %arg29[%c0_100, %c0_101] : memref<1x32xf32, #tpu.memory_space<vmem>>, vector<1x32xf32>
    %313 = vector.broadcast %312 : vector<1x32xf32> to vector<4x32xf32>
    %314 = arith.addf %311, %313 : vector<4x32xf32>
    %cst_102 = arith.constant 5.000000e-01 : f32
    %315 = vector.broadcast %cst_102 : f32 to vector<4x32xf32>
    %316 = arith.mulf %315, %314 : vector<4x32xf32>
    %cst_103 = arith.constant 4.471500e-02 : f32
    %317 = vector.broadcast %cst_103 : f32 to vector<4x32xf32>
    %318 = arith.mulf %317, %314 : vector<4x32xf32>
    %319 = arith.mulf %318, %314 : vector<4x32xf32>
    %320 = arith.mulf %319, %314 : vector<4x32xf32>
    %321 = arith.addf %314, %320 : vector<4x32xf32>
    %cst_104 = arith.constant 0.797884583 : f32
    %322 = vector.broadcast %cst_104 : f32 to vector<4x32xf32>
    %323 = arith.mulf %322, %321 : vector<4x32xf32>
    %324 = math.tanh %323 : vector<4x32xf32>
    %cst_105 = arith.constant 1.000000e+00 : f32
    %325 = vector.broadcast %cst_105 : f32 to vector<4x32xf32>
    %326 = arith.addf %325, %324 : vector<4x32xf32>
    %327 = arith.mulf %316, %326 : vector<4x32xf32>
    %328 = arith.truncf %327 : vector<4x32xf32> to vector<4x32xbf16>
    %c0_106 = arith.constant 0 : index
    %c0_107 = arith.constant 0 : index
    %329 = vector.load %arg30[%c0_106, %c0_107] : memref<32x32xbf16, #tpu.memory_space<vmem>>, vector<32x32xbf16>
    %cst_108 = arith.constant dense<0.000000e+00> : vector<4x32xf32>
    %330 = tpu.matmul %328, %329, %cst_108 {dimension_numbers = #tpu.dot_dimension_numbers<[1], [0], [0], [1], [0, 0, 1, 1], [], []>} : vector<4x32xbf16>, vector<32x32xbf16>, vector<4x32xf32> -> vector<4x32xf32>
    %c0_109 = arith.constant 0 : index
    %c0_110 = arith.constant 0 : index
    %331 = vector.load %arg31[%c0_109, %c0_110] : memref<1x32xf32, #tpu.memory_space<vmem>>, vector<1x32xf32>
    %332 = vector.broadcast %331 : vector<1x32xf32> to vector<4x32xf32>
    %333 = arith.addf %330, %332 : vector<4x32xf32>
    %c0_111 = arith.constant 0 : index
    %c0_112 = arith.constant 0 : index
    %334 = vector.load %arg5[%c0_111, %c0_112] : memref<16x4xbf16, #tpu.memory_space<vmem>>, vector<16x4xbf16>
    %335 = arith.truncf %333 : vector<4x32xf32> to vector<4x32xbf16>
    %cst_113 = arith.constant dense<0.000000e+00> : vector<16x32xf32>
    %336 = tpu.matmul %334, %335, %cst_113 {dimension_numbers = #tpu.dot_dimension_numbers<[1], [0], [0], [1], [0, 0, 1, 1], [], []>} : vector<16x4xbf16>, vector<4x32xbf16>, vector<16x32xf32> -> vector<16x32xf32>
    %337 = arith.addf %281, %336 : vector<16x32xf32>
    %c0_114 = arith.constant 0 : index
    %c0_115 = arith.constant 0 : index
    %c0_116 = arith.constant 0 : index
    %338 = vector.load %arg32[%c0_114, %c0_115, %c0_116] : memref<1x16x32xf32, #tpu.memory_space<vmem>>, vector<1x16x32xf32>
    %339 = vector.shape_cast %338 : vector<1x16x32xf32> to vector<16x32xf32>
    %340 = vector.shape_cast %337 : vector<16x32xf32> to vector<1x16x32xf32>
    tpu.vector_store %arg32[%c0_114, %c0_115, %c0_116], %340 {strides = array<i32>} : memref<1x16x32xf32, #tpu.memory_space<vmem>>, vector<1x16x32xf32>,
    return
  }
  func.func @transform_0(%arg0: i32) -> (i32, i32, i32) {
    %c0_i32 = arith.constant 0 : i32
    %c0_i32_0 = arith.constant 0 : i32
    %c0_i32_1 = arith.constant 0 : i32
    return %arg0, %c0_i32, %c0_i32_0 : i32, i32, i32
  }
  func.func @transform_1(%arg0: i32) -> (i32, i32) {
    %c0_i32 = arith.constant 0 : i32
    %c0_i32_0 = arith.constant 0 : i32
    %c0_i32_1 = arith.constant 0 : i32
    return %c0_i32, %c0_i32_0 : i32, i32
  }
  func.func @transform_2(%arg0: i32) -> (i32, i32) {
    %c0_i32 = arith.constant 0 : i32
    %c0_i32_0 = arith.constant 0 : i32
    %c0_i32_1 = arith.constant 0 : i32
    return %c0_i32, %c0_i32_0 : i32, i32
  }
  func.func @transform_3(%arg0: i32) -> (i32, i32) {
    %c0_i32 = arith.constant 0 : i32
    %c0_i32_0 = arith.constant 0 : i32
    %c0_i32_1 = arith.constant 0 : i32
    return %c0_i32, %c0_i32_0 : i32, i32
  }
  func.func @transform_4(%arg0: i32) -> (i32, i32) {
    %c0_i32 = arith.constant 0 : i32
    %c0_i32_0 = arith.constant 0 : i32
    %c0_i32_1 = arith.constant 0 : i32
    return %c0_i32, %c0_i32_0 : i32, i32
  }
  func.func @transform_5(%arg0: i32) -> (i32, i32) {
    %c0_i32 = arith.constant 0 : i32
    %c0_i32_0 = arith.constant 0 : i32
    %c0_i32_1 = arith.constant 0 : i32
    return %c0_i32, %c0_i32_0 : i32, i32
  }
  func.func @transform_6(%arg0: i32) -> (i32, i32) {
    %c0_i32 = arith.constant 0 : i32
    %c0_i32_0 = arith.constant 0 : i32
    %c0_i32_1 = arith.constant 0 : i32
    return %c0_i32, %c0_i32_0 : i32, i32
  }
  func.func @transform_7(%arg0: i32) -> (i32, i32) {
    %c0_i32 = arith.constant 0 : i32
    %c0_i32_0 = arith.constant 0 : i32
    %c0_i32_1 = arith.constant 0 : i32
    return %c0_i32, %c0_i32_0 : i32, i32
  }
  func.func @transform_8(%arg0: i32) -> (i32, i32) {
    %c0_i32 = arith.constant 0 : i32
    %c0_i32_0 = arith.constant 0 : i32
    %c0_i32_1 = arith.constant 0 : i32
    return %c0_i32, %c0_i32_0 : i32, i32
  }
  func.func @transform_9(%arg0: i32) -> (i32, i32) {
    %c0_i32 = arith.constant 0 : i32
    %c0_i32_0 = arith.constant 0 : i32
    %c0_i32_1 = arith.constant 0 : i32
    return %c0_i32, %c0_i32_0 : i32, i32
  }
  func.func @transform_10(%arg0: i32) -> (i32, i32) {
    %c0_i32 = arith.constant 0 : i32
    %c0_i32_0 = arith.constant 0 : i32
    %c0_i32_1 = arith.constant 0 : i32
    return %c0_i32, %c0_i32_0 : i32, i32
  }
  func.func @transform_11(%arg0: i32) -> (i32, i32) {
    %c0_i32 = arith.constant 0 : i32
    %c0_i32_0 = arith.constant 0 : i32
    %c0_i32_1 = arith.constant 0 : i32
    return %c0_i32, %c0_i32_0 : i32, i32
  }
  func.func @transform_12(%arg0: i32) -> (i32, i32) {
    %c0_i32 = arith.constant 0 : i32
    %c0_i32_0 = arith.constant 0 : i32
    %c0_i32_1 = arith.constant 0 : i32
    return %c0_i32, %c0_i32_0 : i32, i32
  }
  func.func @transform_13(%arg0: i32) -> (i32, i32) {
    %c0_i32 = arith.constant 0 : i32
    %c0_i32_0 = arith.constant 0 : i32
    %c0_i32_1 = arith.constant 0 : i32
    return %c0_i32, %c0_i32_0 : i32, i32
  }
  func.func @transform_14(%arg0: i32) -> (i32, i32) {
    %c0_i32 = arith.constant 0 : i32
    %c0_i32_0 = arith.constant 0 : i32
    %c0_i32_1 = arith.constant 0 : i32
    return %c0_i32, %c0_i32_0 : i32, i32
  }
  func.func @transform_15(%arg0: i32) -> (i32, i32) {
    %c0_i32 = arith.constant 0 : i32
    %c0_i32_0 = arith.constant 0 : i32
    %c0_i32_1 = arith.constant 0 : i32
    return %c0_i32, %c0_i32_0 : i32, i32
  }
  func.func @transform_16(%arg0: i32) -> (i32, i32) {
    %c0_i32 = arith.constant 0 : i32
    %c0_i32_0 = arith.constant 0 : i32
    %c0_i32_1 = arith.constant 0 : i32
    return %c0_i32, %c0_i32_0 : i32, i32
  }
  func.func @transform_17(%arg0: i32) -> (i32, i32) {
    %c0_i32 = arith.constant 0 : i32
    %c0_i32_0 = arith.constant 0 : i32
    %c0_i32_1 = arith.constant 0 : i32
    return %c0_i32, %c0_i32_0 : i32, i32
  }
  func.func @transform_18(%arg0: i32) -> (i32, i32) {
    %c0_i32 = arith.constant 0 : i32
    %c0_i32_0 = arith.constant 0 : i32
    %c0_i32_1 = arith.constant 0 : i32
    return %c0_i32, %c0_i32_0 : i32, i32
  }
  func.func @transform_19(%arg0: i32) -> (i32, i32) {
    %c0_i32 = arith.constant 0 : i32
    %c0_i32_0 = arith.constant 0 : i32
    %c0_i32_1 = arith.constant 0 : i32
    return %c0_i32, %c0_i32_0 : i32, i32
  }
  func.func @transform_20(%arg0: i32) -> (i32, i32) {
    %c0_i32 = arith.constant 0 : i32
    %c0_i32_0 = arith.constant 0 : i32
    %c0_i32_1 = arith.constant 0 : i32
    return %c0_i32, %c0_i32_0 : i32, i32
  }
  func.func @transform_21(%arg0: i32) -> (i32, i32) {
    %c0_i32 = arith.constant 0 : i32
    %c0_i32_0 = arith.constant 0 : i32
    %c0_i32_1 = arith.constant 0 : i32
    return %c0_i32, %c0_i32_0 : i32, i32
  }
  func.func @transform_22(%arg0: i32) -> (i32, i32) {
    %c0_i32 = arith.constant 0 : i32
    %c0_i32_0 = arith.constant 0 : i32
    %c0_i32_1 = arith.constant 0 : i32
    return %c0_i32, %c0_i32_0 : i32, i32
  }
  func.func @transform_23(%arg0: i32) -> (i32, i32) {
    %c0_i32 = arith.constant 0 : i32
    %c0_i32_0 = arith.constant 0 : i32
    %c0_i32_1 = arith.constant 0 : i32
    return %c0_i32, %c0_i32_0 : i32, i32
  }
  func.func @transform_24(%arg0: i32) -> (i32, i32) {
    %c0_i32 = arith.constant 0 : i32
    %c0_i32_0 = arith.constant 0 : i32
    %c0_i32_1 = arith.constant 0 : i32
    return %c0_i32, %c0_i32_0 : i32, i32
  }
  func.func @transform_25(%arg0: i32) -> (i32, i32) {
    %c0_i32 = arith.constant 0 : i32
    %c0_i32_0 = arith.constant 0 : i32
    %c0_i32_1 = arith.constant 0 : i32
    return %c0_i32, %c0_i32_0 : i32, i32
  }
  func.func @transform_26(%arg0: i32) -> (i32, i32) {
    %c0_i32 = arith.constant 0 : i32
    %c0_i32_0 = arith.constant 0 : i32
    %c0_i32_1 = arith.constant 0 : i32
    return %c0_i32, %c0_i32_0 : i32, i32
  }
  func.func @transform_27(%arg0: i32) -> (i32, i32) {
    %c0_i32 = arith.constant 0 : i32
    %c0_i32_0 = arith.constant 0 : i32
    %c0_i32_1 = arith.constant 0 : i32
    return %c0_i32, %c0_i32_0 : i32, i32
  }
  func.func @transform_28(%arg0: i32) -> (i32, i32) {
    %c0_i32 = arith.constant 0 : i32
    %c0_i32_0 = arith.constant 0 : i32
    %c0_i32_1 = arith.constant 0 : i32
    return %c0_i32, %c0_i32_0 : i32, i32
  }
  func.func @transform_29(%arg0: i32) -> (i32, i32) {
    %c0_i32 = arith.constant 0 : i32
    %c0_i32_0 = arith.constant 0 : i32
    %c0_i32_1 = arith.constant 0 : i32
    return %c0_i32, %c0_i32_0 : i32, i32
  }
  func.func @transform_30(%arg0: i32) -> (i32, i32) {
    %c0_i32 = arith.constant 0 : i32
    %c0_i32_0 = arith.constant 0 : i32
    %c0_i32_1 = arith.constant 0 : i32
    return %c0_i32, %c0_i32_0 : i32, i32
  }
  func.func @transform_31(%arg0: i32) -> (i32, i32, i32) {
    %c0_i32 = arith.constant 0 : i32
    %c0_i32_0 = arith.constant 0 : i32
    %c0_i32_1 = arith.constant 0 : i32
    return %arg0, %c0_i32, %c0_i32_0 : i32, i32, i32
  }
}

module attributes {stable_mosaic.version = 11 : i64} {
  func.func @_ln_linear_kernel(%arg0: i32, %arg1: memref<1x4x128xf32, #tpu.memory_space<vmem>>, %arg2: memref<1x128xf32, #tpu.memory_space<vmem>>, %arg3: memref<1x128xf32, #tpu.memory_space<vmem>>, %arg4: memref<128x64xbf16, #tpu.memory_space<vmem>>, %arg5: memref<1x4x64xf32, #tpu.memory_space<vmem>>) attributes {dimension_semantics = [#tpu.dimension_semantics<parallel>], iteration_bounds = array<i64: 2>, scalar_prefetch = 0 : i64, scratch_operands = 0 : i64, tpu.core_type = #tpu.core_type<tc>, window_params = [{transform_indices = @transform_0, window_bounds = array<i64: 1, 4, 128>}, {pipeline_mode = #tpu.pipeline_mode<synchronous>, transform_indices = @transform_1, window_bounds = array<i64: 1, 128>}, {pipeline_mode = #tpu.pipeline_mode<synchronous>, transform_indices = @transform_2, window_bounds = array<i64: 1, 128>}, {pipeline_mode = #tpu.pipeline_mode<synchronous>, transform_indices = @transform_3, window_bounds = array<i64: 128, 64>}, {transform_indices = @transform_4, window_bounds = array<i64: 1, 4, 64>}]} {
    %c0 = arith.constant 0 : index
    %c0_0 = arith.constant 0 : index
    %c0_1 = arith.constant 0 : index
    %0 = vector.load %arg1[%c0, %c0_0, %c0_1] : memref<1x4x128xf32, #tpu.memory_space<vmem>>, vector<1x4x128xf32>
    %1 = vector.shape_cast %0 : vector<1x4x128xf32> to vector<4x128xf32>
    %c0_2 = arith.constant 0 : index
    %c0_3 = arith.constant 0 : index
    %2 = vector.load %arg2[%c0_2, %c0_3] : memref<1x128xf32, #tpu.memory_space<vmem>>, vector<1x128xf32>
    %c0_4 = arith.constant 0 : index
    %c0_5 = arith.constant 0 : index
    %3 = vector.load %arg3[%c0_4, %c0_5] : memref<1x128xf32, #tpu.memory_space<vmem>>, vector<1x128xf32>
    %cst = arith.constant dense<0.000000e+00> : vector<4xf32>
    %4 = vector.multi_reduction <add>, %1, %cst [1] : vector<4x128xf32> to vector<4xf32>
    %5 = vector.shape_cast %4 : vector<4xf32> to vector<4x1xf32>
    %cst_6 = arith.constant 1.280000e+02 : f32
    %6 = vector.broadcast %cst_6 : f32 to vector<4x1xf32>
    %7 = arith.divf %5, %6 : vector<4x1xf32>
    %8 = vector.broadcast %7 : vector<4x1xf32> to vector<4x128xf32>
    %9 = arith.subf %1, %8 : vector<4x128xf32>
    %10 = arith.mulf %9, %9 : vector<4x128xf32>
    %cst_7 = arith.constant dense<0.000000e+00> : vector<4xf32>
    %11 = vector.multi_reduction <add>, %10, %cst_7 [1] : vector<4x128xf32> to vector<4xf32>
    %12 = vector.shape_cast %11 : vector<4xf32> to vector<4x1xf32>
    %cst_8 = arith.constant 1.280000e+02 : f32
    %13 = vector.broadcast %cst_8 : f32 to vector<4x1xf32>
    %14 = arith.divf %12, %13 : vector<4x1xf32>
    %15 = vector.broadcast %7 : vector<4x1xf32> to vector<4x128xf32>
    %16 = arith.subf %1, %15 : vector<4x128xf32>
    %cst_9 = arith.constant 9.99999974E-6 : f32
    %17 = vector.broadcast %cst_9 : f32 to vector<4x1xf32>
    %18 = arith.addf %14, %17 : vector<4x1xf32>
    %19 = math.rsqrt %18 : vector<4x1xf32>
    %20 = vector.broadcast %19 : vector<4x1xf32> to vector<4x128xf32>
    %21 = arith.mulf %16, %20 : vector<4x128xf32>
    %22 = vector.broadcast %2 : vector<1x128xf32> to vector<4x128xf32>
    %23 = arith.mulf %21, %22 : vector<4x128xf32>
    %24 = vector.broadcast %3 : vector<1x128xf32> to vector<4x128xf32>
    %25 = arith.addf %23, %24 : vector<4x128xf32>
    %26 = arith.truncf %25 : vector<4x128xf32> to vector<4x128xbf16>
    %c0_10 = arith.constant 0 : index
    %c0_11 = arith.constant 0 : index
    %27 = vector.load %arg4[%c0_10, %c0_11] : memref<128x64xbf16, #tpu.memory_space<vmem>>, vector<128x64xbf16>
    %cst_12 = arith.constant dense<0.000000e+00> : vector<4x64xf32>
    %28 = tpu.matmul %26, %27, %cst_12 {dimension_numbers = #tpu.dot_dimension_numbers<[1], [0], [0], [1], [0, 0, 1, 1], [], []>} : vector<4x128xbf16>, vector<128x64xbf16>, vector<4x64xf32> -> vector<4x64xf32>
    %c0_13 = arith.constant 0 : index
    %c0_14 = arith.constant 0 : index
    %c0_15 = arith.constant 0 : index
    %29 = vector.load %arg5[%c0_13, %c0_14, %c0_15] : memref<1x4x64xf32, #tpu.memory_space<vmem>>, vector<1x4x64xf32>
    %30 = vector.shape_cast %29 : vector<1x4x64xf32> to vector<4x64xf32>
    %31 = vector.shape_cast %28 : vector<4x64xf32> to vector<1x4x64xf32>
    tpu.vector_store %arg5[%c0_13, %c0_14, %c0_15], %31 {strides = array<i32>} : memref<1x4x64xf32, #tpu.memory_space<vmem>>, vector<1x4x64xf32>,
    return
  }
  func.func @transform_0(%arg0: i32) -> (i32, i32, i32) {
    %c0_i32 = arith.constant 0 : i32
    %c0_i32_0 = arith.constant 0 : i32
    %c0_i32_1 = arith.constant 0 : i32
    return %arg0, %c0_i32, %c0_i32_0 : i32, i32, i32
  }
  func.func @transform_1(%arg0: i32) -> (i32, i32) {
    %c0_i32 = arith.constant 0 : i32
    %c0_i32_0 = arith.constant 0 : i32
    %c0_i32_1 = arith.constant 0 : i32
    return %c0_i32, %c0_i32_0 : i32, i32
  }
  func.func @transform_2(%arg0: i32) -> (i32, i32) {
    %c0_i32 = arith.constant 0 : i32
    %c0_i32_0 = arith.constant 0 : i32
    %c0_i32_1 = arith.constant 0 : i32
    return %c0_i32, %c0_i32_0 : i32, i32
  }
  func.func @transform_3(%arg0: i32) -> (i32, i32) {
    %c0_i32 = arith.constant 0 : i32
    %c0_i32_0 = arith.constant 0 : i32
    %c0_i32_1 = arith.constant 0 : i32
    return %c0_i32, %c0_i32_0 : i32, i32
  }
  func.func @transform_4(%arg0: i32) -> (i32, i32, i32) {
    %c0_i32 = arith.constant 0 : i32
    %c0_i32_0 = arith.constant 0 : i32
    %c0_i32_1 = arith.constant 0 : i32
    return %arg0, %c0_i32, %c0_i32_0 : i32, i32, i32
  }
}

module attributes {stable_mosaic.version = 11 : i64} {
  func.func @_fused_block_kernel(%arg0: i32, %arg1: memref<1x4x64xf32, #tpu.memory_space<vmem>>, %arg2: memref<4x4xf32, #tpu.memory_space<vmem>>, %arg3: memref<4x4xf32, #tpu.memory_space<vmem>>, %arg4: memref<1x4xbf16, #tpu.memory_space<vmem>>, %arg5: memref<4x1xbf16, #tpu.memory_space<vmem>>, %arg6: memref<1x64xf32, #tpu.memory_space<vmem>>, %arg7: memref<1x64xf32, #tpu.memory_space<vmem>>, %arg8: memref<64x256xbf16, #tpu.memory_space<vmem>>, %arg9: memref<1x256xf32, #tpu.memory_space<vmem>>, %arg10: memref<128x144xbf16, #tpu.memory_space<vmem>>, %arg11: memref<1x144xf32, #tpu.memory_space<vmem>>, %arg12: memref<8x128xf32, #tpu.memory_space<vmem>>, %arg13: memref<1x128xf32, #tpu.memory_space<vmem>>, %arg14: memref<128x64xbf16, #tpu.memory_space<vmem>>, %arg15: memref<1x64xf32, #tpu.memory_space<vmem>>, %arg16: memref<1x64xf32, #tpu.memory_space<vmem>>, %arg17: memref<1x64xf32, #tpu.memory_space<vmem>>, %arg18: memref<64x256xbf16, #tpu.memory_space<vmem>>, %arg19: memref<1x256xf32, #tpu.memory_space<vmem>>, %arg20: memref<128x144xbf16, #tpu.memory_space<vmem>>, %arg21: memref<1x144xf32, #tpu.memory_space<vmem>>, %arg22: memref<8x128xf32, #tpu.memory_space<vmem>>, %arg23: memref<1x128xf32, #tpu.memory_space<vmem>>, %arg24: memref<128x64xbf16, #tpu.memory_space<vmem>>, %arg25: memref<1x64xf32, #tpu.memory_space<vmem>>, %arg26: memref<1x64xf32, #tpu.memory_space<vmem>>, %arg27: memref<1x64xf32, #tpu.memory_space<vmem>>, %arg28: memref<64x64xbf16, #tpu.memory_space<vmem>>, %arg29: memref<1x64xf32, #tpu.memory_space<vmem>>, %arg30: memref<64x64xbf16, #tpu.memory_space<vmem>>, %arg31: memref<1x64xf32, #tpu.memory_space<vmem>>, %arg32: memref<1x4x64xf32, #tpu.memory_space<vmem>>) attributes {dimension_semantics = [#tpu.dimension_semantics<parallel>], iteration_bounds = array<i64: 2>, scalar_prefetch = 0 : i64, scratch_operands = 0 : i64, tpu.core_type = #tpu.core_type<tc>, window_params = [{transform_indices = @transform_0, window_bounds = array<i64: 1, 4, 64>}, {pipeline_mode = #tpu.pipeline_mode<synchronous>, transform_indices = @transform_1, window_bounds = array<i64: 4, 4>}, {pipeline_mode = #tpu.pipeline_mode<synchronous>, transform_indices = @transform_2, window_bounds = array<i64: 4, 4>}, {pipeline_mode = #tpu.pipeline_mode<synchronous>, transform_indices = @transform_3, window_bounds = array<i64: 1, 4>}, {pipeline_mode = #tpu.pipeline_mode<synchronous>, transform_indices = @transform_4, window_bounds = array<i64: 4, 1>}, {pipeline_mode = #tpu.pipeline_mode<synchronous>, transform_indices = @transform_5, window_bounds = array<i64: 1, 64>}, {pipeline_mode = #tpu.pipeline_mode<synchronous>, transform_indices = @transform_6, window_bounds = array<i64: 1, 64>}, {pipeline_mode = #tpu.pipeline_mode<synchronous>, transform_indices = @transform_7, window_bounds = array<i64: 64, 256>}, {pipeline_mode = #tpu.pipeline_mode<synchronous>, transform_indices = @transform_8, window_bounds = array<i64: 1, 256>}, {pipeline_mode = #tpu.pipeline_mode<synchronous>, transform_indices = @transform_9, window_bounds = array<i64: 128, 144>}, {pipeline_mode = #tpu.pipeline_mode<synchronous>, transform_indices = @transform_10, window_bounds = array<i64: 1, 144>}, {pipeline_mode = #tpu.pipeline_mode<synchronous>, transform_indices = @transform_11, window_bounds = array<i64: 8, 128>}, {pipeline_mode = #tpu.pipeline_mode<synchronous>, transform_indices = @transform_12, window_bounds = array<i64: 1, 128>}, {pipeline_mode = #tpu.pipeline_mode<synchronous>, transform_indices = @transform_13, window_bounds = array<i64: 128, 64>}, {pipeline_mode = #tpu.pipeline_mode<synchronous>, transform_indices = @transform_14, window_bounds = array<i64: 1, 64>}, {pipeline_mode = #tpu.pipeline_mode<synchronous>, transform_indices = @transform_15, window_bounds = array<i64: 1, 64>}, {pipeline_mode = #tpu.pipeline_mode<synchronous>, transform_indices = @transform_16, window_bounds = array<i64: 1, 64>}, {pipeline_mode = #tpu.pipeline_mode<synchronous>, transform_indices = @transform_17, window_bounds = array<i64: 64, 256>}, {pipeline_mode = #tpu.pipeline_mode<synchronous>, transform_indices = @transform_18, window_bounds = array<i64: 1, 256>}, {pipeline_mode = #tpu.pipeline_mode<synchronous>, transform_indices = @transform_19, window_bounds = array<i64: 128, 144>}, {pipeline_mode = #tpu.pipeline_mode<synchronous>, transform_indices = @transform_20, window_bounds = array<i64: 1, 144>}, {pipeline_mode = #tpu.pipeline_mode<synchronous>, transform_indices = @transform_21, window_bounds = array<i64: 8, 128>}, {pipeline_mode = #tpu.pipeline_mode<synchronous>, transform_indices = @transform_22, window_bounds = array<i64: 1, 128>}, {pipeline_mode = #tpu.pipeline_mode<synchronous>, transform_indices = @transform_23, window_bounds = array<i64: 128, 64>}, {pipeline_mode = #tpu.pipeline_mode<synchronous>, transform_indices = @transform_24, window_bounds = array<i64: 1, 64>}, {pipeline_mode = #tpu.pipeline_mode<synchronous>, transform_indices = @transform_25, window_bounds = array<i64: 1, 64>}, {pipeline_mode = #tpu.pipeline_mode<synchronous>, transform_indices = @transform_26, window_bounds = array<i64: 1, 64>}, {pipeline_mode = #tpu.pipeline_mode<synchronous>, transform_indices = @transform_27, window_bounds = array<i64: 64, 64>}, {pipeline_mode = #tpu.pipeline_mode<synchronous>, transform_indices = @transform_28, window_bounds = array<i64: 1, 64>}, {pipeline_mode = #tpu.pipeline_mode<synchronous>, transform_indices = @transform_29, window_bounds = array<i64: 64, 64>}, {pipeline_mode = #tpu.pipeline_mode<synchronous>, transform_indices = @transform_30, window_bounds = array<i64: 1, 64>}, {transform_indices = @transform_31, window_bounds = array<i64: 1, 4, 64>}]} {
    %c0 = arith.constant 0 : index
    %c0_0 = arith.constant 0 : index
    %c0_1 = arith.constant 0 : index
    %0 = vector.load %arg1[%c0, %c0_0, %c0_1] : memref<1x4x64xf32, #tpu.memory_space<vmem>>, vector<1x4x64xf32>
    %1 = vector.shape_cast %0 : vector<1x4x64xf32> to vector<4x64xf32>
    %c0_2 = arith.constant 0 : index
    %c0_3 = arith.constant 0 : index
    %2 = vector.load %arg2[%c0_2, %c0_3] : memref<4x4xf32, #tpu.memory_space<vmem>>, vector<4x4xf32>
    %cst = arith.constant dense<0.000000e+00> : vector<4x64xf32>
    %3 = tpu.matmul %2, %1, %cst {dimension_numbers = #tpu.dot_dimension_numbers<[1], [0], [0], [1], [0, 0, 1, 1], [], []>} : vector<4x4xf32>, vector<4x64xf32>, vector<4x64xf32> -> vector<4x64xf32>
    %c0_4 = arith.constant 0 : index
    %c0_5 = arith.constant 0 : index
    %4 = vector.load %arg6[%c0_4, %c0_5] : memref<1x64xf32, #tpu.memory_space<vmem>>, vector<1x64xf32>
    %c0_6 = arith.constant 0 : index
    %c0_7 = arith.constant 0 : index
    %5 = vector.load %arg7[%c0_6, %c0_7] : memref<1x64xf32, #tpu.memory_space<vmem>>, vector<1x64xf32>
    %cst_8 = arith.constant dense<0.000000e+00> : vector<4xf32>
    %6 = vector.multi_reduction <add>, %3, %cst_8 [1] : vector<4x64xf32> to vector<4xf32>
    %7 = vector.shape_cast %6 : vector<4xf32> to vector<4x1xf32>
    %cst_9 = arith.constant 6.400000e+01 : f32
    %8 = vector.broadcast %cst_9 : f32 to vector<4x1xf32>
    %9 = arith.divf %7, %8 : vector<4x1xf32>
    %10 = vector.broadcast %9 : vector<4x1xf32> to vector<4x64xf32>
    %11 = arith.subf %3, %10 : vector<4x64xf32>
    %12 = arith.mulf %11, %11 : vector<4x64xf32>
    %cst_10 = arith.constant dense<0.000000e+00> : vector<4xf32>
    %13 = vector.multi_reduction <add>, %12, %cst_10 [1] : vector<4x64xf32> to vector<4xf32>
    %14 = vector.shape_cast %13 : vector<4xf32> to vector<4x1xf32>
    %cst_11 = arith.constant 6.400000e+01 : f32
    %15 = vector.broadcast %cst_11 : f32 to vector<4x1xf32>
    %16 = arith.divf %14, %15 : vector<4x1xf32>
    %17 = vector.broadcast %9 : vector<4x1xf32> to vector<4x64xf32>
    %18 = arith.subf %3, %17 : vector<4x64xf32>
    %cst_12 = arith.constant 9.99999974E-6 : f32
    %19 = vector.broadcast %cst_12 : f32 to vector<4x1xf32>
    %20 = arith.addf %16, %19 : vector<4x1xf32>
    %21 = math.rsqrt %20 : vector<4x1xf32>
    %22 = vector.broadcast %21 : vector<4x1xf32> to vector<4x64xf32>
    %23 = arith.mulf %18, %22 : vector<4x64xf32>
    %24 = vector.broadcast %4 : vector<1x64xf32> to vector<4x64xf32>
    %25 = arith.mulf %23, %24 : vector<4x64xf32>
    %26 = vector.broadcast %5 : vector<1x64xf32> to vector<4x64xf32>
    %27 = arith.addf %25, %26 : vector<4x64xf32>
    %28 = arith.truncf %27 : vector<4x64xf32> to vector<4x64xbf16>
    %c0_13 = arith.constant 0 : index
    %c0_14 = arith.constant 0 : index
    %29 = vector.load %arg8[%c0_13, %c0_14] : memref<64x256xbf16, #tpu.memory_space<vmem>>, vector<64x256xbf16>
    %cst_15 = arith.constant dense<0.000000e+00> : vector<4x256xf32>
    %30 = tpu.matmul %28, %29, %cst_15 {dimension_numbers = #tpu.dot_dimension_numbers<[1], [0], [0], [1], [0, 0, 1, 1], [], []>} : vector<4x64xbf16>, vector<64x256xbf16>, vector<4x256xf32> -> vector<4x256xf32>
    %c0_16 = arith.constant 0 : index
    %c0_17 = arith.constant 0 : index
    %31 = vector.load %arg9[%c0_16, %c0_17] : memref<1x256xf32, #tpu.memory_space<vmem>>, vector<1x256xf32>
    %32 = vector.broadcast %31 : vector<1x256xf32> to vector<4x256xf32>
    %33 = arith.addf %30, %32 : vector<4x256xf32>
    %34 = vector.extract_strided_slice %33 {offsets = [0, 0], sizes = [4, 128], strides = [1, 1]} : vector<4x256xf32> to vector<4x128xf32>
    %35 = vector.extract_strided_slice %33 {offsets = [0, 128], sizes = [4, 128], strides = [1, 1]} : vector<4x256xf32> to vector<4x128xf32>
    %cst_18 = arith.constant 5.000000e-01 : f32
    %36 = vector.broadcast %cst_18 : f32 to vector<4x128xf32>
    %37 = arith.mulf %36, %34 : vector<4x128xf32>
    %38 = math.tanh %37 : vector<4x128xf32>
    %cst_19 = arith.constant 1.000000e+00 : f32
    %39 = vector.broadcast %cst_19 : f32 to vector<4x128xf32>
    %40 = arith.addf %38, %39 : vector<4x128xf32>
    %cst_20 = arith.constant 5.000000e-01 : f32
    %41 = vector.broadcast %cst_20 : f32 to vector<4x128xf32>
    %42 = arith.mulf %41, %40 : vector<4x128xf32>
    %43 = arith.mulf %34, %42 : vector<4x128xf32>
    %44 = arith.truncf %43 : vector<4x128xf32> to vector<4x128xbf16>
    %c0_21 = arith.constant 0 : index
    %c0_22 = arith.constant 0 : index
    %45 = vector.load %arg10[%c0_21, %c0_22] : memref<128x144xbf16, #tpu.memory_space<vmem>>, vector<128x144xbf16>
    %cst_23 = arith.constant dense<0.000000e+00> : vector<4x144xf32>
    %46 = tpu.matmul %44, %45, %cst_23 {dimension_numbers = #tpu.dot_dimension_numbers<[1], [0], [0], [1], [0, 0, 1, 1], [], []>} : vector<4x128xbf16>, vector<128x144xbf16>, vector<4x144xf32> -> vector<4x144xf32>
    %c0_24 = arith.constant 0 : index
    %c0_25 = arith.constant 0 : index
    %47 = vector.load %arg11[%c0_24, %c0_25] : memref<1x144xf32, #tpu.memory_space<vmem>>, vector<1x144xf32>
    %48 = vector.broadcast %47 : vector<1x144xf32> to vector<4x144xf32>
    %49 = arith.addf %46, %48 : vector<4x144xf32>
    %50 = vector.extract_strided_slice %49 {offsets = [0, 0], sizes = [4, 128], strides = [1, 1]} : vector<4x144xf32> to vector<4x128xf32>
    %cst_26 = arith.constant 0.000000e+00 : f32
    %51 = vector.broadcast %cst_26 : f32 to vector<4x128xf32>
    %52 = arith.maximumf %50, %51 : vector<4x128xf32>
    %53 = math.absf %50 : vector<4x128xf32>
    %cst_27 = arith.constant 0.000000e+00 : f32
    %54 = vector.broadcast %cst_27 : f32 to vector<4x128xf32>
    %55 = arith.subf %54, %53 : vector<4x128xf32>
    %56 = math.exp %55 : vector<4x128xf32>
    %cst_28 = arith.constant 1.000000e+00 : f32
    %57 = vector.broadcast %cst_28 : f32 to vector<4x128xf32>
    %58 = arith.addf %57, %56 : vector<4x128xf32>
    %59 = math.log %58 : vector<4x128xf32>
    %60 = arith.addf %52, %59 : vector<4x128xf32>
    %61 = vector.extract_strided_slice %49 {offsets = [0, 128], sizes = [4, 8], strides = [1, 1]} : vector<4x144xf32> to vector<4x8xf32>
    %62 = vector.extract_strided_slice %49 {offsets = [0, 136], sizes = [4, 8], strides = [1, 1]} : vector<4x144xf32> to vector<4x8xf32>
    %c0_29 = arith.constant 0 : index
    %c0_30 = arith.constant 0 : index
    %63 = vector.load %arg12[%c0_29, %c0_30] : memref<8x128xf32, #tpu.memory_space<vmem>>, vector<8x128xf32>
    %64 = vector.shape_cast %60 : vector<4x128xf32> to vector<4x1x128xf32>
    %65 = vector.shape_cast %63 : vector<8x128xf32> to vector<1x8x128xf32>
    %66 = vector.broadcast %64 : vector<4x1x128xf32> to vector<4x8x128xf32>
    %67 = vector.broadcast %65 : vector<1x8x128xf32> to vector<4x8x128xf32>
    %68 = arith.mulf %66, %67 : vector<4x8x128xf32>
    %69 = math.exp %68 : vector<4x8x128xf32>
    %70 = arith.mulf %60, %43 : vector<4x128xf32>
    %71 = vector.shape_cast %70 : vector<4x128xf32> to vector<4x1x128xf32>
    %72 = vector.shape_cast %61 : vector<4x8xf32> to vector<4x8x1xf32>
    %73 = vector.broadcast %71 : vector<4x1x128xf32> to vector<4x8x128xf32>
    %74 = vector.broadcast %72 : vector<4x8x1xf32> to vector<4x8x128xf32>
    %75 = arith.mulf %73, %74 : vector<4x8x128xf32>
    %cst_31 = arith.constant 0.000000e+00 : f32
    %76 = vector.broadcast %cst_31 : f32 to vector<1x8x128xf32>
    %77 = vector.extract_strided_slice %69 {offsets = [0, 0, 0], sizes = [1, 8, 128], strides = [1, 1, 1]} : vector<4x8x128xf32> to vector<1x8x128xf32>
    %78 = arith.mulf %77, %76 : vector<1x8x128xf32>
    %79 = vector.extract_strided_slice %75 {offsets = [0, 0, 0], sizes = [1, 8, 128], strides = [1, 1, 1]} : vector<4x8x128xf32> to vector<1x8x128xf32>
    %80 = arith.addf %78, %79 : vector<1x8x128xf32>
    %81 = vector.extract_strided_slice %69 {offsets = [1, 0, 0], sizes = [1, 8, 128], strides = [1, 1, 1]} : vector<4x8x128xf32> to vector<1x8x128xf32>
    %82 = arith.mulf %81, %80 : vector<1x8x128xf32>
    %83 = vector.extract_strided_slice %75 {offsets = [1, 0, 0], sizes = [1, 8, 128], strides = [1, 1, 1]} : vector<4x8x128xf32> to vector<1x8x128xf32>
    %84 = arith.addf %82, %83 : vector<1x8x128xf32>
    %85 = vector.extract_strided_slice %69 {offsets = [2, 0, 0], sizes = [1, 8, 128], strides = [1, 1, 1]} : vector<4x8x128xf32> to vector<1x8x128xf32>
    %86 = arith.mulf %85, %84 : vector<1x8x128xf32>
    %87 = vector.extract_strided_slice %75 {offsets = [2, 0, 0], sizes = [1, 8, 128], strides = [1, 1, 1]} : vector<4x8x128xf32> to vector<1x8x128xf32>
    %88 = arith.addf %86, %87 : vector<1x8x128xf32>
    %89 = vector.extract_strided_slice %69 {offsets = [3, 0, 0], sizes = [1, 8, 128], strides = [1, 1, 1]} : vector<4x8x128xf32> to vector<1x8x128xf32>
    %90 = arith.mulf %89, %88 : vector<1x8x128xf32>
    %91 = vector.extract_strided_slice %75 {offsets = [3, 0, 0], sizes = [1, 8, 128], strides = [1, 1, 1]} : vector<4x8x128xf32> to vector<1x8x128xf32>
    %92 = arith.addf %90, %91 : vector<1x8x128xf32>
    %93 = tpu.concatenate %80, %84, %88, %92 in 0 : vector<1x8x128xf32>, vector<1x8x128xf32>, vector<1x8x128xf32>, vector<1x8x128xf32> -> vector<4x8x128xf32>
    %94 = vector.shape_cast %62 : vector<4x8xf32> to vector<4x8x1xf32>
    %95 = vector.broadcast %94 : vector<4x8x1xf32> to vector<4x8x128xf32>
    %96 = arith.mulf %93, %95 : vector<4x8x128xf32>
    %cst_32 = arith.constant dense<0.000000e+00> : vector<4x128xf32>
    %97 = vector.multi_reduction <add>, %96, %cst_32 [1] : vector<4x8x128xf32> to vector<4x128xf32>
    %c0_33 = arith.constant 0 : index
    %c0_34 = arith.constant 0 : index
    %98 = vector.load %arg13[%c0_33, %c0_34] : memref<1x128xf32, #tpu.memory_space<vmem>>, vector<1x128xf32>
    %99 = vector.broadcast %98 : vector<1x128xf32> to vector<4x128xf32>
    %100 = arith.mulf %99, %43 : vector<4x128xf32>
    %101 = arith.addf %97, %100 : vector<4x128xf32>
    %cst_35 = arith.constant 5.000000e-01 : f32
    %102 = vector.broadcast %cst_35 : f32 to vector<4x128xf32>
    %103 = arith.mulf %102, %35 : vector<4x128xf32>
    %104 = math.tanh %103 : vector<4x128xf32>
    %cst_36 = arith.constant 1.000000e+00 : f32
    %105 = vector.broadcast %cst_36 : f32 to vector<4x128xf32>
    %106 = arith.addf %104, %105 : vector<4x128xf32>
    %cst_37 = arith.constant 5.000000e-01 : f32
    %107 = vector.broadcast %cst_37 : f32 to vector<4x128xf32>
    %108 = arith.mulf %107, %106 : vector<4x128xf32>
    %109 = arith.mulf %35, %108 : vector<4x128xf32>
    %110 = arith.mulf %101, %109 : vector<4x128xf32>
    %111 = arith.truncf %110 : vector<4x128xf32> to vector<4x128xbf16>
    %c0_38 = arith.constant 0 : index
    %c0_39 = arith.constant 0 : index
    %112 = vector.load %arg14[%c0_38, %c0_39] : memref<128x64xbf16, #tpu.memory_space<vmem>>, vector<128x64xbf16>
    %cst_40 = arith.constant dense<0.000000e+00> : vector<4x64xf32>
    %113 = tpu.matmul %111, %112, %cst_40 {dimension_numbers = #tpu.dot_dimension_numbers<[1], [0], [0], [1], [0, 0, 1, 1], [], []>} : vector<4x128xbf16>, vector<128x64xbf16>, vector<4x64xf32> -> vector<4x64xf32>
    %c0_41 = arith.constant 0 : index
    %c0_42 = arith.constant 0 : index
    %114 = vector.load %arg15[%c0_41, %c0_42] : memref<1x64xf32, #tpu.memory_space<vmem>>, vector<1x64xf32>
    %115 = vector.broadcast %114 : vector<1x64xf32> to vector<4x64xf32>
    %116 = arith.addf %113, %115 : vector<4x64xf32>
    %117 = arith.addf %3, %116 : vector<4x64xf32>
    %c0_43 = arith.constant 0 : index
    %c0_44 = arith.constant 0 : index
    %118 = vector.load %arg3[%c0_43, %c0_44] : memref<4x4xf32, #tpu.memory_space<vmem>>, vector<4x4xf32>
    %cst_45 = arith.constant dense<0.000000e+00> : vector<4x64xf32>
    %119 = tpu.matmul %118, %117, %cst_45 {dimension_numbers = #tpu.dot_dimension_numbers<[1], [0], [0], [1], [0, 0, 1, 1], [], []>} : vector<4x4xf32>, vector<4x64xf32>, vector<4x64xf32> -> vector<4x64xf32>
    %c0_46 = arith.constant 0 : index
    %c0_47 = arith.constant 0 : index
    %120 = vector.load %arg16[%c0_46, %c0_47] : memref<1x64xf32, #tpu.memory_space<vmem>>, vector<1x64xf32>
    %c0_48 = arith.constant 0 : index
    %c0_49 = arith.constant 0 : index
    %121 = vector.load %arg17[%c0_48, %c0_49] : memref<1x64xf32, #tpu.memory_space<vmem>>, vector<1x64xf32>
    %cst_50 = arith.constant dense<0.000000e+00> : vector<4xf32>
    %122 = vector.multi_reduction <add>, %119, %cst_50 [1] : vector<4x64xf32> to vector<4xf32>
    %123 = vector.shape_cast %122 : vector<4xf32> to vector<4x1xf32>
    %cst_51 = arith.constant 6.400000e+01 : f32
    %124 = vector.broadcast %cst_51 : f32 to vector<4x1xf32>
    %125 = arith.divf %123, %124 : vector<4x1xf32>
    %126 = vector.broadcast %125 : vector<4x1xf32> to vector<4x64xf32>
    %127 = arith.subf %119, %126 : vector<4x64xf32>
    %128 = arith.mulf %127, %127 : vector<4x64xf32>
    %cst_52 = arith.constant dense<0.000000e+00> : vector<4xf32>
    %129 = vector.multi_reduction <add>, %128, %cst_52 [1] : vector<4x64xf32> to vector<4xf32>
    %130 = vector.shape_cast %129 : vector<4xf32> to vector<4x1xf32>
    %cst_53 = arith.constant 6.400000e+01 : f32
    %131 = vector.broadcast %cst_53 : f32 to vector<4x1xf32>
    %132 = arith.divf %130, %131 : vector<4x1xf32>
    %133 = vector.broadcast %125 : vector<4x1xf32> to vector<4x64xf32>
    %134 = arith.subf %119, %133 : vector<4x64xf32>
    %cst_54 = arith.constant 9.99999974E-6 : f32
    %135 = vector.broadcast %cst_54 : f32 to vector<4x1xf32>
    %136 = arith.addf %132, %135 : vector<4x1xf32>
    %137 = math.rsqrt %136 : vector<4x1xf32>
    %138 = vector.broadcast %137 : vector<4x1xf32> to vector<4x64xf32>
    %139 = arith.mulf %134, %138 : vector<4x64xf32>
    %140 = vector.broadcast %120 : vector<1x64xf32> to vector<4x64xf32>
    %141 = arith.mulf %139, %140 : vector<4x64xf32>
    %142 = vector.broadcast %121 : vector<1x64xf32> to vector<4x64xf32>
    %143 = arith.addf %141, %142 : vector<4x64xf32>
    %144 = arith.truncf %143 : vector<4x64xf32> to vector<4x64xbf16>
    %c0_55 = arith.constant 0 : index
    %c0_56 = arith.constant 0 : index
    %145 = vector.load %arg18[%c0_55, %c0_56] : memref<64x256xbf16, #tpu.memory_space<vmem>>, vector<64x256xbf16>
    %cst_57 = arith.constant dense<0.000000e+00> : vector<4x256xf32>
    %146 = tpu.matmul %144, %145, %cst_57 {dimension_numbers = #tpu.dot_dimension_numbers<[1], [0], [0], [1], [0, 0, 1, 1], [], []>} : vector<4x64xbf16>, vector<64x256xbf16>, vector<4x256xf32> -> vector<4x256xf32>
    %c0_58 = arith.constant 0 : index
    %c0_59 = arith.constant 0 : index
    %147 = vector.load %arg19[%c0_58, %c0_59] : memref<1x256xf32, #tpu.memory_space<vmem>>, vector<1x256xf32>
    %148 = vector.broadcast %147 : vector<1x256xf32> to vector<4x256xf32>
    %149 = arith.addf %146, %148 : vector<4x256xf32>
    %150 = vector.extract_strided_slice %149 {offsets = [0, 0], sizes = [4, 128], strides = [1, 1]} : vector<4x256xf32> to vector<4x128xf32>
    %151 = vector.extract_strided_slice %149 {offsets = [0, 128], sizes = [4, 128], strides = [1, 1]} : vector<4x256xf32> to vector<4x128xf32>
    %cst_60 = arith.constant 5.000000e-01 : f32
    %152 = vector.broadcast %cst_60 : f32 to vector<4x128xf32>
    %153 = arith.mulf %152, %150 : vector<4x128xf32>
    %154 = math.tanh %153 : vector<4x128xf32>
    %cst_61 = arith.constant 1.000000e+00 : f32
    %155 = vector.broadcast %cst_61 : f32 to vector<4x128xf32>
    %156 = arith.addf %154, %155 : vector<4x128xf32>
    %cst_62 = arith.constant 5.000000e-01 : f32
    %157 = vector.broadcast %cst_62 : f32 to vector<4x128xf32>
    %158 = arith.mulf %157, %156 : vector<4x128xf32>
    %159 = arith.mulf %150, %158 : vector<4x128xf32>
    %160 = arith.truncf %159 : vector<4x128xf32> to vector<4x128xbf16>
    %c0_63 = arith.constant 0 : index
    %c0_64 = arith.constant 0 : index
    %161 = vector.load %arg20[%c0_63, %c0_64] : memref<128x144xbf16, #tpu.memory_space<vmem>>, vector<128x144xbf16>
    %cst_65 = arith.constant dense<0.000000e+00> : vector<4x144xf32>
    %162 = tpu.matmul %160, %161, %cst_65 {dimension_numbers = #tpu.dot_dimension_numbers<[1], [0], [0], [1], [0, 0, 1, 1], [], []>} : vector<4x128xbf16>, vector<128x144xbf16>, vector<4x144xf32> -> vector<4x144xf32>
    %c0_66 = arith.constant 0 : index
    %c0_67 = arith.constant 0 : index
    %163 = vector.load %arg21[%c0_66, %c0_67] : memref<1x144xf32, #tpu.memory_space<vmem>>, vector<1x144xf32>
    %164 = vector.broadcast %163 : vector<1x144xf32> to vector<4x144xf32>
    %165 = arith.addf %162, %164 : vector<4x144xf32>
    %166 = vector.extract_strided_slice %165 {offsets = [0, 0], sizes = [4, 128], strides = [1, 1]} : vector<4x144xf32> to vector<4x128xf32>
    %cst_68 = arith.constant 0.000000e+00 : f32
    %167 = vector.broadcast %cst_68 : f32 to vector<4x128xf32>
    %168 = arith.maximumf %166, %167 : vector<4x128xf32>
    %169 = math.absf %166 : vector<4x128xf32>
    %cst_69 = arith.constant 0.000000e+00 : f32
    %170 = vector.broadcast %cst_69 : f32 to vector<4x128xf32>
    %171 = arith.subf %170, %169 : vector<4x128xf32>
    %172 = math.exp %171 : vector<4x128xf32>
    %cst_70 = arith.constant 1.000000e+00 : f32
    %173 = vector.broadcast %cst_70 : f32 to vector<4x128xf32>
    %174 = arith.addf %173, %172 : vector<4x128xf32>
    %175 = math.log %174 : vector<4x128xf32>
    %176 = arith.addf %168, %175 : vector<4x128xf32>
    %177 = vector.extract_strided_slice %165 {offsets = [0, 128], sizes = [4, 8], strides = [1, 1]} : vector<4x144xf32> to vector<4x8xf32>
    %178 = vector.extract_strided_slice %165 {offsets = [0, 136], sizes = [4, 8], strides = [1, 1]} : vector<4x144xf32> to vector<4x8xf32>
    %c0_71 = arith.constant 0 : index
    %c0_72 = arith.constant 0 : index
    %179 = vector.load %arg22[%c0_71, %c0_72] : memref<8x128xf32, #tpu.memory_space<vmem>>, vector<8x128xf32>
    %180 = vector.shape_cast %176 : vector<4x128xf32> to vector<4x1x128xf32>
    %181 = vector.shape_cast %179 : vector<8x128xf32> to vector<1x8x128xf32>
    %182 = vector.broadcast %180 : vector<4x1x128xf32> to vector<4x8x128xf32>
    %183 = vector.broadcast %181 : vector<1x8x128xf32> to vector<4x8x128xf32>
    %184 = arith.mulf %182, %183 : vector<4x8x128xf32>
    %185 = math.exp %184 : vector<4x8x128xf32>
    %186 = arith.mulf %176, %159 : vector<4x128xf32>
    %187 = vector.shape_cast %186 : vector<4x128xf32> to vector<4x1x128xf32>
    %188 = vector.shape_cast %177 : vector<4x8xf32> to vector<4x8x1xf32>
    %189 = vector.broadcast %187 : vector<4x1x128xf32> to vector<4x8x128xf32>
    %190 = vector.broadcast %188 : vector<4x8x1xf32> to vector<4x8x128xf32>
    %191 = arith.mulf %189, %190 : vector<4x8x128xf32>
    %cst_73 = arith.constant 0.000000e+00 : f32
    %192 = vector.broadcast %cst_73 : f32 to vector<1x8x128xf32>
    %193 = vector.extract_strided_slice %185 {offsets = [0, 0, 0], sizes = [1, 8, 128], strides = [1, 1, 1]} : vector<4x8x128xf32> to vector<1x8x128xf32>
    %194 = arith.mulf %193, %192 : vector<1x8x128xf32>
    %195 = vector.extract_strided_slice %191 {offsets = [0, 0, 0], sizes = [1, 8, 128], strides = [1, 1, 1]} : vector<4x8x128xf32> to vector<1x8x128xf32>
    %196 = arith.addf %194, %195 : vector<1x8x128xf32>
    %197 = vector.extract_strided_slice %185 {offsets = [1, 0, 0], sizes = [1, 8, 128], strides = [1, 1, 1]} : vector<4x8x128xf32> to vector<1x8x128xf32>
    %198 = arith.mulf %197, %196 : vector<1x8x128xf32>
    %199 = vector.extract_strided_slice %191 {offsets = [1, 0, 0], sizes = [1, 8, 128], strides = [1, 1, 1]} : vector<4x8x128xf32> to vector<1x8x128xf32>
    %200 = arith.addf %198, %199 : vector<1x8x128xf32>
    %201 = vector.extract_strided_slice %185 {offsets = [2, 0, 0], sizes = [1, 8, 128], strides = [1, 1, 1]} : vector<4x8x128xf32> to vector<1x8x128xf32>
    %202 = arith.mulf %201, %200 : vector<1x8x128xf32>
    %203 = vector.extract_strided_slice %191 {offsets = [2, 0, 0], sizes = [1, 8, 128], strides = [1, 1, 1]} : vector<4x8x128xf32> to vector<1x8x128xf32>
    %204 = arith.addf %202, %203 : vector<1x8x128xf32>
    %205 = vector.extract_strided_slice %185 {offsets = [3, 0, 0], sizes = [1, 8, 128], strides = [1, 1, 1]} : vector<4x8x128xf32> to vector<1x8x128xf32>
    %206 = arith.mulf %205, %204 : vector<1x8x128xf32>
    %207 = vector.extract_strided_slice %191 {offsets = [3, 0, 0], sizes = [1, 8, 128], strides = [1, 1, 1]} : vector<4x8x128xf32> to vector<1x8x128xf32>
    %208 = arith.addf %206, %207 : vector<1x8x128xf32>
    %209 = tpu.concatenate %196, %200, %204, %208 in 0 : vector<1x8x128xf32>, vector<1x8x128xf32>, vector<1x8x128xf32>, vector<1x8x128xf32> -> vector<4x8x128xf32>
    %210 = vector.shape_cast %178 : vector<4x8xf32> to vector<4x8x1xf32>
    %211 = vector.broadcast %210 : vector<4x8x1xf32> to vector<4x8x128xf32>
    %212 = arith.mulf %209, %211 : vector<4x8x128xf32>
    %cst_74 = arith.constant dense<0.000000e+00> : vector<4x128xf32>
    %213 = vector.multi_reduction <add>, %212, %cst_74 [1] : vector<4x8x128xf32> to vector<4x128xf32>
    %c0_75 = arith.constant 0 : index
    %c0_76 = arith.constant 0 : index
    %214 = vector.load %arg23[%c0_75, %c0_76] : memref<1x128xf32, #tpu.memory_space<vmem>>, vector<1x128xf32>
    %215 = vector.broadcast %214 : vector<1x128xf32> to vector<4x128xf32>
    %216 = arith.mulf %215, %159 : vector<4x128xf32>
    %217 = arith.addf %213, %216 : vector<4x128xf32>
    %cst_77 = arith.constant 5.000000e-01 : f32
    %218 = vector.broadcast %cst_77 : f32 to vector<4x128xf32>
    %219 = arith.mulf %218, %151 : vector<4x128xf32>
    %220 = math.tanh %219 : vector<4x128xf32>
    %cst_78 = arith.constant 1.000000e+00 : f32
    %221 = vector.broadcast %cst_78 : f32 to vector<4x128xf32>
    %222 = arith.addf %220, %221 : vector<4x128xf32>
    %cst_79 = arith.constant 5.000000e-01 : f32
    %223 = vector.broadcast %cst_79 : f32 to vector<4x128xf32>
    %224 = arith.mulf %223, %222 : vector<4x128xf32>
    %225 = arith.mulf %151, %224 : vector<4x128xf32>
    %226 = arith.mulf %217, %225 : vector<4x128xf32>
    %227 = arith.truncf %226 : vector<4x128xf32> to vector<4x128xbf16>
    %c0_80 = arith.constant 0 : index
    %c0_81 = arith.constant 0 : index
    %228 = vector.load %arg24[%c0_80, %c0_81] : memref<128x64xbf16, #tpu.memory_space<vmem>>, vector<128x64xbf16>
    %cst_82 = arith.constant dense<0.000000e+00> : vector<4x64xf32>
    %229 = tpu.matmul %227, %228, %cst_82 {dimension_numbers = #tpu.dot_dimension_numbers<[1], [0], [0], [1], [0, 0, 1, 1], [], []>} : vector<4x128xbf16>, vector<128x64xbf16>, vector<4x64xf32> -> vector<4x64xf32>
    %c0_83 = arith.constant 0 : index
    %c0_84 = arith.constant 0 : index
    %230 = vector.load %arg25[%c0_83, %c0_84] : memref<1x64xf32, #tpu.memory_space<vmem>>, vector<1x64xf32>
    %231 = vector.broadcast %230 : vector<1x64xf32> to vector<4x64xf32>
    %232 = arith.addf %229, %231 : vector<4x64xf32>
    %233 = arith.addf %119, %232 : vector<4x64xf32>
    %c0_85 = arith.constant 0 : index
    %c0_86 = arith.constant 0 : index
    %234 = vector.load %arg26[%c0_85, %c0_86] : memref<1x64xf32, #tpu.memory_space<vmem>>, vector<1x64xf32>
    %c0_87 = arith.constant 0 : index
    %c0_88 = arith.constant 0 : index
    %235 = vector.load %arg27[%c0_87, %c0_88] : memref<1x64xf32, #tpu.memory_space<vmem>>, vector<1x64xf32>
    %cst_89 = arith.constant dense<0.000000e+00> : vector<4xf32>
    %236 = vector.multi_reduction <add>, %233, %cst_89 [1] : vector<4x64xf32> to vector<4xf32>
    %237 = vector.shape_cast %236 : vector<4xf32> to vector<4x1xf32>
    %cst_90 = arith.constant 6.400000e+01 : f32
    %238 = vector.broadcast %cst_90 : f32 to vector<4x1xf32>
    %239 = arith.divf %237, %238 : vector<4x1xf32>
    %240 = vector.broadcast %239 : vector<4x1xf32> to vector<4x64xf32>
    %241 = arith.subf %233, %240 : vector<4x64xf32>
    %242 = arith.mulf %241, %241 : vector<4x64xf32>
    %cst_91 = arith.constant dense<0.000000e+00> : vector<4xf32>
    %243 = vector.multi_reduction <add>, %242, %cst_91 [1] : vector<4x64xf32> to vector<4xf32>
    %244 = vector.shape_cast %243 : vector<4xf32> to vector<4x1xf32>
    %cst_92 = arith.constant 6.400000e+01 : f32
    %245 = vector.broadcast %cst_92 : f32 to vector<4x1xf32>
    %246 = arith.divf %244, %245 : vector<4x1xf32>
    %247 = vector.broadcast %239 : vector<4x1xf32> to vector<4x64xf32>
    %248 = arith.subf %233, %247 : vector<4x64xf32>
    %cst_93 = arith.constant 9.99999974E-6 : f32
    %249 = vector.broadcast %cst_93 : f32 to vector<4x1xf32>
    %250 = arith.addf %246, %249 : vector<4x1xf32>
    %251 = math.rsqrt %250 : vector<4x1xf32>
    %252 = vector.broadcast %251 : vector<4x1xf32> to vector<4x64xf32>
    %253 = arith.mulf %248, %252 : vector<4x64xf32>
    %254 = vector.broadcast %234 : vector<1x64xf32> to vector<4x64xf32>
    %255 = arith.mulf %253, %254 : vector<4x64xf32>
    %256 = vector.broadcast %235 : vector<1x64xf32> to vector<4x64xf32>
    %257 = arith.addf %255, %256 : vector<4x64xf32>
    %c0_94 = arith.constant 0 : index
    %c0_95 = arith.constant 0 : index
    %258 = vector.load %arg4[%c0_94, %c0_95] : memref<1x4xbf16, #tpu.memory_space<vmem>>, vector<1x4xbf16>
    %259 = arith.truncf %257 : vector<4x64xf32> to vector<4x64xbf16>
    %cst_96 = arith.constant dense<0.000000e+00> : vector<1x64xf32>
    %260 = tpu.matmul %258, %259, %cst_96 {dimension_numbers = #tpu.dot_dimension_numbers<[1], [0], [0], [1], [0, 0, 1, 1], [], []>} : vector<1x4xbf16>, vector<4x64xbf16>, vector<1x64xf32> -> vector<1x64xf32>
    %261 = arith.truncf %260 : vector<1x64xf32> to vector<1x64xbf16>
    %c0_97 = arith.constant 0 : index
    %c0_98 = arith.constant 0 : index
    %262 = vector.load %arg28[%c0_97, %c0_98] : memref<64x64xbf16, #tpu.memory_space<vmem>>, vector<64x64xbf16>
    %cst_99 = arith.constant dense<0.000000e+00> : vector<1x64xf32>
    %263 = tpu.matmul %261, %262, %cst_99 {dimension_numbers = #tpu.dot_dimension_numbers<[1], [0], [0], [1], [0, 0, 1, 1], [], []>} : vector<1x64xbf16>, vector<64x64xbf16>, vector<1x64xf32> -> vector<1x64xf32>
    %c0_100 = arith.constant 0 : index
    %c0_101 = arith.constant 0 : index
    %264 = vector.load %arg29[%c0_100, %c0_101] : memref<1x64xf32, #tpu.memory_space<vmem>>, vector<1x64xf32>
    %265 = arith.addf %263, %264 : vector<1x64xf32>
    %cst_102 = arith.constant 5.000000e-01 : f32
    %266 = vector.broadcast %cst_102 : f32 to vector<1x64xf32>
    %267 = arith.mulf %266, %265 : vector<1x64xf32>
    %cst_103 = arith.constant 4.471500e-02 : f32
    %268 = vector.broadcast %cst_103 : f32 to vector<1x64xf32>
    %269 = arith.mulf %268, %265 : vector<1x64xf32>
    %270 = arith.mulf %269, %265 : vector<1x64xf32>
    %271 = arith.mulf %270, %265 : vector<1x64xf32>
    %272 = arith.addf %265, %271 : vector<1x64xf32>
    %cst_104 = arith.constant 0.797884583 : f32
    %273 = vector.broadcast %cst_104 : f32 to vector<1x64xf32>
    %274 = arith.mulf %273, %272 : vector<1x64xf32>
    %275 = math.tanh %274 : vector<1x64xf32>
    %cst_105 = arith.constant 1.000000e+00 : f32
    %276 = vector.broadcast %cst_105 : f32 to vector<1x64xf32>
    %277 = arith.addf %276, %275 : vector<1x64xf32>
    %278 = arith.mulf %267, %277 : vector<1x64xf32>
    %279 = arith.truncf %278 : vector<1x64xf32> to vector<1x64xbf16>
    %c0_106 = arith.constant 0 : index
    %c0_107 = arith.constant 0 : index
    %280 = vector.load %arg30[%c0_106, %c0_107] : memref<64x64xbf16, #tpu.memory_space<vmem>>, vector<64x64xbf16>
    %cst_108 = arith.constant dense<0.000000e+00> : vector<1x64xf32>
    %281 = tpu.matmul %279, %280, %cst_108 {dimension_numbers = #tpu.dot_dimension_numbers<[1], [0], [0], [1], [0, 0, 1, 1], [], []>} : vector<1x64xbf16>, vector<64x64xbf16>, vector<1x64xf32> -> vector<1x64xf32>
    %c0_109 = arith.constant 0 : index
    %c0_110 = arith.constant 0 : index
    %282 = vector.load %arg31[%c0_109, %c0_110] : memref<1x64xf32, #tpu.memory_space<vmem>>, vector<1x64xf32>
    %283 = arith.addf %281, %282 : vector<1x64xf32>
    %c0_111 = arith.constant 0 : index
    %c0_112 = arith.constant 0 : index
    %284 = vector.load %arg5[%c0_111, %c0_112] : memref<4x1xbf16, #tpu.memory_space<vmem>>, vector<4x1xbf16>
    %285 = arith.truncf %283 : vector<1x64xf32> to vector<1x64xbf16>
    %cst_113 = arith.constant dense<0.000000e+00> : vector<4x64xf32>
    %286 = tpu.matmul %284, %285, %cst_113 {dimension_numbers = #tpu.dot_dimension_numbers<[1], [0], [0], [1], [0, 0, 1, 1], [], []>} : vector<4x1xbf16>, vector<1x64xbf16>, vector<4x64xf32> -> vector<4x64xf32>
    %287 = arith.addf %233, %286 : vector<4x64xf32>
    %c0_114 = arith.constant 0 : index
    %c0_115 = arith.constant 0 : index
    %c0_116 = arith.constant 0 : index
    %288 = vector.load %arg32[%c0_114, %c0_115, %c0_116] : memref<1x4x64xf32, #tpu.memory_space<vmem>>, vector<1x4x64xf32>
    %289 = vector.shape_cast %288 : vector<1x4x64xf32> to vector<4x64xf32>
    %290 = vector.shape_cast %287 : vector<4x64xf32> to vector<1x4x64xf32>
    tpu.vector_store %arg32[%c0_114, %c0_115, %c0_116], %290 {strides = array<i32>} : memref<1x4x64xf32, #tpu.memory_space<vmem>>, vector<1x4x64xf32>,
    return
  }
  func.func @transform_0(%arg0: i32) -> (i32, i32, i32) {
    %c0_i32 = arith.constant 0 : i32
    %c0_i32_0 = arith.constant 0 : i32
    %c0_i32_1 = arith.constant 0 : i32
    return %arg0, %c0_i32, %c0_i32_0 : i32, i32, i32
  }
  func.func @transform_1(%arg0: i32) -> (i32, i32) {
    %c0_i32 = arith.constant 0 : i32
    %c0_i32_0 = arith.constant 0 : i32
    %c0_i32_1 = arith.constant 0 : i32
    return %c0_i32, %c0_i32_0 : i32, i32
  }
  func.func @transform_2(%arg0: i32) -> (i32, i32) {
    %c0_i32 = arith.constant 0 : i32
    %c0_i32_0 = arith.constant 0 : i32
    %c0_i32_1 = arith.constant 0 : i32
    return %c0_i32, %c0_i32_0 : i32, i32
  }
  func.func @transform_3(%arg0: i32) -> (i32, i32) {
    %c0_i32 = arith.constant 0 : i32
    %c0_i32_0 = arith.constant 0 : i32
    %c0_i32_1 = arith.constant 0 : i32
    return %c0_i32, %c0_i32_0 : i32, i32
  }
  func.func @transform_4(%arg0: i32) -> (i32, i32) {
    %c0_i32 = arith.constant 0 : i32
    %c0_i32_0 = arith.constant 0 : i32
    %c0_i32_1 = arith.constant 0 : i32
    return %c0_i32, %c0_i32_0 : i32, i32
  }
  func.func @transform_5(%arg0: i32) -> (i32, i32) {
    %c0_i32 = arith.constant 0 : i32
    %c0_i32_0 = arith.constant 0 : i32
    %c0_i32_1 = arith.constant 0 : i32
    return %c0_i32, %c0_i32_0 : i32, i32
  }
  func.func @transform_6(%arg0: i32) -> (i32, i32) {
    %c0_i32 = arith.constant 0 : i32
    %c0_i32_0 = arith.constant 0 : i32
    %c0_i32_1 = arith.constant 0 : i32
    return %c0_i32, %c0_i32_0 : i32, i32
  }
  func.func @transform_7(%arg0: i32) -> (i32, i32) {
    %c0_i32 = arith.constant 0 : i32
    %c0_i32_0 = arith.constant 0 : i32
    %c0_i32_1 = arith.constant 0 : i32
    return %c0_i32, %c0_i32_0 : i32, i32
  }
  func.func @transform_8(%arg0: i32) -> (i32, i32) {
    %c0_i32 = arith.constant 0 : i32
    %c0_i32_0 = arith.constant 0 : i32
    %c0_i32_1 = arith.constant 0 : i32
    return %c0_i32, %c0_i32_0 : i32, i32
  }
  func.func @transform_9(%arg0: i32) -> (i32, i32) {
    %c0_i32 = arith.constant 0 : i32
    %c0_i32_0 = arith.constant 0 : i32
    %c0_i32_1 = arith.constant 0 : i32
    return %c0_i32, %c0_i32_0 : i32, i32
  }
  func.func @transform_10(%arg0: i32) -> (i32, i32) {
    %c0_i32 = arith.constant 0 : i32
    %c0_i32_0 = arith.constant 0 : i32
    %c0_i32_1 = arith.constant 0 : i32
    return %c0_i32, %c0_i32_0 : i32, i32
  }
  func.func @transform_11(%arg0: i32) -> (i32, i32) {
    %c0_i32 = arith.constant 0 : i32
    %c0_i32_0 = arith.constant 0 : i32
    %c0_i32_1 = arith.constant 0 : i32
    return %c0_i32, %c0_i32_0 : i32, i32
  }
  func.func @transform_12(%arg0: i32) -> (i32, i32) {
    %c0_i32 = arith.constant 0 : i32
    %c0_i32_0 = arith.constant 0 : i32
    %c0_i32_1 = arith.constant 0 : i32
    return %c0_i32, %c0_i32_0 : i32, i32
  }
  func.func @transform_13(%arg0: i32) -> (i32, i32) {
    %c0_i32 = arith.constant 0 : i32
    %c0_i32_0 = arith.constant 0 : i32
    %c0_i32_1 = arith.constant 0 : i32
    return %c0_i32, %c0_i32_0 : i32, i32
  }
  func.func @transform_14(%arg0: i32) -> (i32, i32) {
    %c0_i32 = arith.constant 0 : i32
    %c0_i32_0 = arith.constant 0 : i32
    %c0_i32_1 = arith.constant 0 : i32
    return %c0_i32, %c0_i32_0 : i32, i32
  }
  func.func @transform_15(%arg0: i32) -> (i32, i32) {
    %c0_i32 = arith.constant 0 : i32
    %c0_i32_0 = arith.constant 0 : i32
    %c0_i32_1 = arith.constant 0 : i32
    return %c0_i32, %c0_i32_0 : i32, i32
  }
  func.func @transform_16(%arg0: i32) -> (i32, i32) {
    %c0_i32 = arith.constant 0 : i32
    %c0_i32_0 = arith.constant 0 : i32
    %c0_i32_1 = arith.constant 0 : i32
    return %c0_i32, %c0_i32_0 : i32, i32
  }
  func.func @transform_17(%arg0: i32) -> (i32, i32) {
    %c0_i32 = arith.constant 0 : i32
    %c0_i32_0 = arith.constant 0 : i32
    %c0_i32_1 = arith.constant 0 : i32
    return %c0_i32, %c0_i32_0 : i32, i32
  }
  func.func @transform_18(%arg0: i32) -> (i32, i32) {
    %c0_i32 = arith.constant 0 : i32
    %c0_i32_0 = arith.constant 0 : i32
    %c0_i32_1 = arith.constant 0 : i32
    return %c0_i32, %c0_i32_0 : i32, i32
  }
  func.func @transform_19(%arg0: i32) -> (i32, i32) {
    %c0_i32 = arith.constant 0 : i32
    %c0_i32_0 = arith.constant 0 : i32
    %c0_i32_1 = arith.constant 0 : i32
    return %c0_i32, %c0_i32_0 : i32, i32
  }
  func.func @transform_20(%arg0: i32) -> (i32, i32) {
    %c0_i32 = arith.constant 0 : i32
    %c0_i32_0 = arith.constant 0 : i32
    %c0_i32_1 = arith.constant 0 : i32
    return %c0_i32, %c0_i32_0 : i32, i32
  }
  func.func @transform_21(%arg0: i32) -> (i32, i32) {
    %c0_i32 = arith.constant 0 : i32
    %c0_i32_0 = arith.constant 0 : i32
    %c0_i32_1 = arith.constant 0 : i32
    return %c0_i32, %c0_i32_0 : i32, i32
  }
  func.func @transform_22(%arg0: i32) -> (i32, i32) {
    %c0_i32 = arith.constant 0 : i32
    %c0_i32_0 = arith.constant 0 : i32
    %c0_i32_1 = arith.constant 0 : i32
    return %c0_i32, %c0_i32_0 : i32, i32
  }
  func.func @transform_23(%arg0: i32) -> (i32, i32) {
    %c0_i32 = arith.constant 0 : i32
    %c0_i32_0 = arith.constant 0 : i32
    %c0_i32_1 = arith.constant 0 : i32
    return %c0_i32, %c0_i32_0 : i32, i32
  }
  func.func @transform_24(%arg0: i32) -> (i32, i32) {
    %c0_i32 = arith.constant 0 : i32
    %c0_i32_0 = arith.constant 0 : i32
    %c0_i32_1 = arith.constant 0 : i32
    return %c0_i32, %c0_i32_0 : i32, i32
  }
  func.func @transform_25(%arg0: i32) -> (i32, i32) {
    %c0_i32 = arith.constant 0 : i32
    %c0_i32_0 = arith.constant 0 : i32
    %c0_i32_1 = arith.constant 0 : i32
    return %c0_i32, %c0_i32_0 : i32, i32
  }
  func.func @transform_26(%arg0: i32) -> (i32, i32) {
    %c0_i32 = arith.constant 0 : i32
    %c0_i32_0 = arith.constant 0 : i32
    %c0_i32_1 = arith.constant 0 : i32
    return %c0_i32, %c0_i32_0 : i32, i32
  }
  func.func @transform_27(%arg0: i32) -> (i32, i32) {
    %c0_i32 = arith.constant 0 : i32
    %c0_i32_0 = arith.constant 0 : i32
    %c0_i32_1 = arith.constant 0 : i32
    return %c0_i32, %c0_i32_0 : i32, i32
  }
  func.func @transform_28(%arg0: i32) -> (i32, i32) {
    %c0_i32 = arith.constant 0 : i32
    %c0_i32_0 = arith.constant 0 : i32
    %c0_i32_1 = arith.constant 0 : i32
    return %c0_i32, %c0_i32_0 : i32, i32
  }
  func.func @transform_29(%arg0: i32) -> (i32, i32) {
    %c0_i32 = arith.constant 0 : i32
    %c0_i32_0 = arith.constant 0 : i32
    %c0_i32_1 = arith.constant 0 : i32
    return %c0_i32, %c0_i32_0 : i32, i32
  }
  func.func @transform_30(%arg0: i32) -> (i32, i32) {
    %c0_i32 = arith.constant 0 : i32
    %c0_i32_0 = arith.constant 0 : i32
    %c0_i32_1 = arith.constant 0 : i32
    return %c0_i32, %c0_i32_0 : i32, i32
  }
  func.func @transform_31(%arg0: i32) -> (i32, i32, i32) {
    %c0_i32 = arith.constant 0 : i32
    %c0_i32_0 = arith.constant 0 : i32
    %c0_i32_1 = arith.constant 0 : i32
    return %arg0, %c0_i32, %c0_i32_0 : i32, i32, i32
  }
}

</mosaic_0001>

<bundles_post_ra>
// kernel: _lambda_.4
= control target key start
LH: loop header
LB: loop body
LE: loop exit
PB: predicated region body
PF: predicated region fallthrough
CT: control target
= control target key end

     0   :  { %s433_s15 = smov 0   ;;  %s471_s0 = inlined_call_operand.vmem [shape: f32[2,16,64], index: 0, kind: input, shape index: {}]   ;;  %s472_s1 = inlined_call_operand.vmem [shape: bf16[64,32], index: 1, kind: input, shape index: {}]   ;;  %s473_s2 = inlined_call_operand.vmem [shape: f32[1,32], index: 2, kind: input, shape index: {}]   ;;  %s474_s3 = inlined_call_operand.vmem [shape: f32[16,32], index: 3, kind: input, shape index: {}]   ;;  %s475_s4 = inlined_call_operand.vmem [shape: f32[2,16,32], index: 4, kind: output, shape index: {}]  }
   0x1 LB: > { %s348_s16 = sadd.s32 4294967295, %s404_s15   ;;  %p352_p0 = scmp.ge.s32.totalorder %s404_s15, 1  ;;  %s404_s15 = sphi %s433_s15, %s14_s15  }
   0x2   : > { %p162_p1 = scmp.lt.s32.totalorder %s404_s15, 3 }
   0x4   : > { %p163_p2 = pnand %p352_p0, %p162_p1 }
   0x5   : > { %v394_v0 = vld [vmem:[%s472_s1] sm:$0xff] (!%p163_p2)   ;;  %v406_v1 = vmov (!%p163_p2), 0.0   ;;  %v395_v2 = vld [vmem:[%s472_s1 + $0x8] sm:$0xff] (!%p163_p2)   ;;  %vm407_vm0 = vmmov (!%p163_p2), 0   ;;  %p188_p3 = scmp.lt.s32.totalorder (!%p163_p2), %s348_s16, 1  ;;  %v396_v3 = vld [vmem:[%s472_s1 + $0x10] sm:$0xff] (!%p163_p2)  }
   0x6   : > { %166 = sbr.rel (%p163_p2) target bundleno = 241 (0xf1), region = 36  ;;  %372 = vmatprep.subr.bf16.mxu0 (!%p163_p2), %v406_v1  ;;  %380 = vmatprep.mubr.msk.bf16.mxu0 (!%p163_p2), %vm407_vm0, %v406_v1  ;;  %v397_v4 = vld [vmem:[%s472_s1 + $0x18] sm:$0xff] (!%p163_p2)   ;;  %vm241_vm1 = vcmask (!%p163_p2), 523264   ;;  %v357_v8 = vld [vmem:[%s473_s2] ss:$0 sm:$0xff] (!%p163_p2)  ;;  %vm290_vm2 = vcmask (!%p163_p2), 261120  }
   0x7   : > { %373 = vmatpush3.bf16.msra.mxu0 (!%p163_p2), %v394_v0  ;;  %v286_v10 = vld [vmem:[%s474_s3] sm:$0xff] (!%p163_p2)  ;;  %v287_v14 = vld [vmem:[%s474_s3 + $0x8] sm:$0xff] (!%p163_p2) }
   0x8   : > { %374 = vmatprep.subr.bf16.mxu0 (!%p163_p2), %v406_v1 }
   0xb   : > { %375 = vmatpush3.bf16.msra.mxu0 (!%p163_p2), %v395_v2 }
   0xc   : > { %376 = vmatprep.subr.bf16.mxu0 (!%p163_p2), %v406_v1 }
   0xd   : > { %s477_s16 = smov (!%p188_p3, %s348_s16), 1 }
   0xe   : > { %s365_s23 = sshll.u32 %s477_s16, 4 }
   0xf   : > { %s192_s26 = scalar_lea.vmem %s471_s0, %s365_s23  ;;  %377 = vmatpush3.bf16.msra.mxu0 %v396_v3  ;;  %s197_s9 = scalar_lea.vmem %s475_s4, %s365_s23 }
  0x10   : > { %v199_v5 = vld [vmem:[%s192_s26] sm:$0xff]  ;;  %v200_v6 = vld [vmem:[%s192_s26 + $0x8] sm:$0xff]  ;;  %378 = vmatprep.subr.bf16.mxu0 %v406_v1 }
  0x11   : > { %v201_v7 = vpack.c.bf16 %v200_v6, %v199_v5 }
  0x13   : > { %379 = vmatpush3.bf16.msra.mxu0 %v397_v4 }
  0x16   : > { %381 = vmatmul.mubr.msk.bf16.vlgmr.msra.gmra.mrb[0].mxu0 %vm241_vm1, %v201_v7 }
  0xe9   : > { %v279_v9 = vpop.f32.mrb[0].mxu0 }
  0xea   : > { %v280_v11 = vadd.f32 %v357_v8, %v279_v9  ;;  %v382_v12 = vpop.f32.mrb[1].mxu0 }
  0xeb   : > { %v282_v13 = vpop.f32.mrb[2].mxu0 }
  0xec   : > { %v288_v15 = vadd.f32 %v286_v10, %v280_v11  ;;  %v283_v16 = vadd.f32 %v357_v8, %v282_v13  ;;  %v383_v17 = vpop.f32.mrb[3].mxu0 }
  0xee   : > { %291 = vst.msk [vmem:[%s197_s9] sm:$0xff] %vm290_vm2, %v288_v15  ;;  %v289_v18 = vadd.f32 %v287_v14, %v283_v16 }
  0xf0   : > { %292 = vst.msk [vmem:[%s197_s9 + $0x8] sm:$0xff] %vm290_vm2, %v289_v18 }
  0xf1 PF: > { %s14_s15 = sadd.s32 1, %s404_s15  }
  0xf2   : > { %p11_p4 = scmp.ge.s32.totalorder %s14_s15, 4  }
  0xf4   :  { %13 = sbr.rel (!%p11_p4) target bundleno = 1 (0x1), region = 66 }

// kernel: _lambda_.6
= control target key start
LH: loop header
LB: loop body
LE: loop exit
PB: predicated region body
PF: predicated region fallthrough
CT: control target
= control target key end

     0   :  { %9 = vsyncpa [#allocation3], 0  ;;  %s730_s0 = inlined_call_operand.vmem [shape: f32[2,4,128], index: 0, kind: input, shape index: {}]   ;;  %s731_s1 = inlined_call_operand.vmem [shape: f32[1,128], index: 1, kind: input, shape index: {}]   ;;  %s732_s2 = inlined_call_operand.vmem [shape: f32[1,128], index: 2, kind: input, shape index: {}]   ;;  %s733_s3 = inlined_call_operand.vmem [shape: bf16[128,64], index: 3, kind: input, shape index: {}]   ;;  %s734_s4 = inlined_call_operand.hbm [shape: f32[2,4,64], index: 4, kind: output, shape index: {}]  }
   0x1   :  { %11 = vsyncpa [#allocation3 + $0x1], 0  ;;  %s598_s15 = smov 0   ;;  %s600_s16 = smov 0  }
   0x2   :  { %s602_s17 = smov 0   ;;  %s604_s18 = smov 0  }
   0x3 LB: > { %s619_s19 = sadd.s32 4294967295, %s568_s18   ;;  %s406_s20 = sadd.s32 4294967294, %s568_s18   ;;  %s568_s18 = sphi %s604_s18, %s740_s18   ;;  %s564_s17 = sphi %s602_s17, %s739_s17   ;;  %s560_s16 = sphi %s600_s16, %s738_s16   ;;  %s556_s15 = sphi %s598_s15, %s737_s15  }
   0x4   : > { %s623_s21 = sadd.s32 1, %s568_s18   ;;  %s113_s22 = sadd.s32 1, %s564_s17 }
   0x5   : > { %s110_s23 = ssub.s32 %s568_s18, %s623_s21  ;;  %p123_p0 = scmp.ne.s32.totalorder %s564_s17, %s560_s16 }
   0x6   : > { %p111_p1 = scmp.eq.s32.totalorder %s110_s23, 0  ;;  %p124_p2 = scmp.eq.s32.totalorder %s619_s19, 1 }
   0x7   : > { %p129_p3 = scmp.ne.s32.totalorder %s560_s16, %s556_s15  ;;  %p130_p4 = scmp.eq.s32.totalorder %s406_s20, 1 }
   0x8   : > { %s634_s24 = scalar_select %p111_p1, %s564_s17, %s113_s22  }
   0x9   : > { %p636_p5 = por %p124_p2, %p123_p0  ;;  %p640_p6 = por %p130_p4, %p129_p3 }
   0xa   : > { %p409_p7 = scmp.ge.s32.totalorder %s568_s18, 1  ;;  %p164_p8 = scmp.lt.s32.totalorder %s568_s18, 3 }
   0xc   : > { %p165_p9 = pnand %p409_p7, %p164_p8 }
   0xd   : > { %p189_p10 = scmp.lt.s32.totalorder (!%p165_p9), %s619_s19, 1  ;;  %vm197_vm0 = vcmask (!%p165_p9), 1043456   ;;  %v496_v2 = vld [vmem:[%s733_s3] sm:$0xff] (!%p165_p9)   ;;  %v570_v3 = vmov (!%p165_p9), 0.0   ;;  %v497_v4 = vld [vmem:[%s733_s3 + $0x8] sm:$0xff] (!%p165_p9)   ;;  %v498_v10 = vld [vmem:[%s733_s3 + $0x10] sm:$0xff] (!%p165_p9)  }
   0xe   : > { %168 = sbr.rel (%p165_p9) target bundleno = 568 (0x238), region = 36  ;;  %435 = vmatprep.subr.bf16.mxu0 (!%p165_p9), %v570_v3  ;;  %v499_v11 = vld [vmem:[%s733_s3 + $0x18] sm:$0xff] (!%p165_p9)   ;;  %v500_v12 = vld [vmem:[%s733_s3 + $0x20] sm:$0xff] (!%p165_p9)   ;;  %vm571_vm1 = vmmov (!%p165_p9), 0   ;;  %v501_v13 = vld [vmem:[%s733_s3 + $0x28] sm:$0xff] (!%p165_p9)   ;;  %s186_s9 = sand.u32 (!%p165_p9), 1, %s560_s16  }
   0xf   : > { %436 = vmatpush3.bf16.msra.mxu0 (!%p165_p9), %v496_v2  ;;  %451 = vmatprep.mubr.msk.bf16.mxu0 (!%p165_p9), %vm571_vm1, %v570_v3  ;;  %v502_v14 = vld [vmem:[%s733_s3 + $0x30] sm:$0xff] (!%p165_p9)   ;;  %v503_v15 = vld [vmem:[%s733_s3 + $0x38] sm:$0xff] (!%p165_p9)   ;;  %v412_v20 = vld [vmem:[%s731_s1] ss:$0 sm:$0xff] (!%p165_p9)  ;;  %s410_s10 = sshll.u32 (!%p165_p9), %s186_s9, 2  ;;  %s423_s11 = sshll.u32 (!%p165_p9), %s619_s19, 6 }
  0x10   : > { %437 = vmatprep.subr.bf16.mxu0 (!%p165_p9), %v570_v3  ;;  %v413_v22 = vld [vmem:[%s732_s2] ss:$0 sm:$0xff] (!%p165_p9)  ;;  %s188_s12 = scalar_lea.vmem (!%p165_p9), [#allocation2], %s410_s10  ;;  %vm331_vm2 = vcmask (!%p165_p9), 519168   ;;  %s688_s22 = scalar_lea.hbm (!%p165_p9), %s734_s4, %s423_s11 }
  0x11   : > { %s347_s13 = sshll.u32 (!%p165_p9), %s188_s12, 4  ;;  %s334_s23 = scalar_lea.sflag (!%p165_p9), [#allocation3], %s186_s9  ;;  %s690_s13 = int_to_ptr.vmem [resolvable:$true] %s347_s13 }
  0x13   : > { %438 = vmatpush3.bf16.msra.mxu0 (!%p165_p9), %v497_v4 }
  0x14   : > { %439 = vmatprep.subr.bf16.mxu0 (!%p165_p9), %v570_v3 }
  0x15   : > { %s190_s27 = scalar_select %p189_p10, %s619_s19, 1 }
  0x16   : > { %s572_s19 = smov [#allocation2]  }
  0x17   : > { %s411_s28 = sshll.u32 %s190_s27, 2  ;;  %440 = vmatpush3.bf16.msra.mxu0 %v498_v10  ;;  %s506_s27 = scalar_lea.vmem %s690_s13, 64 }
  0x18   : > { %s192_s5 = scalar_lea.vmem %s730_s0, %s411_s28  ;;  %441 = vmatprep.subr.bf16.mxu0 %v570_v3  ;;  %p507_p11 = scmp.ne.s32.totalorder %s690_s13, %s506_s27 }
  0x19   : > { %v194_v0 = vld [vmem:[%s192_s5] sm:$0xf]  ;;  %s510_s28 = sshll.u32 %s572_s19, 4  ;;  %s511_s28 = int_to_ptr.vmem [resolvable:$false] %s510_s28 }
  0x1a   : > { %v198_v1 = vsel %vm197_vm0, %v194_v0, 0.0  ;;  %p508_p12 = pnand %p507_p11, %p636_p5  ;;  %s512_s29 = scalar_lea.vmem %s511_s28, 128 }
  0x1b   : > { %199 = vadd.xlane.f32.xlu0 %v198_v1  ;;  %442 = vmatpush3.bf16.msra.mxu0 %v499_v11  ;;  %p513_p0 = scmp.lt.s32.totalorder %s690_s13, %s511_s28  ;;  %p514_p1 = scmp.lt.s32.totalorder %s512_s29, %s506_s27 }
  0x1c   : > { %443 = vmatprep.subr.bf16.mxu0 %v570_v3  ;;  %p509_p13 = pneg %p508_p12 }
  0x1d   : > { %p515_p2 = por %p514_p1, %p513_p0 }
  0x1f   : > { %444 = vmatpush3.bf16.msra.mxu0 %v500_v12  ;;  %p516_p3 = pnand %p515_p2, %p509_p13 }
  0x20   : > { %445 = vmatprep.subr.bf16.mxu0 %v570_v3 }
  0x23   : > { %446 = vmatpush3.bf16.msra.mxu0 %v501_v13 }
  0x24   : > { %447 = vmatprep.subr.bf16.mxu0 %v570_v3 }
  0x27   : > { %448 = vmatpush3.bf16.msra.mxu0 %v502_v14 }
  0x28   : > { %449 = vmatprep.subr.bf16.mxu0 %v570_v3 }
  0x2b   : > { %450 = vmatpush3.bf16.msra.mxu0 %v503_v15 }
  0xa8   : > { %v200_v5 = vpop.xlane.xlu0 %199 }
  0xa9   : > { %v202_v6 = vmul.f32 0.0078125, %v200_v5 }
  0xab   : > { %v203_v7 = vsub.f32 %v194_v0, %v202_v6 }
  0xad   : > { %v204_v8 = vmul.f32 %v203_v7, %v203_v7 }
  0xaf   : > { %v205_v9 = vsel %vm197_vm0, %v204_v8, 0.0 }
  0xb0   : > { %206 = vadd.xlane.f32.xlu0 %v205_v9 }
 0x13d   : > { %v207_v16 = vpop.xlane.xlu0 %206 }
 0x13e   : > { %v208_v17 = vmul.f32 0.0078125, %v207_v16 }
 0x140   : > { %v209_v18 = vadd.f32 1e-05, %v208_v17 }
 0x142   : > { %504 = vrsqrt.f32 %v209_v18 }
 0x14c   : > { %v505_v19 = vpop.eup %504 }
 0x14d   : > { %v211_v21 = vmul.f32 %v505_v19, %v203_v7 }
 0x14f   : > { %v218_v23 = vmul.f32 %v412_v20, %v211_v21 }
 0x151   : > { %v225_v24 = vadd.f32 %v413_v22, %v218_v23 }
 0x153   : > { %v226_v25 = vpack.c.bf16 %v225_v24, %v225_v24 }
 0x155   : > { %452 = vmatmul.mubr.bf16.vlgmr.msra.gmra.mrb[0].mxu0 %v226_v25 }
 0x228   : > { %v325_v26 = vpop.f32.mrb[0].mxu0 }
 0x229   : > { %332 = vst.msk [vmem:[%s188_s12] sm:$0xf] %vm331_vm2, %v325_v26  ;;  %v453_v27 = vpop.f32.mrb[1].mxu0 }
 0x22a   : > { %v328_v28 = vpop.f32.mrb[2].mxu0 }
 0x22b   : > { %519 = shalt.err (!%p516_p3)
}
 0x22c   : > { %s520_s30 = scalar_lea.hbm %s688_s22, 64  ;;  %s524_s7 = scalar_lea.hbm %s734_s4, 128 }
 0x22d   : > { %p521_p4 = scmp.ne.s32.totalorder %s688_s22, %s520_s30  ;;  %p525_p9 = scmp.lt.u32.totalorder %s688_s22, %s734_s4 }
 0x22e   : > { %p526_p10 = scmp.lt.u32.totalorder %s524_s7, %s520_s30  ;;  %p528_p12 = scmp.lt.u32.totalorder %s520_s30, %s688_s22 }
 0x22f   : > { %p522_p7 = pnand %p521_p4, %p636_p5 }
 0x230   : > { %p527_p11 = por %p526_p10, %p525_p9 }
 0x231   : > { %p523_p8 = pneg %p522_p7 }
 0x232   : > { %p529_p13 = por %p528_p12, %p527_p11 }
 0x234   : > { %p530_p0 = pnand %p529_p13, %p523_p8 }
 0x236   : > { %533 = shalt.err (!%p530_p0)
}
 0x237   : > { %455 = dma.vmem_to_hbm [thread:$0]  (%p636_p5), %s690_s13, 64, %s688_s22, %s334_s23   ;;  %v454_v29 = vpop.f32.mrb[3].mxu0 }
 0x238 PF: > { %p461_p1 = scmp.ge.s32.totalorder %s568_s18, 2  ;;  %s359_s10 = sand.u32 1, %s556_s15  }
 0x239   : > { %s360_s11 = scalar_lea.sflag [#allocation3], %s359_s10 }
 0x23a   : > { %p458_p2 = pnand %p461_p1, %p640_p6 }
 0x23c   : > { %551 = dma.done.wait (!%p458_p2), %s360_s11, 64  }
 0x23d   : > { %553 = vsyncadd (!%p458_p2), %s360_s11, 4294967232  ;;  %p14_p3 = scmp.ge.s32.totalorder %s623_s21, 4   ;;  %s737_s15 = smov %s560_s16 }
 0x23e   : > { %s738_s16 = smov %s564_s17  ;;  %s739_s17 = smov %s634_s24 }
 0x23f   : > { %s740_s18 = smov %s623_s21  ;;  %16 = sbr.rel (!%p14_p3) target bundleno = 3 (0x3), region = 71 }
 0x246   :  { %365 = vsyncpa [#allocation3], 1 }
 0x247   :  { %367 = vsyncpa [#allocation3 + $0x1], 1 }

// kernel: _lambda_.5
= control target key start
LH: loop header
LB: loop body
LE: loop exit
PB: predicated region body
PF: predicated region fallthrough
CT: control target
= control target key end

     0   :  { %s4526_s6 = smov 1   ;;  %s4527_s10 = smov 2   ;;  %s5586_s0 = inlined_call_operand.smem [shape: u32[32], index: -1, kind: input, shape index: {}] }
   0x1   :  { %s4569_s5 = sld [smem:[%s5586_s0]]   ;;  %s4528_s14 = smov 3  }
   0x2   :  { %s4574_s9 = sld [smem:[%s5586_s0 + %s4526_s6]]   ;;  %s4529_s18 = smov 4  }
   0x3   :  { %s4579_s13 = sld [smem:[%s5586_s0 + %s4527_s10]]   ;;  %s4530_s22 = smov 5  }
   0x4   :  { %s4584_s17 = sld [smem:[%s5586_s0 + %s4528_s14]]   ;;  %s4531_s26 = smov 6  }
   0x5   :  { %s4589_s21 = sld [smem:[%s5586_s0 + %s4529_s18]]   ;;  %s4532_s30 = smov 7  }
   0x6   :  { %s4594_s25 = sld [smem:[%s5586_s0 + %s4530_s22]]   ;;  %s4533_s4 = smov 8  }
   0x7   :  { %s4599_s29 = sld [smem:[%s5586_s0 + %s4531_s26]]   ;;  %s4534_s10 = smov 9  }
   0x8   :  { %s4604_s3 = sld [smem:[%s5586_s0 + %s4532_s30]]   ;;  %s4535_s15 = smov 10  }
   0x9   :  { %s4609_s8 = sld [smem:[%s5586_s0 + %s4533_s4]]   ;;  %s4536_s20 = smov 11  }
   0xa   :  { %5592 = sst [smem:[#allocation2_spill]] %s4584_s17  ;;  %s4537_s26 = smov 12  }
   0xb   :  { %5593 = sst [smem:[#allocation3_spill]] %s4589_s21  ;;  %s4538_s1 = smov 13  }
   0xc   :  { %s4614_s14 = sld [smem:[%s5586_s0 + %s4534_s10]]   ;;  %s4539_s7 = smov 14  }
   0xd   :  { %s4619_s19 = sld [smem:[%s5586_s0 + %s4535_s15]]   ;;  %s4540_s15 = smov 15  }
   0xe   :  { %s4624_s24 = sld [smem:[%s5586_s0 + %s4536_s20]]   ;;  %s4541_s22 = smov 16  }
   0xf   :  { %s4629_s30 = sld [smem:[%s5586_s0 + %s4537_s26]]   ;;  %s4542_s28 = smov 17  }
  0x10   :  { %s4634_s6 = sld [smem:[%s5586_s0 + %s4538_s1]]  }
  0x11   :  { %s4639_s12 = sld [smem:[%s5586_s0 + %s4539_s7]]   ;;  %s4543_s7 = smov 18  }
  0x12   :  { %s4644_s20 = sld [smem:[%s5586_s0 + %s4540_s15]]   ;;  %s4544_s15 = smov 19  }
  0x13   :  { %s4649_s27 = sld [smem:[%s5586_s0 + %s4541_s22]]   ;;  %s4545_s22 = smov 20  }
  0x14   :  { %s4654_s4 = sld [smem:[%s5586_s0 + %s4542_s28]]   ;;  %s4546_s28 = smov 21  }
  0x15   :  { %s4659_s21 = sld [smem:[%s5586_s0 + %s4543_s7]]   ;;  %s4547_s7 = smov 22  }
  0x16   :  { %s4664_s17 = sld [smem:[%s5586_s0 + %s4544_s15]]   ;;  %s4548_s15 = smov 23  }
  0x18   :  { %5594 = sst [smem:[#allocation4_spill]] %s4644_s20 }
  0x19   :  { %5595 = sst [smem:[#allocation5_spill]] %s4649_s27 }
  0x1a   :  { %s4669_s27 = sld [smem:[%s5586_s0 + %s4545_s22]]   ;;  %s4549_s22 = smov 24  }
  0x1b   :  { %5596 = sst [smem:[#allocation6_spill]] %s4659_s21 }
  0x1c   :  { %5597 = sst [smem:[#allocation7_spill]] %s4664_s17 }
  0x1d   :  { %s4674_s20 = sld [smem:[%s5586_s0 + %s4546_s28]]   ;;  %s4550_s28 = smov 25  }
  0x1e   :  { %s4679_s21 = sld [smem:[%s5586_s0 + %s4547_s7]]   ;;  %s4551_s7 = smov 26  }
  0x1f   :  { %s4684_s17 = sld [smem:[%s5586_s0 + %s4548_s15]]   ;;  %s4552_s15 = smov 27  }
  0x20   :  { %5598 = sst [smem:[#allocation8_spill]] %s4669_s27 }
  0x21   :  { %s4689_s27 = sld [smem:[%s5586_s0 + %s4549_s22]]   ;;  %s4553_s22 = smov 28  }
  0x23   :  { %5599 = sst [smem:[#allocation9_spill]] %s4674_s20 }
  0x24   :  { %5600 = sst [smem:[#allocation10_spill]] %s4679_s21 }
  0x25   :  { %5601 = sst [smem:[#allocation11_spill]] %s4684_s17 }
  0x26   :  { %s4694_s20 = sld [smem:[%s5586_s0 + %s4550_s28]]   ;;  %s4554_s28 = smov 29  }
  0x27   :  { %5602 = sst [smem:[#allocation12_spill]] %s4689_s27 }
  0x28   :  { %s4699_s21 = sld [smem:[%s5586_s0 + %s4551_s7]]   ;;  %s4555_s7 = smov 30  }
  0x29   :  { %s4704_s17 = sld [smem:[%s5586_s0 + %s4552_s15]]   ;;  %s4556_s15 = smov 31  }
  0x2a   :  { %s4709_s27 = sld [smem:[%s5586_s0 + %s4553_s22]]   ;;  %s4726_s22 = smov 0  }
  0x2c   :  { %5603 = sst [smem:[#allocation13_spill]] %s4694_s20 }
  0x2d   :  { %s4714_s20 = sld [smem:[%s5586_s0 + %s4554_s28]]  }
  0x2e   :  { %5604 = sst [smem:[#allocation14_spill]] %s4699_s21 }
  0x2f   :  { %5605 = sst [smem:[#allocation15_spill]] %s4704_s17 }
  0x30   :  { %s4719_s21 = sld [smem:[%s5586_s0 + %s4555_s7]]  }
  0x31   :  { %s4724_s17 = sld [smem:[%s5586_s0 + %s4556_s15]]  }
  0x32 LB: > { %s4122_s23 = sadd.s32 4294967295, %s4524_s22   ;;  %p4126_p0 = scmp.ge.s32.totalorder %s4524_s22, 1  ;;  %s4524_s22 = sphi %s4726_s22, %s73_s22  }
  0x33   : > { %p869_p1 = scmp.lt.s32.totalorder %s4524_s22, 3 }
  0x35   : > { %p870_p2 = pnand %p4126_p0, %p869_p1 }
  0x36   : > { %p949_p3 = scmp.lt.s32.totalorder (!%p870_p2), %s4122_s23, 1  ;;  %v962_v0 = vld [vmem:[%s4574_s9] sm:$0xff] (!%p870_p2)  ;;  %vm964_vm0 = vcmask (!%p870_p2), 130048   ;;  %v963_v4 = vld [vmem:[%s4574_s9 + $0x8] sm:$0xff] (!%p870_p2)  ;;  %vm1048_vm1 = vcmask (!%p870_p2), 261120   ;;  %v5590_v20 = vmov (!%p870_p2), 0.0  }
  0x37   : > { %873 = sbr.rel (%p870_p2) target bundleno = 4129 (0x1021), region = 144  ;;  %4238 = vmatprep.mubr.msk.f32.mxu0 (!%p870_p2), %vm964_vm0, %v962_v0  ;;  %v4391_v19 = vld [vmem:[%s4604_s3] sm:$0xff] (!%p870_p2)   ;;  %4241 = vmatprep.subr.bf16.mxu1 (!%p870_p2), %v5590_v20  ;;  %vm4558_vm2 = vmmov (!%p870_p2), 0   ;;  %v4392_v21 = vld [vmem:[%s4604_s3 + $0x8] sm:$0xff] (!%p870_p2)   ;;  %v4395_v41 = vld [vmem:[%s4614_s14 + $0x10] sm:$0xff] (!%p870_p2)   ;;  %vm1210_vm3 = vcmask (!%p870_p2), 523264  }
  0x38   : > { %4245 = vmatprep.mubr.msk.bf16.mxu1 (!%p870_p2), %vm4558_vm2, %v5590_v20  ;;  %4242 = vmatpush3.bf16.msra.mxu1 (!%p870_p2), %v4391_v19  ;;  %v4133_v30 = vld [vmem:[%s4594_s25] ss:$0 sm:$0xff] (!%p870_p2)  ;;  %v4394_v40 = vld [vmem:[%s4614_s14 + $0x8] sm:$0xff] (!%p870_p2)   ;;  %v4396_v42 = vld [vmem:[%s4614_s14 + $0x18] sm:$0xff] (!%p870_p2)   ;;  %s4559_s28 = smov (!%p870_p2), 64   ;;  %vm2253_vm4 = vcmask (!%p870_p2), 1041409  }
  0x39   : > { %4243 = vmatprep.subr.bf16.mxu1 (!%p870_p2), %v5590_v20  ;;  %v4134_v34 = vld [vmem:[%s4599_s29] ss:$0 sm:$0xff] (!%p870_p2)  ;;  %vm2256_vm5 = vcmask (!%p870_p2), 1042434   ;;  %vm2259_vm6 = vcmask (!%p870_p2), 1043459   ;;  %vm2262_vm7 = vcmask (!%p870_p2), 1044484   ;;  %vm2265_vm8 = vcmask (!%p870_p2), 1045509  }
  0x3a   : > { %v4393_v39 = vld [vmem:[%s4614_s14] sm:$0xff] (!%p870_p2)   ;;  %vm2268_vm9 = vcmask (!%p870_p2), 1046534   ;;  %vm2271_vm10 = vcmask (!%p870_p2), 1047559   ;;  %s5612_s1 = sld [smem:[#allocation4_spill]] (!%p870_p2)  ;;  %s5613_s2 = sld [smem:[#allocation5_spill]] (!%p870_p2)  ;;  %vm3987_vm11 = vcmask (!%p870_p2), 1041408  }
  0x3b   : > { %v4135_v43 = vld [vmem:[%s4609_s8] ss:$0 sm:$0xff] (!%p870_p2)  ;;  %s5614_s7 = sld [smem:[#allocation7_spill]] (!%p870_p2)  ;;  %s5615_s10 = sld [smem:[#allocation6_spill]] (!%p870_p2)  ;;  %vm3983_vm12 = vcmask (!%p870_p2), 31744  }
  0x3c   : > { %4244 = vmatpush3.bf16.msra.mxu1 (!%p870_p2), %v4392_v21  ;;  %s5616_s11 = sld [smem:[#allocation8_spill]] (!%p870_p2)  ;;  %s5617_s15 = sld [smem:[#allocation11_spill]] (!%p870_p2) }
  0x3d   : > { %4261 = vmatprep.subr.bf16.mxu1 (!%p870_p2), %v5590_v20  ;;  %s5618_s16 = sld [smem:[#allocation9_spill]] (!%p870_p2)  ;;  %s5619_s18 = sld [smem:[#allocation10_spill]] (!%p870_p2) }
  0x3e   : > { %s5627_s23 = smov (!%p949_p3, %s4122_s23), 1 }
  0x3f   : > { %s4188_s0 = sshll.u32 %s5627_s23, 4 }
  0x40   : > { %s953_s26 = scalar_lea.vmem %s4569_s5, %s4188_s0 }
  0x41   : > { %v960_v1 = vld [vmem:[%s953_s26] sm:$0xff]  ;;  %v961_v2 = vld [vmem:[%s953_s26 + $0x8] sm:$0xff]  ;;  %s5620_s26 = sld [smem:[#allocation12_spill]] }
  0x42   : > { %v4340_v3 = vpack.c.bf16 %v961_v2, %v960_v1  ;;  %v1280_v1 = vlaneseq }
  0x44   : > { %4341 = vmatprep.subr.bf16.mxu0 %v4340_v3  ;;  %v4794_v2 = vshrl.u32 %v1280_v1, 7 }
  0x45   : > { %4343 = vmatpush3.bf16.msra.mxu0 %v4340_v3  ;;  %v4139_v3 = vld [vmem:[%s4619_s19] ss:$0 sm:$0xff] }
  0x46   : > { %4249 = vmatprep.subr.bf16.mxu0 %v5590_v20  ;;  %v4820_v19 = vsub.s32 3, %v4794_v2  ;;  %v4823_v21 = vsub.s32 6, %v4794_v2 }
  0x48   : > { %4239 = vmatmul.mubr.msk.f32.vlgmr.msra.gmra.mrb[0].mxu0 %vm964_vm0, %v963_v4  ;;  %v4798_v4 = vsub.s32 0, %v4794_v2 }
  0x49   : > { %4257 = vmatprep.mubr.msk.bf16.mxu0 %vm4558_vm2, %v5590_v20  ;;  %4250 = vmatpush3.bf16.msra.mxu0 %v4393_v39 }
  0x4a   : > { %4251 = vmatprep.subr.bf16.mxu0 %v5590_v20 }
  0x4d   : > { %4252 = vmatpush3.bf16.msra.mxu0 %v4394_v40 }
  0x4e   : > { %4253 = vmatprep.subr.bf16.mxu0 %v5590_v20 }
  0x51   : > { %4254 = vmatpush3.bf16.msra.mxu0 %v4395_v41 }
  0x52   : > { %4255 = vmatprep.subr.bf16.mxu0 %v5590_v20 }
  0x55   : > { %4256 = vmatpush3.bf16.msra.mxu0 %v4396_v42 }
 0x11b   : > { %v4744_v5 = vpop.f32.mrb[0].mxu0 }
 0x11c   : > { %v4746_v6 = vpop.f32.mrb[1].mxu0  ;;  %v1052_v8 = vsel %vm1048_vm1, %v4744_v5, 0.0 }
 0x11d   : > { %v1049_v7 = vsel %vm1048_vm1, %v4746_v6, 0.0 }
 0x11e   : > { %1050 = vadd.xlane.f32.xlu0 %v1049_v7  ;;  %v4801_v7 = vsub.s32 1, %v4794_v2 }
 0x122   : > { %1053 = vadd.xlane.f32.xlu0 %v1052_v8 }
 0x1ab   : > { %v1051_v9 = vpop.xlane.xlu0 %1050 }
 0x1ac   : > { %v1056_v10 = vmul.f32 0.03125, %v1051_v9 }
 0x1ae   : > { %v1058_v11 = vsub.f32 %v4746_v6, %v1056_v10 }
 0x1af   : > { %v1054_v12 = vpop.xlane.xlu0 %1053 }
 0x1b0   : > { %v1057_v13 = vmul.f32 0.03125, %v1054_v12  ;;  %v1060_v14 = vmul.f32 %v1058_v11, %v1058_v11 }
 0x1b2   : > { %v1059_v15 = vsub.f32 %v4744_v5, %v1057_v13  ;;  %v1062_v16 = vsel %vm1048_vm1, %v1060_v14, 0.0 }
 0x1b3   : > { %1063 = vadd.xlane.f32.xlu1 %v1062_v16  ;;  %v4813_v16 = vsub.s32 4, %v4794_v2 }
 0x1b4   : > { %v1061_v17 = vmul.f32 %v1059_v15, %v1059_v15 }
 0x1b6   : > { %v1065_v18 = vsel %vm1048_vm1, %v1061_v17, 0.0 }
 0x1b7   : > { %1066 = vadd.xlane.f32.xlu1 %v1065_v18 }
 0x240   : > { %v1064_v22 = vpop.xlane.xlu1 %1063 }
 0x241   : > { %v1068_v23 = vmul.f32 0.03125, %v1064_v22 }
 0x243   : > { %v1070_v24 = vadd.f32 1e-05, %v1068_v23 }
 0x244   : > { %v1067_v25 = vpop.xlane.xlu1 %1066 }
 0x245   : > { %4416 = vrsqrt.f32 %v1070_v24  ;;  %v1069_v26 = vmul.f32 0.03125, %v1067_v25  ;;  %v4830_v24 = vsub.s32 5, %v4794_v2 }
 0x247   : > { %v1071_v27 = vadd.f32 1e-05, %v1069_v26  ;;  %v4835_v26 = vsub.s32 7, %v4794_v2 }
 0x249   : > { %4418 = vrsqrt.f32 %v1071_v27 }
 0x24f   : > { %v4417_v28 = vpop.eup %4416 }
 0x250   : > { %v1074_v29 = vmul.f32 %v4417_v28, %v1058_v11 }
 0x252   : > { %v1082_v33 = vmul.f32 %v4133_v30, %v1074_v29 }
 0x253   : > { %v4419_v31 = vpop.eup %4418 }
 0x254   : > { %v1075_v32 = vmul.f32 %v4419_v31, %v1059_v15  ;;  %v1090_v36 = vadd.f32 %v4134_v34, %v1082_v33  ;;  %v4810_v15 = vsub.s32 2, %v4794_v2 }
 0x256   : > { %v1083_v35 = vmul.f32 %v4133_v30, %v1075_v32 }
 0x258   : > { %v1091_v37 = vadd.f32 %v4134_v34, %v1083_v35 }
 0x25a   : > { %v1092_v38 = vpack.c.bf16 %v1091_v37, %v1090_v36 }
 0x25c   : > { %4246 = vmatmul.mubr.msk.bf16.vlgmr.msra.gmra.mrb[0].mxu1 %vm1048_vm1, %v1092_v38 }
 0x25d   : > { %4269 = vmatprep.mubr.msk.bf16.mxu1 %vm4558_vm2, %v5590_v20 }
 0x32f   : > { %v1153_v44 = vpop.f32.mrb[0].mxu1 }
 0x330   : > { %v1154_v45 = vadd.f32 %v4135_v43, %v1153_v44  ;;  %v4247_v46 = vpop.f32.mrb[1].mxu1 }
 0x331   : > { %v1156_v47 = vpop.f32.mrb[2].mxu1 }
 0x332   : > { %v1160_v48 = vmul.f32 0.5, %v1154_v45  ;;  %v1157_v49 = vadd.f32 %v4135_v43, %v1156_v47  ;;  %v4248_v50 = vpop.f32.mrb[3].mxu1 }
 0x334   : > { %4420 = vtanh.f32 %v1160_v48  ;;  %v1161_v51 = vmul.f32 0.5, %v1157_v49 }
 0x336   : > { %4422 = vtanh.f32 %v1161_v51 }
 0x33e   : > { %v4421_v52 = vpop.eup %4420 }
 0x33f   : > { %v1164_v53 = vadd.f32 1.0, %v4421_v52 }
 0x340   : > { %v4423_v54 = vpop.eup %4422 }
 0x341   : > { %v1166_v55 = vmul.f32 0.5, %v1164_v53  ;;  %v1165_v56 = vadd.f32 1.0, %v4423_v54 }
 0x343   : > { %v4779_v57 = vmul.f32 %v1166_v55, %v1154_v45  ;;  %v1167_v58 = vmul.f32 0.5, %v1165_v56 }
 0x345   : > { %v4781_v59 = vmul.f32 %v1167_v58, %v1157_v49  ;;  %v2111_v60 = vrot.slane %v4779_v57, 1  ;;  %v2112_v63 = vrot.slane %v4779_v57, 2  ;;  %v2113_v41 = vrot.slane %v4779_v57, 3 }
 0x346   : > { %v2114_v47 = vrot.slane %v4779_v57, 4  ;;  %v4560_v49 = vmov 1966171168   ;;  %v2115_v53 = vrot.slane %v4779_v57, 5  ;;  %v2116_v58 = vrot.slane %v4779_v57, 6 }
 0x347   : > { %2127 = vrot.lane.b32.xlu0 %v2111_v60, %s4559_s28  ;;  %v2118_v61 = vrot.slane %v4781_v59, 1  ;;  %v1170_v62 = vpack.c.bf16 %v4781_v59, %v4779_v57  ;;  %v2119_v0 = vrot.slane %v4781_v59, 2  ;;  %v1278_v50 = vunpack.c.l.s4 %v4560_v49 }
 0x348   : > { %v2120_v52 = vrot.slane %v4781_v59, 3  ;;  %v2121_v56 = vrot.slane %v4781_v59, 4 }
 0x349   : > { %2143 = vrot.lane.b32.xlu1 %v2118_v61, %s4559_s28  ;;  %4258 = vmatmul.mubr.msk.bf16.vlgmr.msra.gmra.mrb[4].mxu0 %vm1210_vm3, %v1170_v62  ;;  %v1279_v54 = vunpack.c.0.s8 %v1278_v50 }
 0x34b   : > { %2129 = vrot.lane.b32.xlu0 %v2112_v63, %s4559_s28  ;;  %v4877_v61 = vsub.s32 %v1279_v54, %v4794_v2  ;;  %v2122_v63 = vrot.slane %v4781_v59, 5 }
 0x34d   : > { %2145 = vrot.lane.b32.xlu1 %v2119_v0, %s4559_s28  ;;  %v2117_v0 = vrot.slane %v4779_v57, 7 }
 0x41c   : > { %v1248_v8 = vpop.f32.mrb[4].mxu0 }
 0x41d   : > { %v4803_v9 = vadd.f32 %v4139_v3, %v1248_v8  ;;  %v4259_v10 = vpop.f32.mrb[5].mxu0 }
 0x41e   : > { %v1251_v11 = vpop.f32.mrb[6].mxu0 }
 0x41f   : > { %v4260_v12 = vpop.f32.mrb[7].mxu0  ;;  %v1615_v13 = vrot.slane %v4803_v9, %v4801_v7  ;;  %v1607_v14 = vrot.slane %v4803_v9, %v4798_v4  ;;  %v1623_v17 = vrot.slane %v4803_v9, %v4810_v15  ;;  %v1639_v18 = vrot.slane %v4803_v9, %v4813_v16 }
 0x420   : > { %v1631_v22 = vrot.slane %v4803_v9, %v4820_v19  ;;  %v1655_v23 = vrot.slane %v4803_v9, %v4823_v21  ;;  %v1647_v25 = vrot.slane %v4803_v9, %v4830_v24  ;;  %v1663_v27 = vrot.slane %v4803_v9, %v4835_v26 }
 0x421   : > { %1618 = vbcast.lane.b32.xlu1 %v1615_v13, 320  ;;  %1610 = vbcast.lane.b32.xlu0 %v1607_v14, 320  ;;  %v4839_v28 = vadd.f32 %v4139_v3, %v1251_v11  ;;  %v1257_v31 = vand.u32 2147483647, %v4803_v9  ;;  %v1255_v60 = vmax.f32 %v4803_v9, 0.0  ;;  %v4397_v3 = vld [vmem:[%s4634_s6] sm:$0xff]  }
 0x422   : > { %v2123_v9 = vrot.slane %v4781_v59, 6  ;;  %4262 = vmatpush3.bf16.msra.mxu1 %v4397_v3  ;;  %v4398_v11 = vld [vmem:[%s4634_s6 + $0x8] sm:$0xff]  }
 0x423   : > { %v1679_v29 = vrot.slane %v4839_v28, %v4801_v7  ;;  %v1695_v30 = vrot.slane %v4839_v28, %v4820_v19  ;;  %v1711_v32 = vrot.slane %v4839_v28, %v4830_v24  ;;  %v1671_v33 = vrot.slane %v4839_v28, %v4798_v4  ;;  %4263 = vmatprep.subr.bf16.mxu1 %v5590_v20 }
 0x424   : > { %v1259_v34 = vsub.f32 0.0, %v1257_v31  ;;  %v1687_v35 = vrot.slane %v4839_v28, %v4810_v15  ;;  %v1258_v37 = vand.u32 2147483647, %v4839_v28  ;;  %v1727_v38 = vrot.slane %v4839_v28, %v4835_v26  ;;  %v4903_v31 = vld [vmem:[%s4624_s24] sm:$0xff] }
 0x425   : > { %1626 = vbcast.lane.b32.xlu1 %v1623_v17, 320  ;;  %1642 = vbcast.lane.b32.xlu0 %v1639_v18, 320  ;;  %v1703_v39 = vrot.slane %v4839_v28, %v4813_v16  ;;  %v1719_v42 = vrot.slane %v4839_v28, %v4823_v21 }
 0x426   : > { %v1261_v36 = vmul.f32 1.442695, %v1259_v34  ;;  %v1260_v40 = vsub.f32 0.0, %v1258_v37  ;;  %4264 = vmatpush3.bf16.msra.mxu1 %v4398_v11 }
 0x427   : > { %4265 = vmatprep.subr.bf16.mxu1 %v5590_v20 }
 0x428   : > { %4424 = vpow2.f32 %v1261_v36  ;;  %v1263_v43 = vmul.f32 1.442695, %v1260_v40 }
 0x429   : > { %1634 = vbcast.lane.b32.xlu1 %v1631_v22, 320  ;;  %1658 = vbcast.lane.b32.xlu0 %v1655_v23, 320 }
 0x42a   : > { %4426 = vpow2.f32 %v1263_v43 }
 0x42d   : > { %1650 = vbcast.lane.b32.xlu1 %v1647_v25, 320  ;;  %1866 = vbcast.lane.b32.xlu0 %v1615_v13, 328 }
 0x431   : > { %1666 = vbcast.lane.b32.xlu1 %v1663_v27, 320  ;;  %1862 = vbcast.lane.b32.xlu0 %v1607_v14, 328  ;;  %v1256_v14 = vmax.f32 %v4839_v28, 0.0  ;;  %v4400_v28 = vld [vmem:[%s4634_s6 + $0x18] sm:$0xff]  }
 0x432   : > { %v4425_v44 = vpop.eup %4424 }
 0x433   : > { %v1265_v45 = vadd.f32 1.0, %v4425_v44 }
 0x434   : > { %v4427_v46 = vpop.eup %4426 }
 0x435   : > { %1870 = vbcast.lane.b32.xlu1 %v1623_v17, 328  ;;  %1878 = vbcast.lane.b32.xlu0 %v1639_v18, 328  ;;  %4428 = vlog2.f32 %v1265_v45  ;;  %v1266_v48 = vadd.f32 1.0, %v4427_v46  ;;  %v2124_v17 = vrot.slane %v4781_v59, 7 }
 0x437   : > { %4430 = vlog2.f32 %v1266_v48 }
 0x439   : > { %1874 = vbcast.lane.b32.xlu1 %v1631_v22, 328  ;;  %1882 = vbcast.lane.b32.xlu0 %v1647_v25, 328  ;;  %v4399_v22 = vld [vmem:[%s4634_s6 + $0x10] sm:$0xff]  }
 0x43a   : > { %4266 = vmatpush3.bf16.msra.mxu1 %v4399_v22 }
 0x43b   : > { %4267 = vmatprep.subr.bf16.mxu1 %v5590_v20 }
 0x43d   : > { %1886 = vbcast.lane.b32.xlu0 %v1655_v23, 328  ;;  %1682 = vbcast.lane.b32.xlu1 %v1679_v29, 320 }
 0x43e   : > { %4268 = vmatpush3.bf16.msra.mxu1 %v4400_v28 }
 0x43f   : > { %v4429_v51 = vpop.eup %4428  ;;  %4280 = vmatprep.subr.bf16.mxu1 %v5590_v20 }
 0x440   : > { %v1268_v55 = vmul.f32 0.6931472, %v4429_v51 }
 0x441   : > { %1890 = vbcast.lane.b32.xlu0 %v1663_v27, 328  ;;  %1698 = vbcast.lane.b32.xlu1 %v1695_v30, 320  ;;  %v4431_v1 = vpop.eup %4430 }
 0x442   : > { %v1271_v62 = vadd.f32 %v1268_v55, %v1255_v60  ;;  %v1270_v2 = vmul.f32 0.6931472, %v4431_v1 }
 0x444   : > { %v1283_v8 = vrot.slane %v1271_v62, %v4877_v61  ;;  %v1276_v10 = vcombine.high %v1271_v62, %v1271_v62  ;;  %v4894_v23 = vadd.f32 %v1270_v2, %v1256_v14  ;;  %v1502_v43 = vmul.f32 %v1271_v62, %v4779_v57 }
 0x445   : > { %1714 = vbcast.lane.b32.xlu1 %v1711_v32, 320  ;;  %1674 = vbcast.lane.b32.xlu0 %v1671_v33, 320 }
 0x446   : > { %v1291_v12 = vcombine.high %v1283_v8, %v1283_v8  ;;  %v1299_v13 = vrot.slane %v1283_v8, %v4877_v61  ;;  %v1290_v18 = vrot.slane %v1276_v10, %v4877_v61  ;;  %v1513_v54 = vrot.slane %v1502_v43, %v4877_v61 }
 0x448   : > { %v1313_v25 = vrot.slane %v1291_v12, %v4877_v61  ;;  %v1321_v27 = vcombine.high %v1299_v13, %v1299_v13  ;;  %v1521_v2 = vcombine.high %v1513_v54, %v1513_v54  ;;  %v1529_v11 = vrot.slane %v1513_v54, %v4877_v61 }
 0x449   : > { %1898 = vbcast.lane.b32.xlu1 %v1679_v29, 328  ;;  %1690 = vbcast.lane.b32.xlu0 %v1687_v35, 320  ;;  %v1377_v29 = vrot.slane %v1299_v13, %v4798_v4  ;;  %v1325_v13 = vcombine.high %v4894_v23, %v4894_v23 }
 0x44a   : > { %v1323_v34 = vcombine.high %v1313_v25, %v1313_v25  ;;  %v1381_v37 = vrot.slane %v1313_v25, %v4798_v4 }
 0x44c   : > { %v1455_v46 = vmul.f32 %v1381_v37, %v4903_v31 }
 0x44d   : > { %1730 = vbcast.lane.b32.xlu1 %v1727_v38, 320  ;;  %1706 = vbcast.lane.b32.xlu0 %v1703_v39, 320 }
 0x451   : > { %2131 = vrot.lane.b32.xlu1 %v2113_v41, %s4559_s28  ;;  %1722 = vbcast.lane.b32.xlu0 %v1719_v42, 320 }
 0x455   : > { %1906 = vbcast.lane.b32.xlu1 %v1695_v30, 328  ;;  %1902 = vbcast.lane.b32.xlu0 %v1687_v35, 328  ;;  %v1306_v30 = vrot.slane %v1290_v18, %v4877_v61  ;;  %v1454_v35 = vmul.f32 %v1377_v29, %v4903_v31 }
 0x457   : > { %v1322_v36 = vcombine.high %v1306_v30, %v1306_v30  ;;  %v1393_v40 = vrot.slane %v1306_v30, %v4798_v4  ;;  %v1470_v44 = vmul.f32 1.442695, %v1454_v35 }
 0x459   : > { %1910 = vbcast.lane.b32.xlu1 %v1703_v39, 328  ;;  %1894 = vbcast.lane.b32.xlu0 %v1671_v33, 328  ;;  %v1385_v33 = vrot.slane %v1321_v27, %v4798_v4  ;;  %v1401_v45 = vrot.slane %v1322_v36, %v4798_v4  ;;  %v1458_v49 = vmul.f32 %v1393_v40, %v4903_v31  ;;  %4432 = vpow2.f32 %v1470_v44 }
 0x45a   : > { %v4950_v40 = vrot.slane %v1325_v13, %v4877_v61 }
 0x45b   : > { %v1456_v41 = vmul.f32 %v1385_v33, %v4903_v31  ;;  %v1460_v55 = vmul.f32 %v1401_v45, %v4903_v31  ;;  %v1478_v1 = vmul.f32 1.442695, %v1458_v49  ;;  %v1551_v33 = vcombine.high %v1529_v11, %v1529_v11 }
 0x45c   : > { %v1341_v54 = vcombine.high %v4950_v40, %v4950_v40 }
 0x45d   : > { %1914 = vbcast.lane.b32.xlu1 %v1711_v32, 328  ;;  %2125 = vrot.lane.b32.xlu0 %v4779_v57, %s4559_s28  ;;  %v1332_v32 = vrot.slane %v4894_v23, %v4877_v61  ;;  %v1482_v12 = vmul.f32 1.442695, %v1460_v55 }
 0x45f   : > { %v1348_v39 = vrot.slane %v1332_v32, %v4877_v61  ;;  %v1340_v50 = vcombine.high %v1332_v32, %v1332_v32  ;;  %v1543_v32 = vrot.slane %v1521_v2, %v4877_v61 }
 0x461   : > { %1918 = vbcast.lane.b32.xlu1 %v1719_v42, 328  ;;  %2141 = vrot.lane.b32.xlu0 %v4781_v59, %s4559_s28  ;;  %v1389_v42 = vrot.slane %v1323_v34, %v4798_v4  ;;  %v1409_v48 = vrot.slane %v1348_v39, %v4798_v4  ;;  %v1370_v51 = vcombine.high %v1348_v39, %v1348_v39 }
 0x462   : > { %v1362_v3 = vrot.slane %v1340_v50, %v4877_v61  ;;  %v1739_v44 = vrot.slane %v1543_v32, %v4798_v4 }
 0x463   : > { %v1462_v62 = vmul.f32 %v1409_v48, %v4903_v31  ;;  %v1417_v8 = vrot.slane %v1370_v51, %v4798_v4  ;;  %v4433_v36 = vpop.eup %4432 }
 0x464   : > { %v1413_v22 = vrot.slane %v1362_v3, %v4798_v4  ;;  %v1372_v25 = vcombine.high %v1362_v3, %v1362_v3  ;;  %v1828_v50 = vmul.f32 0.0, %v4433_v36 }
 0x465   : > { %1922 = vbcast.lane.b32.xlu1 %v1727_v38, 328  ;;  %2133 = vrot.lane.b32.xlu0 %v2114_v47, %s4559_s28  ;;  %v1292_v38 = vcombine.high %v1290_v18, %v1290_v18  ;;  %v1486_v18 = vmul.f32 1.442695, %v1462_v62  ;;  %v1464_v27 = vmul.f32 %v1417_v8, %v4903_v31 }
 0x466   : > { %v1463_v37 = vmul.f32 %v1413_v22, %v4903_v31 }
 0x467   : > { %v1320_v47 = vrot.slane %v1292_v38, %v4877_v61  ;;  %v1421_v38 = vrot.slane %v1372_v25, %v4798_v4  ;;  %v1490_v39 = vmul.f32 1.442695, %v1464_v27  ;;  %v1369_v25 = vrot.slane %v1341_v54, %v4877_v61 }
 0x469   : > { %2147 = vrot.lane.b32.xlu1 %v2120_v52, %s4559_s28  ;;  %2135 = vrot.lane.b32.xlu0 %v2115_v53, %s4559_s28  ;;  %v1474_v52 = vmul.f32 1.442695, %v1456_v41  ;;  %v1457_v53 = vmul.f32 %v1389_v42, %v4903_v31  ;;  %v1324_v60 = vcombine.high %v1320_v47, %v1320_v47  ;;  %v1735_v41 = vrot.slane %v1529_v11, %v4798_v4 }
 0x46b   : > { %4434 = vpow2.f32 %v1474_v52  ;;  %v1476_v10 = vmul.f32 1.442695, %v1457_v53  ;;  %v1488_v52 = vmul.f32 1.442695, %v1463_v37  ;;  %v1465_v53 = vmul.f32 %v1421_v38, %v4903_v31 }
 0x46d   : > { %2149 = vrot.lane.b32.xlu1 %v2121_v56, %s4559_s28  ;;  %2137 = vrot.lane.b32.xlu0 %v2116_v58, %s4559_s28  ;;  %v1472_v56 = vmul.f32 1.442695, %v1455_v46  ;;  %v1397_v58 = vrot.slane %v1320_v47, %v4798_v4  ;;  %v1743_v46 = vrot.slane %v1551_v33, %v4798_v4  ;;  %v1492_v22 = vmul.f32 1.442695, %v1465_v53 }
 0x46f   : > { %4436 = vpow2.f32 %v1472_v56  ;;  %v1459_v14 = vmul.f32 %v1397_v58, %v4903_v31  ;;  %v1553_v58 = vcombine.high %v1543_v32, %v1543_v32 }
 0x470   : > { %4438 = vpow2.f32 %v1478_v1 }
 0x471   : > { %2151 = vrot.lane.b32.xlu1 %v2122_v63, %s4559_s28  ;;  %2139 = vrot.lane.b32.xlu0 %v2117_v0, %s4559_s28  ;;  %v4927_v63 = vpop.permute.xlu0 %2127  ;;  %v4929_v0 = vpop.permute.xlu1 %2143  ;;  %4440 = vpow2.f32 %v1476_v10  ;;  %v1480_v34 = vmul.f32 1.442695, %v1459_v14 }
 0x472   : > { %4442 = vpow2.f32 %v1482_v12 }
 0x473   : > { %4444 = vpow2.f32 %v1486_v18 }
 0x474   : > { %4446 = vpow2.f32 %v1480_v34 }
 0x475   : > { %2153 = vrot.lane.b32.xlu1 %v2123_v9, %s4559_s28  ;;  %v1506_v9 = vcombine.high %v1502_v43, %v1502_v43  ;;  %v4941_v30 = vpop.permute.xlu0 %2129  ;;  %v4943_v28 = vpop.permute.xlu1 %2145  ;;  %4448 = vpow2.f32 %v1490_v39 }
 0x476   : > { %v4435_v48 = vpop.eup %4434 }
 0x477   : > { %v1520_v29 = vrot.slane %v1506_v9, %v4877_v61  ;;  %v1830_v2 = vmul.f32 0.0, %v4435_v48 }
 0x479   : > { %2155 = vrot.lane.b32.xlu1 %v2124_v17, %s4559_s28  ;;  %v1405_v17 = vrot.slane %v1324_v60, %v4798_v4  ;;  %v1536_v42 = vrot.slane %v1520_v29, %v4877_v61  ;;  %v1522_v47 = vcombine.high %v1520_v29, %v1520_v29  ;;  %v4437_v55 = vpop.eup %4436  ;;  %v1747_v29 = vrot.slane %v1553_v58, %v4798_v4 }
 0x47a   : > { %v4439_v1 = vpop.eup %4438  ;;  %v1829_v18 = vmul.f32 0.0, %v4437_v55 }
 0x47b   : > { %v1461_v35 = vmul.f32 %v1405_v17, %v4903_v31  ;;  %v1751_v56 = vrot.slane %v1536_v42, %v4798_v4  ;;  %v1552_v60 = vcombine.high %v1536_v42, %v1536_v42  ;;  %v1550_v10 = vrot.slane %v1522_v47, %v4877_v61  ;;  %v4441_v11 = vpop.eup %4440 }
 0x47c   : > { %v4443_v17 = vpop.eup %4442 }
 0x47d   : > { %v1484_v51 = vmul.f32 1.442695, %v1461_v35  ;;  %v4445_v27 = vpop.eup %4444  ;;  %v1759_v32 = vrot.slane %v1552_v60, %v4798_v4  ;;  %v1755_v47 = vrot.slane %v1550_v10, %v4798_v4  ;;  %v1554_v48 = vcombine.high %v1550_v10, %v1550_v10 }
 0x47e   : > { %v1355_v60 = vrot.slane %v4950_v40, %v4877_v61 }
 0x47f   : > { %4450 = vpow2.f32 %v1484_v51 }
 0x480   : > { %4452 = vpow2.f32 %v1488_v52 }
 0x481   : > { %4454 = vpow2.f32 %v1492_v22 }
 0x493   : > { %v1619_v43 = vpop.permute.xlu1 %1618  ;;  %v1611_v45 = vpop.permute.xlu0 %1610 }
 0x494   : > { %v1812_v49 = vmul.f32 %v1735_v41, %v1611_v45  ;;  %v1813_v3 = vmul.f32 %v1739_v44, %v1619_v43  ;;  %v1503_v43 = vmul.f32 %v4894_v23, %v4781_v59  ;;  %v1429_v44 = vrot.slane %v1369_v25, %v4798_v4 }
 0x495   : > { %v1373_v45 = vcombine.high %v1369_v25, %v1369_v25  ;;  %v1425_v25 = vrot.slane %v1355_v60, %v4798_v4 }
 0x496   : > { %v4960_v62 = vadd.f32 %v1828_v50, %v1812_v49  ;;  %v1833_v37 = vadd.f32 %v1829_v18, %v1813_v3  ;;  %v1831_v49 = vmul.f32 0.0, %v4441_v11 }
 0x497   : > { %v1627_v8 = vpop.permute.xlu1 %1626  ;;  %v1643_v9 = vpop.permute.xlu0 %1642  ;;  %v1437_v3 = vrot.slane %v1373_v45, %v4798_v4 }
 0x498   : > { %v1814_v12 = vmul.f32 %v1743_v46, %v1627_v8  ;;  %v1816_v13 = vmul.f32 %v1751_v56, %v1643_v9  ;;  %v1836_v14 = vmul.f32 %v4439_v1, %v4960_v62  ;;  %v4447_v46 = vpop.eup %4446  ;;  %v1467_v1 = vmul.f32 %v1429_v44, %v4903_v31 }
 0x499   : > { %v4449_v51 = vpop.eup %4448  ;;  %v1837_v54 = vmul.f32 %v4447_v46, %v1833_v37  ;;  %v1763_v9 = vrot.slane %v1554_v48, %v4798_v4 }
 0x49a   : > { %v1834_v33 = vadd.f32 %v1830_v2, %v1814_v12  ;;  %v4967_v34 = vadd.f32 %v1836_v14, %v1816_v13  ;;  %v4451_v8 = vpop.eup %4450  ;;  %v1562_v2 = vrot.slane %v1503_v43, %v4877_v61  ;;  %v1555_v14 = vcombine.high %v1503_v43, %v1503_v43  ;;  %v4145_v43 = vld [vmem:[%s4629_s30] ss:$0 sm:$0xff] }
 0x49b   : > { %v1635_v35 = vpop.permute.xlu1 %1634  ;;  %v1659_v36 = vpop.permute.xlu0 %1658 }
 0x49c   : > { %v1815_v38 = vmul.f32 %v1747_v29, %v1635_v35  ;;  %v1818_v39 = vmul.f32 %v1759_v32, %v1659_v36  ;;  %v1838_v41 = vmul.f32 %v4443_v17, %v1834_v33  ;;  %v4970_v42 = vmul.f32 %v4445_v27, %v4967_v34  ;;  %v4453_v11 = vpop.eup %4452 }
 0x49d   : > { %v1496_v27 = vmul.f32 1.442695, %v1467_v1  ;;  %v1371_v29 = vcombine.high %v1355_v60, %v1355_v60  ;;  %v1469_v32 = vmul.f32 %v1437_v3, %v4903_v31  ;;  %v1570_v35 = vcombine.high %v1562_v2, %v1562_v2 }
 0x49e   : > { %v4976_v50 = vadd.f32 %v1838_v41, %v1818_v39  ;;  %v4978_v58 = vadd.f32 %v1831_v49, %v1815_v38  ;;  %v5000_v45 = vrot.slane %v1555_v14, %v4877_v61  ;;  %v5012_v60 = vmul.f32 %v4145_v43, %v4781_v59 }
 0x49f   : > { %v1651_v52 = vpop.permute.xlu1 %1650  ;;  %v1867_v53 = vpop.permute.xlu0 %1866  ;;  %4456 = vpow2.f32 %v1496_v27  ;;  %v1433_v48 = vrot.slane %v1371_v29, %v4798_v4  ;;  %v1500_v49 = vmul.f32 1.442695, %v1469_v32 }
 0x4a0   : > { %v1817_v55 = vmul.f32 %v1755_v47, %v1651_v52  ;;  %v1925_v56 = vmul.f32 %v1867_v53, %v1833_v37  ;;  %v4981_v23 = vmul.f32 %v4449_v51, %v4976_v50  ;;  %v1839_v40 = vmul.f32 %v4451_v8, %v4978_v58  ;;  %v4455_v37 = vpop.eup %4454 }
 0x4a1   : > { %v1466_v47 = vmul.f32 %v1425_v25, %v4903_v31  ;;  %v1592_v52 = vrot.slane %v1570_v35, %v4877_v61  ;;  %v5008_v53 = vmul.f32 %v4145_v43, %v4779_v57  ;;  %v1571_v1 = vcombine.high %v5000_v45, %v5000_v45 }
 0x4a2   : > { %v4988_v10 = vadd.f32 %v1837_v54, %v1817_v55  ;;  %v1947_v17 = vsel %vm1210_vm3, %v1925_v56, 0.0  ;;  %v1468_v8 = vmul.f32 %v1433_v48, %v4903_v31  ;;  %4458 = vpow2.f32 %v1500_v49 }
 0x4a3   : > { %v1667_v12 = vpop.permute.xlu1 %1666  ;;  %v1863_v13 = vpop.permute.xlu0 %1862  ;;  %v1948_v38 = vrot.slane %v1947_v17, 4  ;;  %v1494_v3 = vmul.f32 1.442695, %v1466_v47  ;;  %v1771_v57 = vrot.slane %v1592_v52, %v4798_v4  ;;  %v2064_v59 = vrot.slane %v5008_v53, 2 }
 0x4a4   : > { %v1819_v18 = vmul.f32 %v1763_v9, %v1667_v12  ;;  %v1845_v22 = vmul.f32 %v4453_v11, %v4988_v10  ;;  %v1924_v51 = vmul.f32 %v1863_v13, %v4960_v62  ;;  %v1602_v11 = vcombine.high %v1592_v52, %v1592_v52 }
 0x4a5   : > { %v1949_v54 = vadd.f32 %v1948_v38, %v1947_v17  ;;  %v2063_v12 = vrot.slane %v5008_v53, 1  ;;  %v2070_v25 = vrot.slane %v5012_v60, 1  ;;  %v1599_v27 = vrot.slane %v1571_v1, %v4877_v61 }
 0x4a6   : > { %v4996_v36 = vadd.f32 %v1839_v40, %v1819_v18  ;;  %v1940_v62 = vsel %vm1210_vm3, %v1924_v51, 0.0  ;;  %v1578_v40 = vrot.slane %v1562_v2, %v4877_v61  ;;  %4460 = vpow2.f32 %v1494_v3 }
 0x4a7   : > { %v1871_v39 = vpop.permute.xlu1 %1870  ;;  %v1879_v41 = vpop.permute.xlu0 %1878  ;;  %v1950_v13 = vrot.slane %v1949_v54, 2  ;;  %v1941_v31 = vrot.slane %v1940_v62, 4  ;;  %v1498_v29 = vmul.f32 1.442695, %v1468_v8  ;;  %v2065_v2 = vrot.slane %v5008_v53, 3 }
 0x4a8   : > { %v1926_v44 = vmul.f32 %v1871_v39, %v1834_v33  ;;  %v1847_v46 = vmul.f32 %v4455_v37, %v4996_v36  ;;  %v1779_v37 = vrot.slane %v1602_v11, %v4798_v4  ;;  %v1767_v52 = vrot.slane %v1578_v40, %v4798_v4 }
 0x4a9   : > { %v4457_v39 = vpop.eup %4456  ;;  %v1951_v43 = vadd.f32 %v1950_v13, %v1949_v54  ;;  %4462 = vpow2.f32 %v1498_v29 }
 0x4aa   : > { %v1954_v33 = vsel %vm1210_vm3, %v1926_v44, 0.0  ;;  %v1928_v44 = vmul.f32 %v1879_v41, %v4967_v34  ;;  %v1603_v41 = vcombine.high %v1599_v27, %v1599_v27 }
 0x4ab   : > { %v1875_v55 = vpop.permute.xlu1 %1874  ;;  %v1883_v56 = vpop.permute.xlu0 %1882  ;;  %v1955_v9 = vrot.slane %v1954_v33, 4 }
 0x4ac   : > { %v1927_v35 = vmul.f32 %v1875_v55, %v4978_v58  ;;  %v1942_v58 = vadd.f32 %v1941_v31, %v1940_v62  ;;  %v1787_v55 = vrot.slane %v1599_v27, %v4798_v4  ;;  %v4459_v8 = vpop.eup %4458  ;;  %v1929_v11 = vmul.f32 %v1883_v56, %v4988_v10 }
 0x4ad   : > { %v1956_v32 = vadd.f32 %v1955_v9, %v1954_v33  ;;  %v2066_v33 = vrot.slane %v5008_v53, 4  ;;  %v1952_v9 = vrot.slane %v1951_v43, 1  ;;  %v1585_v62 = vrot.slane %v5000_v45, %v4877_v61 }
 0x4ae   : > { %v1961_v34 = vsel %vm1210_vm3, %v1927_v35, 0.0  ;;  %v1943_v27 = vrot.slane %v1942_v58, 2  ;;  %v1795_v56 = vrot.slane %v1603_v41, %v4798_v4 }
 0x4af   : > { %v1887_v14 = vpop.permute.xlu0 %1886  ;;  %v1683_v17 = vpop.permute.xlu1 %1682  ;;  %v1957_v54 = vrot.slane %v1956_v32, 2 }
 0x4b0   : > { %v1821_v18 = vmul.f32 %v1771_v57, %v1683_v17  ;;  %v1968_v57 = vsel %vm1210_vm3, %v1928_v44, 0.0  ;;  %v4461_v45 = vpop.eup %4460 }
 0x4b2   : > { %v1849_v38 = vadd.f32 %v1845_v22, %v1821_v18  ;;  %v1600_v22 = vcombine.high %v1578_v40, %v1578_v40  ;;  %v1930_v18 = vmul.f32 %v1887_v14, %v4976_v50  ;;  %v1953_v50 = vadd.f32 %v1952_v9, %v1951_v43 }
 0x4b3   : > { %v1891_v47 = vpop.permute.xlu0 %1890  ;;  %v1699_v48 = vpop.permute.xlu1 %1698  ;;  %v1969_v14 = vrot.slane %v1968_v57, 4 }
 0x4b4   : > { %v1823_v51 = vmul.f32 %v1779_v37, %v1699_v48  ;;  %v1853_v1 = vmul.f32 %v4457_v39, %v1849_v38  ;;  %v1775_v35 = vrot.slane %v1600_v22, %v4798_v4  ;;  %v1958_v39 = vadd.f32 %v1957_v54, %v1956_v32 }
 0x4b5   : > { %v1975_v48 = vsel %vm1210_vm3, %v1929_v11, 0.0  ;;  %v1982_v22 = vsel %vm1210_vm3, %v1930_v18, 0.0  ;;  %v1931_v41 = vmul.f32 %v1891_v47, %v4996_v36  ;;  %v2094_v18 = vadd.f32 %v2063_v12, %v1953_v50 }
 0x4b6   : > { %v5033_v3 = vadd.f32 %v1847_v46, %v1823_v51  ;;  %v1962_v46 = vrot.slane %v1961_v34, 4  ;;  %v1976_v43 = vrot.slane %v1975_v48, 4 }
 0x4b7   : > { %v1715_v13 = vpop.permute.xlu1 %1714  ;;  %v1675_v17 = vpop.permute.xlu0 %1674  ;;  %v2174_v12 = vmul.f32 %v4927_v63, %v2094_v18 }
 0x4b8   : > { %v1825_v40 = vmul.f32 %v1787_v55, %v1715_v13  ;;  %v1820_v31 = vmul.f32 %v1767_v52, %v1675_v17  ;;  %v1855_v29 = vmul.f32 %v4459_v8, %v5033_v3  ;;  %v1601_v55 = vcombine.high %v1585_v62, %v1585_v62 }
 0x4b9   : > { %v1963_v54 = vadd.f32 %v1962_v46, %v1961_v34  ;;  %v1959_v17 = vrot.slane %v1958_v39, 1  ;;  %v1970_v34 = vadd.f32 %v1969_v14, %v1968_v57  ;;  %v1989_v46 = vsel %vm1210_vm3, %v1931_v41, 0.0 }
 0x4ba   : > { %v5044_v10 = vadd.f32 %v4970_v42, %v1820_v31  ;;  %v5047_v44 = vadd.f32 %v1853_v1, %v1825_v40  ;;  %v1944_v42 = vadd.f32 %v1943_v27, %v1942_v58  ;;  %v1783_v1 = vrot.slane %v1585_v62, %v4798_v4  ;;  %v4463_v40 = vpop.eup %4462 }
 0x4bb   : > { %v1899_v51 = vpop.permute.xlu1 %1898  ;;  %v1691_v52 = vpop.permute.xlu0 %1690  ;;  %v1791_v58 = vrot.slane %v1601_v55, %v4798_v4  ;;  %v1964_v27 = vrot.slane %v1963_v54, 2  ;;  %v1990_v14 = vrot.slane %v1989_v46, 4  ;;  %v2073_v41 = vrot.slane %v5012_v60, 4 }
 0x4bc   : > { %v1933_v8 = vmul.f32 %v1899_v51, %v1849_v38  ;;  %v1822_v13 = vmul.f32 %v1775_v35, %v1691_v52  ;;  %v1852_v32 = vmul.f32 %v4461_v45, %v5044_v10  ;;  %v1983_v38 = vrot.slane %v1982_v22, 4 }
 0x4bd   : > { %v1945_v52 = vrot.slane %v1944_v42, 1 }
 0x4be   : > { %v2003_v9 = vsel %vm1210_vm3, %v1933_v8, 0.0  ;;  %v1850_v11 = vadd.f32 %v4981_v23, %v1822_v13  ;;  %v1960_v23 = vadd.f32 %v1959_v17, %v1958_v39  ;;  %v1977_v8 = vadd.f32 %v1976_v43, %v1975_v48 }
 0x4bf   : > { %v2004_v31 = vrot.slane %v2003_v9, 4  ;;  %v1731_v35 = vpop.permute.xlu1 %1730  ;;  %v1707_v45 = vpop.permute.xlu0 %1706  ;;  %v1984_v50 = vadd.f32 %v1983_v38, %v1982_v22  ;;  %v1971_v39 = vrot.slane %v1970_v34, 2  ;;  %v1965_v48 = vadd.f32 %v1964_v27, %v1963_v54 }
 0x4c0   : > { %v1827_v36 = vmul.f32 %v1795_v56, %v1731_v35  ;;  %v1824_v47 = vmul.f32 %v1783_v1, %v1707_v45  ;;  %v1854_v62 = vmul.f32 %v4463_v40, %v1850_v11  ;;  %v2067_v56 = vrot.slane %v5008_v53, 5 }
 0x4c1   : > { %v2005_v51 = vadd.f32 %v2004_v31, %v2003_v9  ;;  %v2068_v1 = vrot.slane %v5008_v53, 6  ;;  %v2095_v63 = vadd.f32 %v2064_v59, %v1960_v23  ;;  %v1978_v22 = vrot.slane %v1977_v8, 2 }
 0x4c2   : > { %v1856_v13 = vadd.f32 %v1852_v32, %v1824_v47  ;;  %v5060_v20 = vadd.f32 %v1855_v29, %v1827_v36  ;;  %v1946_v29 = vadd.f32 %v1945_v52, %v1944_v42  ;;  %v2074_v43 = vrot.slane %v5012_v60, 5 }
 0x4c3   : > { %v2006_v37 = vrot.slane %v2005_v51, 2  ;;  %v5063_v49 = vpop.permute.xlu1 %2131  ;;  %v1723_v57 = vpop.permute.xlu0 %1722  ;;  %v1985_v9 = vrot.slane %v1984_v50, 2  ;;  %v2190_v38 = vpack.c.bf16 %v2174_v12, %v2174_v12  ;;  %v2069_v31 = vrot.slane %v5008_v53, 7 }
 0x4c4   : > { %v1826_v55 = vmul.f32 %v1791_v58, %v1723_v57  ;;  %v1991_v45 = vadd.f32 %v1990_v14, %v1989_v46  ;;  %v1972_v58 = vadd.f32 %v1971_v39, %v1970_v34  ;;  %v1966_v59 = vrot.slane %v1965_v48, 1 }
 0x4c5   : > { %v2007_v32 = vadd.f32 %v2006_v37, %v2005_v51  ;;  %v5077_v36 = vadd.f32 %v5008_v53, %v1946_v29  ;;  %v1979_v27 = vadd.f32 %v1978_v22, %v1977_v8  ;;  %v1986_v46 = vadd.f32 %v1985_v9, %v1984_v50 }
 0x4c6   : > { %v5070_v17 = vadd.f32 %v1854_v62, %v1826_v55  ;;  %v5081_v62 = vmul.f32 %v4941_v30, %v2095_v63  ;;  %v5085_v34 = vunpack.c.l.b16 %v2190_v38  ;;  %v1992_v57 = vrot.slane %v1991_v45, 2 }
 0x4c7   : > { %v1907_v40 = vpop.permute.xlu1 %1906  ;;  %v1903_v18 = vpop.permute.xlu0 %1902  ;;  %v2008_v54 = vrot.slane %v2007_v32, 1  ;;  %v1967_v29 = vadd.f32 %v1966_v59, %v1965_v48  ;;  %v1973_v8 = vrot.slane %v1972_v58, 1  ;;  %v1987_v59 = vrot.slane %v1986_v46, 1 }
 0x4c8   : > { %v1935_v37 = vmul.f32 %v1907_v40, %v5033_v3  ;;  %v1934_v42 = vmul.f32 %v1903_v18, %v1850_v11  ;;  %v1980_v40 = vrot.slane %v1979_v27, 1 }
 0x4c9   : > { %v2009_v14 = vadd.f32 %v2008_v54, %v2007_v32  ;;  %v1993_v54 = vadd.f32 %v1992_v57, %v1991_v45 }
 0x4ca   : > { %v2017_v51 = vsel %vm1210_vm3, %v1935_v37, 0.0  ;;  %v2010_v52 = vsel %vm1210_vm3, %v1934_v42, 0.0 }
 0x4cb   : > { %v2018_v23 = vrot.slane %v2017_v51, 4  ;;  %v2011_v12 = vrot.slane %v2010_v52, 4  ;;  %v1911_v3 = vpop.permute.xlu1 %1910  ;;  %v1895_v11 = vpop.permute.xlu0 %1894 }
 0x4cc   : > { %v1936_v55 = vmul.f32 %v1911_v3, %v1856_v13  ;;  %v1932_v39 = vmul.f32 %v1895_v11, %v5044_v10  ;;  %v2102_v10 = vadd.f32 %v2070_v25, %v2009_v14  ;;  %v2096_v3 = vadd.f32 %v2065_v2, %v1967_v29 }
 0x4cd   : > { %v2019_v30 = vadd.f32 %v2018_v23, %v2017_v51  ;;  %v2012_v63 = vadd.f32 %v2011_v12, %v2010_v52  ;;  %v1988_v2 = vadd.f32 %v1987_v59, %v1986_v46 }
 0x4ce   : > { %v2024_v50 = vsel %vm1210_vm3, %v1936_v55, 0.0  ;;  %v1996_v9 = vsel %vm1210_vm3, %v1932_v39, 0.0  ;;  %v1974_v55 = vadd.f32 %v1973_v8, %v1972_v58  ;;  %v1981_v39 = vadd.f32 %v1980_v40, %v1979_v27 }
 0x4cf   : > { %v2020_v18 = vrot.slane %v2019_v30, 2  ;;  %v2013_v38 = vrot.slane %v2012_v63, 2  ;;  %v2025_v37 = vrot.slane %v2024_v50, 4  ;;  %v1997_v42 = vrot.slane %v1996_v9, 4  ;;  %v1915_v32 = vpop.permute.xlu1 %1914  ;;  %v2126_v13 = vpop.permute.xlu0 %2125 }
 0x4d0   : > { %v1937_v48 = vmul.f32 %v1915_v32, %v5047_v44  ;;  %v2182_v44 = vmul.f32 %v4929_v0, %v2102_v10  ;;  %v2097_v27 = vadd.f32 %v2066_v33, %v1974_v55  ;;  %v5606_v40 = vrot.slane %v5012_v60, 2 }
 0x4d1   : > { %v2021_v51 = vadd.f32 %v2020_v18, %v2019_v30  ;;  %v2014_v52 = vadd.f32 %v2013_v38, %v2012_v63  ;;  %v2026_v23 = vadd.f32 %v2025_v37, %v2024_v50  ;;  %v1998_v12 = vadd.f32 %v1997_v42, %v1996_v9 }
 0x4d2   : > { %v2031_v11 = vsel %vm1210_vm3, %v1937_v48, 0.0  ;;  %v1994_v63 = vrot.slane %v1993_v54, 1  ;;  %v2198_v32 = vpack.c.bf16 %v2182_v44, %v2182_v44  ;;  %v5109_v10 = vmul.f32 %v5063_v49, %v2096_v3 }
 0x4d3   : > { %v2015_v47 = vrot.slane %v2014_v52, 1  ;;  %v2027_v35 = vrot.slane %v2026_v23, 2  ;;  %v1999_v45 = vrot.slane %v1998_v12, 2  ;;  %v2032_v57 = vrot.slane %v2031_v11, 4  ;;  %v1919_v22 = vpop.permute.xlu1 %1918  ;;  %v2142_v25 = vpop.permute.xlu0 %2141 }
 0x4d4   : > { %v1938_v14 = vmul.f32 %v1919_v22, %v5070_v17  ;;  %v2022_v30 = vrot.slane %v2021_v51, 1  ;;  %v1995_v46 = vadd.f32 %v1994_v63, %v1993_v54  ;;  %v2173_v49 = vmul.f32 %v2126_v13, %v5077_v36 }
 0x4d5   : > { %v2016_v50 = vadd.f32 %v2015_v47, %v2014_v52  ;;  %v2000_v9 = vadd.f32 %v1999_v45, %v1998_v12  ;;  %v2033_v18 = vadd.f32 %v2032_v57, %v2031_v11  ;;  %v2028_v29 = vadd.f32 %v2027_v35, %v2026_v23 }
 0x4d6   : > { %v2038_v58 = vsel %vm1210_vm3, %v1938_v14, 0.0  ;;  %v2023_v8 = vadd.f32 %v2022_v30, %v2021_v51  ;;  %v2098_v47 = vadd.f32 %v2067_v56, %v1981_v39  ;;  %v5607_v23 = vrot.slane %v5012_v60, 3 }
 0x4d7   : > { %v2103_v38 = vadd.f32 %v5606_v40, %v2016_v50  ;;  %v2034_v37 = vrot.slane %v2033_v18, 2  ;;  %v2039_v0 = vrot.slane %v2038_v58, 4  ;;  %v1923_v42 = vpop.permute.xlu1 %1922  ;;  %v2134_v17 = vpop.permute.xlu0 %2133  ;;  %v2001_v22 = vrot.slane %v2000_v9, 1 }
 0x4d8   : > { %v1939_v35 = vmul.f32 %v1923_v42, %v5060_v20  ;;  %v2104_v12 = vadd.f32 %v5607_v23, %v2023_v8  ;;  %v2029_v11 = vrot.slane %v2028_v29, 1  ;;  %v2245_v3 = vunpack.c.l.b16 %v2198_v32 }
 0x4d9   : > { %v2183_v33 = vmul.f32 %v4943_v28, %v2103_v38  ;;  %v2035_v48 = vadd.f32 %v2034_v37, %v2033_v18  ;;  %v2040_v59 = vadd.f32 %v2039_v0, %v2038_v58  ;;  %v2002_v51 = vadd.f32 %v2001_v22, %v2000_v9 }
 0x4da   : > { %v2045_v52 = vsel %vm1210_vm3, %v1939_v35, 0.0  ;;  %v2030_v14 = vadd.f32 %v2029_v11, %v2028_v29  ;;  %v2099_v30 = vadd.f32 %v2068_v1, %v1988_v2  ;;  %v2100_v63 = vadd.f32 %v2069_v31, %v1995_v46 }
 0x4db   : > { %v2199_v56 = vpack.c.bf16 %v2183_v33, %v2183_v33  ;;  %v2041_v55 = vrot.slane %v2040_v59, 2  ;;  %v2046_v39 = vrot.slane %v2045_v52, 4  ;;  %v2148_v20 = vpop.permute.xlu1 %2147  ;;  %v2136_v54 = vpop.permute.xlu0 %2135  ;;  %v2036_v45 = vrot.slane %v2035_v48, 1 }
 0x4dc   : > { %v2101_v28 = vadd.f32 %v5012_v60, %v2002_v51  ;;  %v2184_v57 = vmul.f32 %v2148_v20, %v2104_v12  ;;  %v2192_v50 = vpack.c.bf16 %v5109_v10, %v5109_v10  ;;  %v2105_v40 = vadd.f32 %v2073_v41, %v2030_v14 }
 0x4dd   : > { %v2047_v44 = vadd.f32 %v2046_v39, %v2045_v52  ;;  %v2042_v9 = vadd.f32 %v2041_v55, %v2040_v59  ;;  %v2246_v36 = vunpack.c.l.b16 %v2199_v56  ;;  %v2037_v29 = vadd.f32 %v2036_v45, %v2035_v48 }
 0x4de   : > { %v2181_v18 = vmul.f32 %v2142_v25, %v2101_v28  ;;  %v2200_v58 = vpack.c.bf16 %v2184_v57, %v2184_v57  ;;  %v2189_v37 = vpack.c.bf16 %v2173_v49, %v2173_v49  ;;  %v2273_v1 = vrot.slane %v2245_v3, 7 }
 0x4df   : > { %v2048_v13 = vrot.slane %v2047_v44, 2  ;;  %v2150_v8 = vpop.permute.xlu1 %2149  ;;  %v2138_v38 = vpop.permute.xlu0 %2137  ;;  %v2177_v31 = vmul.f32 %v2134_v17, %v2097_v27  ;;  %v2178_v42 = vmul.f32 %v2136_v54, %v2098_v47  ;;  %v2106_v25 = vadd.f32 %v2074_v43, %v2037_v29 }
 0x4e0   : > { %v2197_v0 = vpack.c.bf16 %v2181_v18, %v2181_v18  ;;  %v2247_v2 = vunpack.c.l.b16 %v2200_v58  ;;  %v2185_v22 = vmul.f32 %v2150_v8, %v2105_v40  ;;  %v2043_v46 = vrot.slane %v2042_v9, 1 }
 0x4e1   : > { %v2049_v53 = vadd.f32 %v2048_v13, %v2047_v44  ;;  %v2275_v10 = vrot.slane %v2246_v36, 6  ;;  %v2179_v59 = vmul.f32 %v2138_v38, %v2099_v30  ;;  %v2236_v52 = vunpack.c.l.b16 %v2189_v37 }
 0x4e2   : > { %v2244_v32 = vunpack.c.l.b16 %v2197_v0  ;;  %v2277_v35 = vrot.slane %v2247_v2, 5  ;;  %v2201_v33 = vpack.c.bf16 %v2185_v22, %v2185_v22  ;;  %v2193_v17 = vpack.c.bf16 %v2177_v31, %v2177_v31 }
 0x4e3   : > { %v2152_v41 = vpop.permute.xlu1 %2151  ;;  %v2140_v51 = vpop.permute.xlu0 %2139  ;;  %v2050_v48 = vrot.slane %v2049_v53, 1  ;;  %v2044_v56 = vadd.f32 %v2043_v46, %v2042_v9  ;;  %v2194_v43 = vpack.c.bf16 %v2178_v42, %v2178_v42  ;;  %v5608_v54 = vpack.c.bf16 %v5081_v62, %v5081_v62 }
 0x4e4   : > { %v2274_v23 = vsel %vm2253_vm4, %v2273_v1, %v2244_v32  ;;  %v2186_v12 = vmul.f32 %v2152_v41, %v2106_v25  ;;  %v2180_v11 = vmul.f32 %v2140_v51, %v2100_v63  ;;  %v2248_v47 = vunpack.c.l.b16 %v2201_v33 }
 0x4e5   : > { %v2276_v27 = vsel %vm2256_vm5, %v2275_v10, %v2274_v23  ;;  %v2051_v20 = vadd.f32 %v2050_v48, %v2049_v53  ;;  %v2238_v45 = vunpack.c.l.b16 %v5608_v54  ;;  %v2195_v28 = vpack.c.bf16 %v2179_v59, %v2179_v59 }
 0x4e6   : > { %v2278_v55 = vsel %vm2259_vm6, %v2277_v35, %v2276_v27  ;;  %v2202_v39 = vpack.c.bf16 %v2186_v12, %v2186_v12  ;;  %v2279_v49 = vrot.slane %v2248_v47, 4  ;;  %v5609_v57 = vrot.slane %v5012_v60, 6  ;;  %v4146_v47 = vld [vmem:[%s4639_s12] ss:$0 sm:$0xff] }
 0x4e7   : > { %v2154_v3 = vpop.permute.xlu1 %2153  ;;  %v2252_v14 = vrot.slane %v5085_v34, 7  ;;  %v2196_v63 = vpack.c.bf16 %v2180_v11, %v2180_v11  ;;  %v2239_v9 = vunpack.c.l.b16 %v2192_v50  ;;  %v2240_v18 = vunpack.c.l.b16 %v2193_v17  ;;  %v2358_v17 = vld [vmem:[%s4579_s13] sm:$0xff] }
 0x4e8   : > { %v2107_v44 = vadd.f32 %v5609_v57, %v2044_v56  ;;  %v2249_v30 = vunpack.c.l.b16 %v2202_v39  ;;  %v2280_v58 = vsel %vm2262_vm7, %v2279_v49, %v2278_v55  ;;  %v2241_v62 = vunpack.c.l.b16 %v2194_v43  ;;  %4277 = vmatprep.mubr.msk.f32.mxu0 %vm964_vm0, %v2358_v17 }
 0x4e9   : > { %v2254_v13 = vsel %vm2253_vm4, %v2252_v14, %v2236_v52  ;;  %v5610_v40 = vrot.slane %v5012_v60, 7  ;;  %v2255_v29 = vrot.slane %v2238_v45, 6  ;;  %v2242_v37 = vunpack.c.l.b16 %v2195_v28 }
 0x4ea   : > { %v2187_v36 = vmul.f32 %v2154_v3, %v2107_v44  ;;  %v2281_v8 = vrot.slane %v2249_v30, 3  ;;  %v2243_v2 = vunpack.c.l.b16 %v2196_v63  ;;  %v2261_v31 = vrot.slane %v2240_v18, 4  ;;  %v2359_v3 = vld [vmem:[%s4579_s13 + $0x8] sm:$0xff] }
 0x4eb   : > { %v2108_v38 = vadd.f32 %v5610_v40, %v2051_v20  ;;  %v2156_v34 = vpop.permute.xlu1 %2155  ;;  %v2257_v53 = vsel %vm2256_vm5, %v2255_v29, %v2254_v13  ;;  %v2258_v22 = vrot.slane %v2239_v9, 5  ;;  %v2264_v32 = vrot.slane %v2241_v62, 3  ;;  %v4401_v40 = vld [vmem:[%s4654_s4] sm:$0xff]  }
 0x4ec   : > { %v2203_v0 = vpack.c.bf16 %v2187_v36, %v2187_v36  ;;  %v2282_v1 = vsel %vm2265_vm8, %v2281_v8, %v2280_v58  ;;  %v2267_v25 = vrot.slane %v2242_v37, 2  ;;  %v2270_v10 = vrot.slane %v2243_v2, 1 }
 0x4ed   : > { %v2188_v50 = vmul.f32 %v2156_v34, %v2108_v38  ;;  %v2260_v60 = vsel %vm2259_vm6, %v2258_v22, %v2257_v53  ;;  %v5611_v27 = vmov 0.0   ;;  %v4402_v38 = vld [vmem:[%s4654_s4 + $0x8] sm:$0xff]  }
 0x4ee   : > { %v2250_v42 = vunpack.c.l.b16 %v2203_v0  ;;  %v2263_v59 = vsel %vm2262_vm7, %v2261_v31, %v2260_v60  ;;  %v4154_v31 = vld [vmem:[%s5612_s1] ss:$0 sm:$0xff]  ;;  %s5622_s1 = sld [smem:[#allocation13_spill]] }
 0x4ef   : > { %v2204_v35 = vpack.c.bf16 %v2188_v50, %v2188_v50  ;;  %v2266_v51 = vsel %vm2265_vm8, %v2264_v32, %v2263_v59  ;;  %v4404_v59 = vld [vmem:[%s5614_s7 + $0x8] sm:$0xff]  }
 0x4f0   : > { %v2283_v46 = vrot.slane %v2250_v42, 2  ;;  %v2269_v52 = vsel %vm2268_vm9, %v2267_v25, %v2266_v51  ;;  %v4406_v51 = vld [vmem:[%s5614_s7 + $0x18] sm:$0xff]  }
 0x4f1   : > { %v2251_v33 = vunpack.c.l.b16 %v2204_v35  ;;  %v2272_v23 = vsel %vm2271_vm10, %v2270_v10, %v2269_v52  ;;  %v4155_v35 = vld [vmem:[%s5613_s2] ss:$0 sm:$0xff]  ;;  %s5623_s2 = sld [smem:[#allocation14_spill]] }
 0x4f2   : > { %v2284_v41 = vsel %vm2268_vm9, %v2283_v46, %v2282_v1 }
 0x4f3   : > { %v2285_v48 = vrot.slane %v2251_v33, 1  ;;  %v4403_v33 = vld [vmem:[%s5614_s7] sm:$0xff]  }
 0x4f5   : > { %v2286_v12 = vsel %vm2271_vm10, %v2285_v48, %v2284_v41  ;;  %v4405_v41 = vld [vmem:[%s5614_s7 + $0x10] sm:$0xff]   ;;  %v4156_v48 = vld [vmem:[%s5615_s10] ss:$0 sm:$0xff]  ;;  %s5624_s10 = sld [smem:[#allocation2_spill]] }
 0x4f6   : > { %v2287_v11 = vpack.c.b16 %v2286_v12, %v2272_v23 }
 0x4f8   : > { %4270 = vmatmul.mubr.msk.bf16.vlgmr.msra.gmra.mrb[4].mxu1 %vm1210_vm3, %v2287_v11 }
 0x4f9   : > { %4284 = vmatprep.mubr.msk.bf16.mxu1 %vm4558_vm2, %v5611_v27  ;;  %4281 = vmatpush3.bf16.msra.mxu1 %v4401_v40 }
 0x4fa   : > { %4282 = vmatprep.subr.bf16.mxu1 %v5611_v27 }
 0x4fd   : > { %4283 = vmatpush3.bf16.msra.mxu1 %v4402_v38 }
 0x4fe   : > { %4300 = vmatprep.subr.bf16.mxu1 %v5611_v27 }
 0x5cb   : > { %v2349_v56 = vpop.f32.mrb[4].mxu1 }
 0x5cc   : > { %v2350_v55 = vadd.f32 %v4146_v47, %v2349_v56  ;;  %v4271_v43 = vpop.f32.mrb[5].mxu1 }
 0x5cd   : > { %v2352_v39 = vpop.f32.mrb[6].mxu1 }
 0x5ce   : > { %v2356_v20 = vadd.f32 %v2350_v55, %v4746_v6  ;;  %v2353_v54 = vadd.f32 %v4146_v47, %v2352_v39  ;;  %v4272_v45 = vpop.f32.mrb[7].mxu1 }
 0x5d0   : > { %v2357_v49 = vadd.f32 %v4744_v5, %v2353_v54 }
 0x5d2   : > { %v4344_v28 = vpack.c.bf16 %v2357_v49, %v2356_v20 }
 0x5d4   : > { %4345 = vmatprep.subr.bf16.mxu0 %v4344_v28 }
 0x5d5   : > { %4347 = vmatpush3.bf16.msra.mxu0 %v4344_v28 }
 0x5d6   : > { %4288 = vmatprep.subr.bf16.mxu0 %v5611_v27 }
 0x5d8   : > { %4278 = vmatmul.mubr.msk.f32.vlgmr.msra.gmra.mrb[2].mxu0 %vm964_vm0, %v2359_v3 }
 0x5d9   : > { %4296 = vmatprep.mubr.msk.bf16.mxu0 %vm4558_vm2, %v5611_v27  ;;  %4289 = vmatpush3.bf16.msra.mxu0 %v4403_v33 }
 0x5da   : > { %4290 = vmatprep.subr.bf16.mxu0 %v5611_v27 }
 0x5dd   : > { %4291 = vmatpush3.bf16.msra.mxu0 %v4404_v59 }
 0x5de   : > { %4292 = vmatprep.subr.bf16.mxu0 %v5611_v27 }
 0x5e1   : > { %4293 = vmatpush3.bf16.msra.mxu0 %v4405_v41 }
 0x5e2   : > { %4294 = vmatprep.subr.bf16.mxu0 %v5611_v27 }
 0x5e5   : > { %4295 = vmatpush3.bf16.msra.mxu0 %v4406_v51 }
 0x5e6   : > { %4312 = vmatprep.subr.bf16.mxu0 %v5611_v27 }
 0x6ab   : > { %v5162_v57 = vpop.f32.mrb[2].mxu0 }
 0x6ac   : > { %v5164_v44 = vpop.f32.mrb[3].mxu0  ;;  %v2446_v6 = vsel %vm1048_vm1, %v5162_v57, 0.0 }
 0x6ad   : > { %2447 = vadd.xlane.f32.xlu1 %v2446_v6  ;;  %v2443_v5 = vsel %vm1048_vm1, %v5164_v44, 0.0 }
 0x6ae   : > { %2444 = vadd.xlane.f32.xlu0 %v2443_v5 }
 0x73a   : > { %v2448_v14 = vpop.xlane.xlu1 %2447 }
 0x73b   : > { %v2450_v30 = vmul.f32 0.03125, %v2448_v14  ;;  %v2445_v63 = vpop.xlane.xlu0 %2444 }
 0x73c   : > { %v2449_v9 = vmul.f32 0.03125, %v2445_v63 }
 0x73d   : > { %v2452_v18 = vsub.f32 %v5162_v57, %v2450_v30  ;;  %v4160_v30 = vld [vmem:[%s5616_s11] ss:$0 sm:$0xff]  ;;  %s5625_s11 = sld [smem:[#allocation3_spill]] }
 0x73e   : > { %v2451_v58 = vsub.f32 %v5164_v44, %v2449_v9 }
 0x73f   : > { %v2454_v62 = vmul.f32 %v2452_v18, %v2452_v18 }
 0x740   : > { %v2453_v36 = vmul.f32 %v2451_v58, %v2451_v58 }
 0x741   : > { %v2458_v8 = vsel %vm1048_vm1, %v2454_v62, 0.0 }
 0x742   : > { %v2455_v13 = vsel %vm1048_vm1, %v2453_v36, 0.0 }
 0x743   : > { %2456 = vadd.xlane.f32.xlu0 %v2455_v13 }
 0x747   : > { %2459 = vadd.xlane.f32.xlu0 %v2458_v8 }
 0x7d0   : > { %v2457_v29 = vpop.xlane.xlu0 %2456 }
 0x7d1   : > { %v2461_v37 = vmul.f32 0.03125, %v2457_v29 }
 0x7d3   : > { %v2463_v0 = vadd.f32 1e-05, %v2461_v37 }
 0x7d4   : > { %v2460_v34 = vpop.xlane.xlu0 %2459 }
 0x7d5   : > { %4464 = vrsqrt.f32 %v2463_v0  ;;  %v2462_v1 = vmul.f32 0.03125, %v2460_v34 }
 0x7d7   : > { %v2464_v2 = vadd.f32 1e-05, %v2462_v1 }
 0x7d9   : > { %4466 = vrsqrt.f32 %v2464_v2 }
 0x7df   : > { %v4465_v50 = vpop.eup %4464 }
 0x7e0   : > { %v2467_v53 = vmul.f32 %v4465_v50, %v2451_v58 }
 0x7e2   : > { %v2475_v22 = vmul.f32 %v4154_v31, %v2467_v53 }
 0x7e3   : > { %v4467_v42 = vpop.eup %4466 }
 0x7e4   : > { %v2468_v32 = vmul.f32 %v4467_v42, %v2452_v18  ;;  %v2483_v46 = vadd.f32 %v4155_v35, %v2475_v22 }
 0x7e6   : > { %v2476_v25 = vmul.f32 %v4154_v31, %v2468_v32 }
 0x7e8   : > { %v2484_v60 = vadd.f32 %v4155_v35, %v2476_v25 }
 0x7ea   : > { %v2485_v10 = vpack.c.bf16 %v2484_v60, %v2483_v46 }
 0x7ec   : > { %4285 = vmatmul.mubr.msk.bf16.vlgmr.msra.gmra.mrb[8].mxu1 %vm1048_vm1, %v2485_v10 }
 0x7ed   : > { %4308 = vmatprep.mubr.msk.bf16.mxu1 %vm4558_vm2, %v5611_v27 }
 0x8bf   : > { %v2546_v52 = vpop.f32.mrb[8].mxu1 }
 0x8c0   : > { %v2547_v23 = vadd.f32 %v4156_v48, %v2546_v52  ;;  %v4286_v12 = vpop.f32.mrb[9].mxu1 }
 0x8c1   : > { %v2549_v11 = vpop.f32.mrb[10].mxu1 }
 0x8c2   : > { %v2553_v17 = vmul.f32 0.5, %v2547_v23  ;;  %v2550_v47 = vadd.f32 %v4156_v48, %v2549_v11  ;;  %v4287_v56 = vpop.f32.mrb[11].mxu1 }
 0x8c4   : > { %4468 = vtanh.f32 %v2553_v17  ;;  %v2554_v55 = vmul.f32 0.5, %v2550_v47 }
 0x8c6   : > { %4470 = vtanh.f32 %v2554_v55  ;;  %v4407_v55 = vld [vmem:[%s5617_s15] sm:$0xff]  }
 0x8c7   : > { %4301 = vmatpush3.bf16.msra.mxu1 %v4407_v55 }
 0x8c8   : > { %4302 = vmatprep.subr.bf16.mxu1 %v5611_v27 }
 0x8ce   : > { %v4469_v43 = vpop.eup %4468 }
 0x8cf   : > { %v2557_v39 = vadd.f32 1.0, %v4469_v43 }
 0x8d0   : > { %v4471_v20 = vpop.eup %4470 }
 0x8d1   : > { %v2559_v54 = vmul.f32 0.5, %v2557_v39  ;;  %v2558_v45 = vadd.f32 1.0, %v4471_v20 }
 0x8d3   : > { %v5192_v49 = vmul.f32 %v2559_v54, %v2547_v23  ;;  %v2560_v28 = vmul.f32 0.5, %v2558_v45  ;;  %v4408_v45 = vld [vmem:[%s5617_s15 + $0x8] sm:$0xff]  }
 0x8d4   : > { %4303 = vmatpush3.bf16.msra.mxu1 %v4408_v45 }
 0x8d5   : > { %v5194_v3 = vmul.f32 %v2560_v28, %v2550_v47  ;;  %v3503_v6 = vrot.slane %v5192_v49, 1  ;;  %v3504_v31 = vrot.slane %v5192_v49, 2  ;;  %v3506_v10 = vrot.slane %v5192_v49, 4  ;;  %4304 = vmatprep.subr.bf16.mxu1 %v5611_v27 }
 0x8d6   : > { %v3507_v41 = vrot.slane %v5192_v49, 5  ;;  %v3508_v23 = vrot.slane %v5192_v49, 6  ;;  %v3509_v17 = vrot.slane %v5192_v49, 7 }
 0x8d7   : > { %3519 = vrot.lane.b32.xlu0 %v3503_v6, %s4559_s28  ;;  %v3510_v5 = vrot.slane %v5194_v3, 1  ;;  %v2563_v14 = vpack.c.bf16 %v5194_v3, %v5192_v49  ;;  %v3511_v1 = vrot.slane %v5194_v3, 2  ;;  %v3512_v59 = vrot.slane %v5194_v3, 3 }
 0x8d8   : > { %v3513_v52 = vrot.slane %v5194_v3, 4  ;;  %v3514_v11 = vrot.slane %v5194_v3, 5  ;;  %v3515_v43 = vrot.slane %v5194_v3, 6  ;;  %v3516_v28 = vrot.slane %v5194_v3, 7 }
 0x8d9   : > { %3535 = vrot.lane.b32.xlu1 %v3510_v5, %s4559_s28  ;;  %4297 = vmatmul.mubr.msk.bf16.vlgmr.msra.gmra.mrb[8].mxu0 %vm1210_vm3, %v2563_v14  ;;  %v4409_v5 = vld [vmem:[%s5617_s15 + $0x10] sm:$0xff]   ;;  %v5280_v14 = vld [vmem:[%s5618_s16] sm:$0xff]  ;;  %s958_s16 = scalar_lea.vmem %s4724_s17, %s4188_s0 }
 0x8da   : > { %4314 = vmatprep.mubr.msk.bf16.mxu0 %vm4558_vm2, %v5611_v27  ;;  %4305 = vmatpush3.bf16.msra.mxu1 %v4409_v5 }
 0x8db   : > { %4306 = vmatprep.subr.bf16.mxu1 %v5611_v27 }
 0x9ac   : > { %v2640_v63 = vpop.f32.mrb[8].mxu0 }
 0x9ad   : > { %v5206_v9 = vadd.f32 %v4160_v30, %v2640_v63  ;;  %v4298_v18 = vpop.f32.mrb[9].mxu0 }
 0x9ae   : > { %v2643_v58 = vpop.f32.mrb[10].mxu0 }
 0x9af   : > { %v4299_v36 = vpop.f32.mrb[11].mxu0  ;;  %v3007_v13 = vrot.slane %v5206_v9, %v4801_v7  ;;  %v2999_v62 = vrot.slane %v5206_v9, %v4798_v4  ;;  %v3015_v8 = vrot.slane %v5206_v9, %v4810_v15  ;;  %v3031_v40 = vrot.slane %v5206_v9, %v4813_v16 }
 0x9b0   : > { %v3023_v38 = vrot.slane %v5206_v9, %v4820_v19  ;;  %v3047_v29 = vrot.slane %v5206_v9, %v4823_v21  ;;  %v3039_v37 = vrot.slane %v5206_v9, %v4830_v24  ;;  %v3055_v0 = vrot.slane %v5206_v9, %v4835_v26 }
 0x9b1   : > { %3010 = vbcast.lane.b32.xlu1 %v3007_v13, 320  ;;  %3002 = vbcast.lane.b32.xlu0 %v2999_v62, 320  ;;  %v5224_v34 = vadd.f32 %v4160_v30, %v2643_v58  ;;  %v2649_v50 = vand.u32 2147483647, %v5206_v9  ;;  %v2647_v48 = vmax.f32 %v5206_v9, 0.0  ;;  %v4410_v9 = vld [vmem:[%s5617_s15 + $0x18] sm:$0xff]  }
 0x9b2   : > { %4307 = vmatpush3.bf16.msra.mxu1 %v4410_v9 }
 0x9b3   : > { %v3063_v2 = vrot.slane %v5224_v34, %v4798_v4  ;;  %v3071_v53 = vrot.slane %v5224_v34, %v4801_v7  ;;  %v2651_v42 = vsub.f32 0.0, %v2649_v50  ;;  %v3087_v22 = vrot.slane %v5224_v34, %v4820_v19  ;;  %4318 = vmatprep.subr.bf16.mxu1 %v5611_v27 }
 0x9b4   : > { %v3079_v32 = vrot.slane %v5224_v34, %v4810_v15  ;;  %v3103_v25 = vrot.slane %v5224_v34, %v4830_v24  ;;  %v3095_v7 = vrot.slane %v5224_v34, %v4813_v16  ;;  %v3119_v46 = vrot.slane %v5224_v34, %v4835_v26 }
 0x9b5   : > { %3018 = vbcast.lane.b32.xlu1 %v3015_v8, 320  ;;  %3034 = vbcast.lane.b32.xlu0 %v3031_v40, 320  ;;  %v2653_v35 = vmul.f32 1.442695, %v2651_v42  ;;  %v3111_v19 = vrot.slane %v5224_v34, %v4823_v21  ;;  %v3505_v15 = vrot.slane %v5192_v49, 3 }
 0x9b6   : > { %v2650_v60 = vand.u32 2147483647, %v5224_v34 }
 0x9b7   : > { %4472 = vpow2.f32 %v2653_v35 }
 0x9b8   : > { %v2652_v21 = vsub.f32 0.0, %v2650_v60  ;;  %v5309_v60 = vpop.permute.xlu0 %3519 }
 0x9b9   : > { %3026 = vbcast.lane.b32.xlu1 %v3023_v38, 320  ;;  %3050 = vbcast.lane.b32.xlu0 %v3047_v29, 320 }
 0x9ba   : > { %v2655_v26 = vmul.f32 1.442695, %v2652_v21 }
 0x9bd   : > { %3042 = vbcast.lane.b32.xlu1 %v3039_v37, 320  ;;  %3254 = vbcast.lane.b32.xlu0 %v2999_v62, 328 }
 0x9c1   : > { %3058 = vbcast.lane.b32.xlu1 %v3055_v0, 320  ;;  %3270 = vbcast.lane.b32.xlu0 %v3031_v40, 328  ;;  %v4473_v24 = vpop.eup %4472 }
 0x9c2   : > { %v2657_v16 = vadd.f32 1.0, %v4473_v24 }
 0x9c4   : > { %4474 = vlog2.f32 %v2657_v16 }
 0x9c5   : > { %3258 = vbcast.lane.b32.xlu1 %v3007_v13, 328  ;;  %3274 = vbcast.lane.b32.xlu0 %v3039_v37, 328  ;;  %4476 = vpow2.f32 %v2655_v26 }
 0x9c9   : > { %3262 = vbcast.lane.b32.xlu1 %v3015_v8, 328  ;;  %3278 = vbcast.lane.b32.xlu0 %v3047_v29, 328 }
 0x9cd   : > { %3266 = vbcast.lane.b32.xlu1 %v3023_v38, 328  ;;  %3282 = vbcast.lane.b32.xlu0 %v3055_v0, 328 }
 0x9ce   : > { %v4475_v33 = vpop.eup %4474 }
 0x9cf   : > { %v2660_v51 = vmul.f32 0.6931472, %v4475_v33  ;;  %v4477_v56 = vpop.eup %4476 }
 0x9d0   : > { %v2658_v20 = vadd.f32 1.0, %v4477_v56 }
 0x9d1   : > { %3537 = vrot.lane.b32.xlu1 %v3511_v1, %s4559_s28  ;;  %3066 = vbcast.lane.b32.xlu0 %v3063_v2, 320  ;;  %v2663_v12 = vadd.f32 %v2660_v51, %v2647_v48 }
 0x9d2   : > { %4478 = vlog2.f32 %v2658_v20 }
 0x9d3   : > { %v2675_v47 = vrot.slane %v2663_v12, %v4877_v61  ;;  %v2668_v18 = vcombine.high %v2663_v12, %v2663_v12  ;;  %v2894_v37 = vmul.f32 %v2663_v12, %v5192_v49 }
 0x9d5   : > { %3074 = vbcast.lane.b32.xlu1 %v3071_v53, 320  ;;  %3521 = vrot.lane.b32.xlu0 %v3504_v31, %s4559_s28  ;;  %v2691_v39 = vrot.slane %v2675_v47, %v4877_v61  ;;  %v2683_v54 = vcombine.high %v2675_v47, %v2675_v47  ;;  %v2682_v62 = vrot.slane %v2668_v18, %v4877_v61 }
 0x9d6   : > { %v2905_v42 = vrot.slane %v2894_v37, %v4877_v61 }
 0x9d7   : > { %v2769_v6 = vrot.slane %v2691_v39, %v4798_v4  ;;  %v2705_v30 = vrot.slane %v2683_v54, %v4877_v61  ;;  %v2713_v36 = vcombine.high %v2691_v39, %v2691_v39  ;;  %v2698_v0 = vrot.slane %v2682_v62, %v4877_v61 }
 0x9d8   : > { %v2684_v31 = vcombine.high %v2682_v62, %v2682_v62  ;;  %v2921_v24 = vrot.slane %v2905_v42, %v4877_v61 }
 0x9d9   : > { %3090 = vbcast.lane.b32.xlu1 %v3087_v22, 320  ;;  %3082 = vbcast.lane.b32.xlu0 %v3079_v32, 320  ;;  %v2846_v63 = vmul.f32 %v2769_v6, %v5280_v14  ;;  %v2773_v58 = vrot.slane %v2705_v30, %v4798_v4  ;;  %v2777_v38 = vrot.slane %v2713_v36, %v4798_v4 }
 0x9da   : > { %v2715_v29 = vcombine.high %v2705_v30, %v2705_v30  ;;  %v2785_v35 = vrot.slane %v2698_v0, %v4798_v4  ;;  %v2714_v51 = vcombine.high %v2698_v0, %v2698_v0  ;;  %v3127_v48 = vrot.slane %v2921_v24, %v4798_v4 }
 0x9db   : > { %v2862_v13 = vmul.f32 1.442695, %v2846_v63  ;;  %v2847_v40 = vmul.f32 %v2773_v58, %v5280_v14  ;;  %v2848_v50 = vmul.f32 %v2777_v38, %v5280_v14  ;;  %v2943_v63 = vcombine.high %v2921_v24, %v2921_v24 }
 0x9dc   : > { %v4479_v8 = vpop.eup %4478  ;;  %v2850_v26 = vmul.f32 %v2785_v35, %v5280_v14 }
 0x9dd   : > { %3106 = vbcast.lane.b32.xlu1 %v3103_v25, 320  ;;  %3098 = vbcast.lane.b32.xlu0 %v3095_v7, 320  ;;  %4480 = vpow2.f32 %v2862_v13  ;;  %v2662_v1 = vmul.f32 0.6931472, %v4479_v8 }
 0x9de   : > { %v2870_v20 = vmul.f32 1.442695, %v2850_v26 }
 0x9e1   : > { %3122 = vbcast.lane.b32.xlu1 %v3119_v46, 320  ;;  %3114 = vbcast.lane.b32.xlu0 %v3111_v19, 320 }
 0x9e5   : > { %3523 = vrot.lane.b32.xlu1 %v3505_v15, %s4559_s28  ;;  %3290 = vbcast.lane.b32.xlu0 %v3071_v53, 328  ;;  %v2781_v53 = vrot.slane %v2715_v29, %v4798_v4  ;;  %v2913_v15 = vcombine.high %v2905_v42, %v2905_v42 }
 0x9e7   : > { %v4481_v33 = vpop.eup %4480 }
 0x9e8   : > { %v3220_v39 = vmul.f32 0.0, %v4481_v33 }
 0x9e9   : > { %3298 = vbcast.lane.b32.xlu1 %v3087_v22, 328  ;;  %3294 = vbcast.lane.b32.xlu0 %v3079_v32, 328  ;;  %v2648_v22 = vmax.f32 %v5224_v34, 0.0  ;;  %v4166_v32 = vld [vmem:[%s5619_s18] ss:$0 sm:$0xff]  ;;  %v5311_v34 = vpop.permute.xlu1 %3535 }
 0x9ea   : > { %v5307_v16 = vmul.f32 %v4166_v32, %v5192_v49  ;;  %v5314_v21 = vmul.f32 %v4166_v32, %v5194_v3 }
 0x9ec   : > { %v3457_v47 = vrot.slane %v5307_v16, 3  ;;  %v3462_v56 = vrot.slane %v5314_v21, 1  ;;  %v3463_v55 = vrot.slane %v5314_v21, 2  ;;  %v3458_v62 = vrot.slane %v5307_v16, 4 }
 0x9ed   : > { %3302 = vbcast.lane.b32.xlu1 %v3095_v7, 328  ;;  %3286 = vbcast.lane.b32.xlu0 %v3063_v2, 328  ;;  %v2864_v2 = vmul.f32 1.442695, %v2847_v40  ;;  %v2866_v7 = vmul.f32 1.442695, %v2848_v50 }
 0x9ee   : > { %v3464_v8 = vrot.slane %v5314_v21, 3  ;;  %v3459_v40 = vrot.slane %v5307_v16, 5 }
 0x9ef   : > { %4482 = vpow2.f32 %v2864_v2 }
 0x9f0   : > { %4484 = vpow2.f32 %v2866_v7 }
 0x9f1   : > { %3306 = vbcast.lane.b32.xlu1 %v3103_v25, 328  ;;  %3517 = vrot.lane.b32.xlu0 %v5192_v49, %s4559_s28  ;;  %v5301_v25 = vadd.f32 %v2662_v1, %v2648_v22  ;;  %v2935_v49 = vrot.slane %v2913_v15, %v4877_v61  ;;  %v3465_v15 = vrot.slane %v5314_v21, 4 }
 0x9f3   : > { %v3131_v5 = vrot.slane %v2935_v49, %v4798_v4  ;;  %v2945_v42 = vcombine.high %v2935_v49, %v2935_v49 }
 0x9f5   : > { %3310 = vbcast.lane.b32.xlu1 %v3111_v19, 328  ;;  %3533 = vrot.lane.b32.xlu0 %v5194_v3, %s4559_s28  ;;  %v2712_v19 = vrot.slane %v2684_v31, %v4877_v61 }
 0x9f7   : > { %v2716_v6 = vcombine.high %v2712_v19, %v2712_v19 }
 0x9f9   : > { %3314 = vbcast.lane.b32.xlu1 %v3119_v46, 328  ;;  %3525 = vrot.lane.b32.xlu0 %v3506_v10, %s4559_s28  ;;  %v2849_v46 = vmul.f32 %v2781_v53, %v5280_v14  ;;  %v2724_v10 = vrot.slane %v5301_v25, %v4877_v61  ;;  %v4483_v18 = vpop.eup %4482  ;;  %v2797_v2 = vrot.slane %v2716_v6, %v4798_v4 }
 0x9fa   : > { %v3135_v53 = vrot.slane %v2943_v63, %v4798_v4  ;;  %v4485_v32 = vpop.eup %4484 }
 0x9fb   : > { %v2732_v54 = vcombine.high %v2724_v10, %v2724_v10  ;;  %v2740_v13 = vrot.slane %v2724_v10, %v4877_v61 }
 0x9fd   : > { %3539 = vrot.lane.b32.xlu1 %v3512_v59, %s4559_s28  ;;  %3527 = vrot.lane.b32.xlu0 %v3507_v41, %s4559_s28  ;;  %v2868_v59 = vmul.f32 1.442695, %v2849_v46  ;;  %v2789_v41 = vrot.slane %v2712_v19, %v4798_v4  ;;  %v2754_v50 = vrot.slane %v2732_v54, %v4877_v61  ;;  %v2717_v19 = vcombine.high %v5301_v25, %v5301_v25 }
 0x9fe   : > { %v2801_v10 = vrot.slane %v2740_v13, %v4798_v4 }
 0x9ff   : > { %4486 = vpow2.f32 %v2868_v59  ;;  %v2851_v45 = vmul.f32 %v2789_v41, %v5280_v14  ;;  %v2853_v41 = vmul.f32 %v2797_v2, %v5280_v14  ;;  %v2731_v54 = vrot.slane %v2717_v19, %v4877_v61 }
 0xa00   : > { %4488 = vpow2.f32 %v2870_v20  ;;  %v2854_v63 = vmul.f32 %v2801_v10, %v5280_v14 }
 0xa01   : > { %3541 = vrot.lane.b32.xlu1 %v3513_v52, %s4559_s28  ;;  %3529 = vrot.lane.b32.xlu0 %v3508_v23, %s4559_s28  ;;  %v2898_v52 = vcombine.high %v2894_v37, %v2894_v37  ;;  %v3455_v23 = vrot.slane %v5307_v16, 1  ;;  %v5340_v37 = vmul.f32 %v5301_v25, %v5194_v3  ;;  %v2872_v0 = vmul.f32 1.442695, %v2851_v45 }
 0xa02   : > { %v2762_v3 = vcombine.high %v2740_v13, %v2740_v13  ;;  %v3460_v45 = vrot.slane %v5307_v16, 6  ;;  %v2878_v19 = vmul.f32 1.442695, %v2854_v63 }
 0xa03   : > { %v2912_v9 = vrot.slane %v2898_v52, %v4877_v61  ;;  %v2954_v33 = vrot.slane %v5340_v37, %v4877_v61  ;;  %4490 = vpow2.f32 %v2872_v0  ;;  %v2805_v52 = vrot.slane %v2754_v50, %v4798_v4 }
 0xa04   : > { %v2809_v20 = vrot.slane %v2762_v3, %v4798_v4 }
 0xa05   : > { %3543 = vrot.lane.b32.xlu1 %v3514_v11, %s4559_s28  ;;  %3531 = vrot.lane.b32.xlu0 %v3509_v17, %s4559_s28  ;;  %v3456_v17 = vrot.slane %v5307_v16, 2  ;;  %v2914_v22 = vcombine.high %v2912_v9, %v2912_v9  ;;  %v2928_v35 = vrot.slane %v2912_v9, %v4877_v61  ;;  %v2876_v9 = vmul.f32 1.442695, %v2853_v41 }
 0xa06   : > { %v5374_v0 = vrot.slane %v2954_v33, %v4877_v61 }
 0xa07   : > { %v2942_v25 = vrot.slane %v2914_v22, %v4877_v61  ;;  %v2747_v22 = vrot.slane %v2731_v54, %v4877_v61 }
 0xa09   : > { %3545 = vrot.lane.b32.xlu1 %v3515_v43, %s4559_s28 }
 0xa0d   : > { %3547 = vrot.lane.b32.xlu1 %v3516_v28, %s4559_s28  ;;  %v2793_v28 = vrot.slane %v2714_v51, %v4798_v4  ;;  %v2764_v51 = vcombine.high %v2754_v50, %v2754_v50  ;;  %s5621_s28 = sld [smem:[#allocation15_spill]] }
 0xa0f   : > { %v2852_v1 = vmul.f32 %v2793_v28, %v5280_v14  ;;  %v3143_v28 = vrot.slane %v2928_v35, %v4798_v4 }
 0xa11   : > { %v2874_v59 = vmul.f32 1.442695, %v2852_v1  ;;  %v2855_v1 = vmul.f32 %v2805_v52, %v5280_v14 }
 0xa13   : > { %4492 = vpow2.f32 %v2874_v59  ;;  %v2880_v41 = vmul.f32 1.442695, %v2855_v1 }
 0xa14   : > { %4494 = vpow2.f32 %v2876_v9  ;;  %v2763_v9 = vcombine.high %v2747_v22, %v2747_v22 }
 0xa15   : > { %4496 = vpow2.f32 %v2878_v19 }
 0xa16   : > { %4498 = vpow2.f32 %v2880_v41 }
 0xa23   : > { %v3011_v12 = vpop.permute.xlu1 %3010  ;;  %v3003_v11 = vpop.permute.xlu0 %3002 }
 0xa24   : > { %v3204_v43 = vmul.f32 %v3127_v48, %v3003_v11  ;;  %v3205_v38 = vmul.f32 %v3131_v5, %v3011_v12  ;;  %v3139_v48 = vrot.slane %v2945_v42, %v4798_v4  ;;  %v4487_v12 = vpop.eup %4486  ;;  %v2944_v11 = vcombine.high %v2928_v35, %v2928_v35 }
 0xa25   : > { %v4489_v13 = vpop.eup %4488  ;;  %v2856_v42 = vmul.f32 %v2809_v20, %v5280_v14 }
 0xa26   : > { %v5330_v30 = vadd.f32 %v3220_v39, %v3204_v43  ;;  %v3151_v2 = vrot.slane %v2944_v11, %v4798_v4  ;;  %v2817_v11 = vrot.slane %v2747_v22, %v4798_v4 }
 0xa27   : > { %v3019_v58 = vpop.permute.xlu1 %3018  ;;  %v3035_v36 = vpop.permute.xlu0 %3034  ;;  %v2882_v52 = vmul.f32 1.442695, %v2856_v42 }
 0xa28   : > { %v3222_v29 = vmul.f32 %v4483_v18, %v5330_v30  ;;  %v3206_v24 = vmul.f32 %v3135_v53, %v3019_v58  ;;  %v2962_v18 = vcombine.high %v2954_v33, %v2954_v33  ;;  %v2813_v58 = vrot.slane %v2764_v51, %v4798_v4  ;;  %v4491_v51 = vpop.eup %4490 }
 0xa29   : > { %v3208_v35 = vmul.f32 %v3143_v28, %v3035_v36  ;;  %v3159_v36 = vrot.slane %v5374_v0, %v4798_v4  ;;  %4500 = vpow2.f32 %v2882_v52  ;;  %v2858_v42 = vmul.f32 %v2817_v11, %v5280_v14 }
 0xa2a   : > { %v5346_v31 = vadd.f32 %v3222_v29, %v3205_v38  ;;  %v2946_v29 = vcombine.high %v2942_v25, %v2942_v25  ;;  %v2857_v10 = vmul.f32 %v2813_v58, %v5280_v14 }
 0xa2b   : > { %v3027_v7 = vpop.permute.xlu1 %3026  ;;  %v5349_v46 = vpop.permute.xlu0 %3050 }
 0xa2c   : > { %v3224_v26 = vmul.f32 %v4485_v32, %v5346_v31  ;;  %v3207_v6 = vmul.f32 %v3139_v48, %v3027_v7  ;;  %v2733_v32 = vcombine.high %v2731_v54, %v2731_v54  ;;  %v3147_v7 = vrot.slane %v2942_v25, %v4798_v4 }
 0xa2d   : > { %v3155_v33 = vrot.slane %v2946_v29, %v4798_v4  ;;  %v2884_v63 = vmul.f32 1.442695, %v2857_v10  ;;  %v4493_v29 = vpop.eup %4492 }
 0xa2e   : > { %v5359_v49 = vadd.f32 %v3224_v26, %v3206_v24  ;;  %v5383_v24 = vrot.slane %v2962_v18, %v4877_v61  ;;  %v2947_v26 = vcombine.high %v5340_v37, %v5340_v37  ;;  %v2761_v37 = vrot.slane %v2733_v32, %v4877_v61 }
 0xa2f   : > { %v3043_v43 = vpop.permute.xlu1 %3042  ;;  %v3255_v39 = vpop.permute.xlu0 %3254  ;;  %4502 = vpow2.f32 %v2884_v63 }
 0xa30   : > { %v3226_v5 = vmul.f32 %v4487_v12, %v5359_v49  ;;  %v2992_v12 = vcombine.high %v5374_v0, %v5374_v0  ;;  %v3209_v20 = vmul.f32 %v3147_v7, %v3043_v43  ;;  %v3316_v18 = vmul.f32 %v3255_v39, %v5330_v30 }
 0xa31   : > { %v2821_v32 = vrot.slane %v2761_v37, %v4798_v4  ;;  %v2825_v39 = vrot.slane %v2763_v9, %v4798_v4  ;;  %v2765_v19 = vcombine.high %v2761_v37, %v2761_v37 }
 0xa32   : > { %v5371_v38 = vadd.f32 %v3226_v5, %v3207_v6  ;;  %v3163_v6 = vrot.slane %v5383_v24, %v4798_v4  ;;  %v5399_v5 = vrot.slane %v2947_v26, %v4877_v61  ;;  %v3332_v26 = vsel %vm1210_vm3, %v3316_v18, 0.0 }
 0xa33   : > { %v3059_v50 = vpop.permute.xlu1 %3058  ;;  %v3271_v53 = vpop.permute.xlu0 %3270  ;;  %v3333_v37 = vrot.slane %v3332_v26, 4 }
 0xa34   : > { %v3228_v3 = vmul.f32 %v4489_v13, %v5371_v38  ;;  %v3211_v52 = vmul.f32 %v3155_v33, %v3059_v50 }
 0xa36   : > { %v3229_v59 = vadd.f32 %v3228_v3, %v3208_v35  ;;  %v3210_v35 = vmul.f32 %v3151_v2, %v5349_v46 }
 0xa37   : > { %v3259_v48 = vpop.permute.xlu1 %3258  ;;  %v3275_v25 = vpop.permute.xlu0 %3274 }
 0xa38   : > { %v3317_v54 = vmul.f32 %v3259_v48, %v5346_v31  ;;  %v3230_v28 = vmul.f32 %v4491_v51, %v3229_v59  ;;  %v3320_v7 = vmul.f32 %v3271_v53, %v3229_v59  ;;  %v4495_v48 = vpop.eup %4494  ;;  %v2886_v53 = vmul.f32 1.442695, %v2858_v42 }
 0xa39   : > { %v4497_v18 = vpop.eup %4496  ;;  %v2829_v42 = vrot.slane %v2765_v19, %v4798_v4 }
 0xa3a   : > { %v3339_v58 = vsel %vm1210_vm3, %v3317_v54, 0.0  ;;  %v3231_v13 = vadd.f32 %v3230_v28, %v3209_v20  ;;  %4504 = vpow2.f32 %v2886_v53  ;;  %v2994_v53 = vcombine.high %v5383_v24, %v5383_v24 }
 0xa3b   : > { %v3340_v43 = vrot.slane %v3339_v58, 4  ;;  %v3263_v1 = vpop.permute.xlu1 %3262  ;;  %v3279_v31 = vpop.permute.xlu0 %3278 }
 0xa3c   : > { %v3318_v22 = vmul.f32 %v3263_v1, %v5359_v49  ;;  %v3232_v3 = vmul.f32 %v4493_v29, %v3231_v13  ;;  %v3321_v10 = vmul.f32 %v3275_v25, %v3231_v13  ;;  %v3360_v49 = vsel %vm1210_vm3, %v3320_v7, 0.0 }
 0xa3d   : > { %v3341_v30 = vadd.f32 %v3340_v43, %v3339_v58  ;;  %v2859_v25 = vmul.f32 %v2821_v32, %v5280_v14  ;;  %v3361_v29 = vrot.slane %v3360_v49, 4 }
 0xa3e   : > { %v3346_v41 = vsel %vm1210_vm3, %v3318_v22, 0.0  ;;  %v3233_v51 = vadd.f32 %v3232_v3, %v3210_v35  ;;  %v3367_v58 = vsel %vm1210_vm3, %v3321_v10, 0.0  ;;  %v4499_v35 = vpop.eup %4498 }
 0xa3f   : > { %v3342_v11 = vrot.slane %v3341_v30, 2  ;;  %v3347_v20 = vrot.slane %v3346_v41, 4  ;;  %v3267_v46 = vpop.permute.xlu1 %3266  ;;  %v3283_v2 = vpop.permute.xlu0 %3282 }
 0xa40   : > { %v3322_v59 = vmul.f32 %v3279_v31, %v3233_v51  ;;  %v3319_v54 = vmul.f32 %v3267_v46, %v5371_v38  ;;  %v3234_v28 = vmul.f32 %v4495_v48, %v3233_v51  ;;  %v2860_v46 = vmul.f32 %v2825_v39, %v5280_v14 }
 0xa41   : > { %v3343_v63 = vadd.f32 %v3342_v11, %v3341_v30  ;;  %v3348_v9 = vadd.f32 %v3347_v20, %v3346_v41  ;;  %v4501_v30 = vpop.eup %4500  ;;  %v3368_v41 = vrot.slane %v3367_v58, 4 }
 0xa42   : > { %v3374_v50 = vsel %vm1210_vm3, %v3322_v59, 0.0  ;;  %v3353_v33 = vsel %vm1210_vm3, %v3319_v54, 0.0  ;;  %v3235_v13 = vadd.f32 %v3234_v28, %v3211_v52  ;;  %v3334_v52 = vadd.f32 %v3333_v37, %v3332_v26  ;;  %v4503_v19 = vpop.eup %4502 }
 0xa43   : > { %v3344_v43 = vrot.slane %v3343_v63, 1  ;;  %v3349_v1 = vrot.slane %v3348_v9, 2  ;;  %v5416_v31 = vpop.permute.xlu1 %3537  ;;  %v3067_v38 = vpop.permute.xlu0 %3066  ;;  %v3354_v7 = vrot.slane %v3353_v33, 4  ;;  %v3375_v48 = vrot.slane %v3374_v50, 4 }
 0xa44   : > { %v3323_v22 = vmul.f32 %v3283_v2, %v3235_v13  ;;  %v3212_v32 = vmul.f32 %v3159_v36, %v3067_v38  ;;  %v3236_v3 = vmul.f32 %v4497_v18, %v3235_v13  ;;  %v3362_v59 = vadd.f32 %v3361_v29, %v3360_v49 }
 0xa45   : > { %v3345_v10 = vadd.f32 %v3344_v43, %v3343_v63  ;;  %v3350_v51 = vadd.f32 %v3349_v1, %v3348_v9  ;;  %v3355_v11 = vadd.f32 %v3354_v7, %v3353_v33  ;;  %v2888_v36 = vmul.f32 1.442695, %v2859_v25 }
 0xa46   : > { %v5422_v20 = vadd.f32 %v3236_v3, %v3212_v32  ;;  %v3381_v63 = vsel %vm1210_vm3, %v3323_v22, 0.0  ;;  %v3369_v49 = vadd.f32 %v3368_v41, %v3367_v58  ;;  %v3376_v9 = vadd.f32 %v3375_v48, %v3374_v50 }
 0xa47   : > { %v3486_v2 = vadd.f32 %v3455_v23, %v3345_v10  ;;  %v3075_v54 = vpop.permute.xlu1 %3074  ;;  %v3522_v28 = vpop.permute.xlu0 %3521  ;;  %v3356_v18 = vrot.slane %v3355_v11, 2  ;;  %v3351_v33 = vrot.slane %v3350_v51, 1  ;;  %v3335_v23 = vrot.slane %v3334_v52, 2 }
 0xa48   : > { %v3213_v26 = vmul.f32 %v3163_v6, %v3075_v54  ;;  %v3238_v37 = vmul.f32 %v4499_v35, %v5422_v20  ;;  %v3167_v25 = vrot.slane %v2992_v12, %v4798_v4  ;;  %v3363_v6 = vrot.slane %v3362_v59, 2  ;;  %v4505_v54 = vpop.eup %4504 }
 0xa49   : > { %v5433_v39 = vmul.f32 %v5309_v60, %v3486_v2  ;;  %v3382_v29 = vrot.slane %v3381_v63, 4  ;;  %v2963_v60 = vcombine.high %v5399_v5, %v5399_v5  ;;  %v2861_v58 = vmul.f32 %v2829_v42, %v5280_v14 }
 0xa4a   : > { %v5435_v13 = vadd.f32 %v3238_v37, %v3213_v26  ;;  %v3357_v50 = vadd.f32 %v3356_v18, %v3355_v11  ;;  %v2890_v7 = vmul.f32 1.442695, %v2860_v46  ;;  %v3370_v24 = vrot.slane %v3369_v49, 2 }
 0xa4b   : > { %v3091_v43 = vpop.permute.xlu1 %3090  ;;  %v3083_v1 = vpop.permute.xlu0 %3082  ;;  %v3377_v22 = vrot.slane %v3376_v9, 2  ;;  %v3352_v32 = vadd.f32 %v3351_v33, %v3350_v51  ;;  %4506 = vpow2.f32 %v2888_v36  ;;  %v3336_v0 = vadd.f32 %v3335_v23, %v3334_v52 }
 0xa4c   : > { %v3214_v38 = vmul.f32 %v3167_v25, %v3083_v1  ;;  %v3240_v35 = vmul.f32 %v4501_v30, %v5435_v13  ;;  %v3171_v12 = vrot.slane %v2994_v53, %v4798_v4  ;;  %v2977_v10 = vrot.slane %v5399_v5, %v4877_v61 }
 0xa4d   : > { %v3364_v41 = vadd.f32 %v3363_v6, %v3362_v59  ;;  %v3383_v48 = vadd.f32 %v3382_v29, %v3381_v63  ;;  %v2991_v42 = vrot.slane %v2963_v60, %v4877_v61  ;;  %v3466_v30 = vrot.slane %v5314_v21, 5 }
 0xa4e   : > { %v5448_v3 = vadd.f32 %v3240_v35, %v3214_v38  ;;  %v3215_v46 = vmul.f32 %v3171_v12, %v3091_v43  ;;  %v3358_v2 = vrot.slane %v3357_v50, 1  ;;  %v2892_v52 = vmul.f32 1.442695, %v2861_v58 }
 0xa4f   : > { %v3107_v14 = vpop.permute.xlu1 %3106  ;;  %v3099_v11 = vpop.permute.xlu0 %3098  ;;  %v3371_v36 = vadd.f32 %v3370_v24, %v3369_v49  ;;  %v3378_v18 = vadd.f32 %v3377_v22, %v3376_v9  ;;  %v3487_v26 = vadd.f32 %v3456_v17, %v3352_v32  ;;  %4508 = vpow2.f32 %v2890_v7 }
 0xa50   : > { %v3242_v51 = vmul.f32 %v4503_v19, %v5448_v3  ;;  %v3175_v5 = vrot.slane %v2977_v10, %v4798_v4  ;;  %v3337_v63 = vrot.slane %v3336_v0, 1  ;;  %v3461_v61 = vrot.slane %v5307_v16, 7 }
 0xa51   : > { %v3384_v37 = vrot.slane %v3383_v48, 2  ;;  %v2993_v53 = vcombine.high %v2977_v10, %v2977_v10  ;;  %v3582_v19 = vpack.c.bf16 %v5433_v39, %v5433_v39  ;;  %v3365_v25 = vrot.slane %v3364_v41, 1 }
 0xa52   : > { %v3243_v59 = vadd.f32 %v3242_v51, %v3215_v46  ;;  %v3216_v49 = vmul.f32 %v3175_v5, %v3099_v11  ;;  %v2995_v9 = vcombine.high %v2991_v42, %v2991_v42  ;;  %v3359_v6 = vadd.f32 %v3358_v2, %v3357_v50 }
 0xa53   : > { %v3123_v33 = vpop.permute.xlu1 %3122  ;;  %v3115_v23 = vpop.permute.xlu0 %3114  ;;  %v3567_v17 = vmul.f32 %v3522_v28, %v3487_v26  ;;  %4510 = vpow2.f32 %v2892_v52  ;;  %v3372_v43 = vrot.slane %v3371_v36, 1  ;;  %v3379_v1 = vrot.slane %v3378_v18, 1 }
 0xa54   : > { %v3244_v29 = vmul.f32 %v4505_v54, %v3243_v59  ;;  %v3179_v60 = vrot.slane %v2991_v42, %v4798_v4  ;;  %v3338_v38 = vadd.f32 %v3337_v63, %v3336_v0  ;;  %v3467_v35 = vrot.slane %v5314_v21, 6 }
 0xa55   : > { %v4507_v7 = vpop.eup %4506  ;;  %v3385_v24 = vadd.f32 %v3384_v37, %v3383_v48  ;;  %v3183_v22 = vrot.slane %v2993_v53, %v4798_v4  ;;  %v5464_v12 = vunpack.c.l.b16 %v3582_v19  ;;  %v3366_v50 = vadd.f32 %v3365_v25, %v3364_v41 }
 0xa56   : > { %v3245_v58 = vadd.f32 %v3244_v29, %v3216_v49  ;;  %v3217_v10 = vmul.f32 %v3179_v60, %v3107_v14  ;;  %v3488_v28 = vadd.f32 %v3457_v47, %v3359_v6  ;;  %v3583_v46 = vpack.c.bf16 %v3567_v17, %v3567_v17 }
 0xa57   : > { %v3524_v39 = vpop.permute.xlu1 %3523  ;;  %v3291_v32 = vpop.permute.xlu0 %3290  ;;  %v3187_v0 = vrot.slane %v2995_v9, %v4798_v4  ;;  %v3373_v2 = vadd.f32 %v3372_v43, %v3371_v36  ;;  %v3380_v51 = vadd.f32 %v3379_v1, %v3378_v18  ;;  %v3485_v26 = vadd.f32 %v5307_v16, %v3338_v38 }
 0xa58   : > { %v3325_v11 = vmul.f32 %v3291_v32, %v5435_v13  ;;  %v3246_v42 = vmul.f32 %v4507_v7, %v3245_v58  ;;  %v3568_v48 = vmul.f32 %v3524_v39, %v3488_v28  ;;  %v3644_v47 = vrot.slane %v5464_v12, 7 }
 0xa59   : > { %v4509_v5 = vpop.eup %4508  ;;  %v5475_v13 = vadd.f32 %v3458_v62, %v3366_v50  ;;  %v3386_v37 = vrot.slane %v3385_v24, 1  ;;  %v3218_v4 = vmul.f32 %v3183_v22, %v3115_v23  ;;  %v5478_v19 = vunpack.c.l.b16 %v3583_v46 }
 0xa5a   : > { %v3395_v52 = vsel %vm1210_vm3, %v3325_v11, 0.0  ;;  %v3247_v54 = vadd.f32 %v3246_v42, %v3217_v10  ;;  %v5482_v49 = vadd.f32 %v3459_v40, %v3373_v2  ;;  %v5486_v9 = vadd.f32 %v3460_v45, %v3380_v51 }
 0xa5b   : > { %v3396_v41 = vrot.slane %v3395_v52, 4  ;;  %v3299_v14 = vpop.permute.xlu1 %3298  ;;  %v3295_v63 = vpop.permute.xlu0 %3294  ;;  %v3584_v6 = vpack.c.bf16 %v3568_v48, %v3568_v48  ;;  %v3387_v38 = vadd.f32 %v3386_v37, %v3385_v24  ;;  %v3219_v7 = vmul.f32 %v3187_v0, %v3123_v33 }
 0xa5c   : > { %v3327_v36 = vmul.f32 %v3299_v14, %v3243_v59  ;;  %v3326_v18 = vmul.f32 %v3295_v63, %v5448_v3  ;;  %v3248_v53 = vmul.f32 %v4509_v5, %v3247_v54  ;;  %v3646_v45 = vrot.slane %v5478_v19, 6 }
 0xa5d   : > { %v3397_v25 = vadd.f32 %v3396_v41, %v3395_v52  ;;  %v4511_v29 = vpop.eup %4510  ;;  %v3631_v28 = vunpack.c.l.b16 %v3584_v6  ;;  %v5496_v5 = vadd.f32 %v3461_v61, %v3387_v38 }
 0xa5e   : > { %v3409_v62 = vsel %vm1210_vm3, %v3327_v36, 0.0  ;;  %v3402_v23 = vsel %vm1210_vm3, %v3326_v18, 0.0  ;;  %v3249_v59 = vadd.f32 %v3248_v53, %v3218_v4 }
 0xa5f   : > { %v3398_v3 = vrot.slane %v3397_v25, 2  ;;  %v3410_v17 = vrot.slane %v3409_v62, 4  ;;  %v3403_v43 = vrot.slane %v3402_v23, 4  ;;  %v3303_v1 = vpop.permute.xlu1 %3302  ;;  %v3287_v60 = vpop.permute.xlu0 %3286  ;;  %v3648_v4 = vrot.slane %v3631_v28, 5 }
 0xa60   : > { %v3328_v40 = vmul.f32 %v3303_v1, %v3245_v58  ;;  %v3324_v22 = vmul.f32 %v3287_v60, %v5422_v20  ;;  %v3250_v39 = vmul.f32 %v4511_v29, %v3249_v59 }
 0xa61   : > { %v3399_v32 = vadd.f32 %v3398_v3, %v3397_v25  ;;  %v3411_v50 = vadd.f32 %v3410_v17, %v3409_v62  ;;  %v3404_v10 = vadd.f32 %v3403_v43, %v3402_v23 }
 0xa62   : > { %v3416_v11 = vsel %vm1210_vm3, %v3328_v40, 0.0  ;;  %v3388_v42 = vsel %vm1210_vm3, %v3324_v22, 0.0  ;;  %v3251_v46 = vadd.f32 %v3250_v39, %v3219_v7 }
 0xa63   : > { %v3400_v2 = vrot.slane %v3399_v32, 1  ;;  %v3412_v51 = vrot.slane %v3411_v50, 2  ;;  %v3405_v48 = vrot.slane %v3404_v10, 2  ;;  %v3417_v24 = vrot.slane %v3416_v11, 4  ;;  %v3307_v33 = vpop.permute.xlu1 %3306  ;;  %v3518_v58 = vpop.permute.xlu0 %3517 }
 0xa64   : > { %v3389_v0 = vrot.slane %v3388_v42, 4  ;;  %v3329_v20 = vmul.f32 %v3307_v33, %v3247_v54  ;;  %v3565_v52 = vmul.f32 %v3518_v58, %v3485_v26 }
 0xa65   : > { %v3401_v41 = vadd.f32 %v3400_v2, %v3399_v32  ;;  %v3413_v14 = vadd.f32 %v3412_v51, %v3411_v50  ;;  %v3406_v63 = vadd.f32 %v3405_v48, %v3404_v10  ;;  %v3418_v37 = vadd.f32 %v3417_v24, %v3416_v11 }
 0xa66   : > { %v3390_v36 = vadd.f32 %v3389_v0, %v3388_v42  ;;  %v3423_v18 = vsel %vm1210_vm3, %v3329_v20, 0.0  ;;  %v3581_v53 = vpack.c.bf16 %v3565_v52, %v3565_v52 }
 0xa67   : > { %v3494_v19 = vadd.f32 %v3462_v56, %v3401_v41  ;;  %v3407_v25 = vrot.slane %v3406_v63, 1  ;;  %v3419_v6 = vrot.slane %v3418_v37, 2  ;;  %v3424_v54 = vrot.slane %v3423_v18, 4  ;;  %v3311_v26 = vpop.permute.xlu1 %3310  ;;  %v3534_v62 = vpop.permute.xlu0 %3533 }
 0xa68   : > { %v3391_v16 = vrot.slane %v3390_v36, 2  ;;  %v3628_v61 = vunpack.c.l.b16 %v3581_v53  ;;  %v3330_v23 = vmul.f32 %v3311_v26, %v3249_v59  ;;  %v3414_v29 = vrot.slane %v3413_v14, 1 }
 0xa69   : > { %v3574_v3 = vmul.f32 %v5311_v34, %v3494_v19  ;;  %v3408_v17 = vadd.f32 %v3407_v25, %v3406_v63  ;;  %v3420_v43 = vadd.f32 %v3419_v6, %v3418_v37  ;;  %v3425_v1 = vadd.f32 %v3424_v54, %v3423_v18 }
 0xa6a   : > { %v3392_v60 = vadd.f32 %v3391_v16, %v3390_v36  ;;  %v3645_v38 = vsel %vm2253_vm4, %v3644_v47, %v3628_v61  ;;  %v3430_v56 = vsel %vm1210_vm3, %v3330_v23, 0.0  ;;  %v3415_v7 = vadd.f32 %v3414_v29, %v3413_v14 }
 0xa6b   : > { %v3495_v40 = vadd.f32 %v3463_v55, %v3408_v17  ;;  %v3426_v22 = vrot.slane %v3425_v1, 2  ;;  %v3647_v59 = vsel %vm2256_vm5, %v3646_v45, %v3645_v38  ;;  %v3431_v39 = vrot.slane %v3430_v56, 4  ;;  %v3315_v32 = vpop.permute.xlu1 %3314  ;;  %v3526_v34 = vpop.permute.xlu0 %3525 }
 0xa6c   : > { %v3393_v50 = vrot.slane %v3392_v60, 1  ;;  %v3590_v10 = vpack.c.bf16 %v3574_v3, %v3574_v3  ;;  %v3331_v28 = vmul.f32 %v3315_v32, %v3251_v46  ;;  %v3649_v11 = vsel %vm2259_vm6, %v3648_v4, %v3647_v59 }
 0xa6d   : > { %v3575_v12 = vmul.f32 %v5416_v31, %v3495_v40  ;;  %v3427_v47 = vadd.f32 %v3426_v22, %v3425_v1  ;;  %v3432_v42 = vadd.f32 %v3431_v39, %v3430_v56  ;;  %v3569_v2 = vmul.f32 %v3526_v34, %v5475_v13 }
 0xa6e   : > { %v3394_v51 = vadd.f32 %v3393_v50, %v3392_v60  ;;  %v3637_v48 = vunpack.c.l.b16 %v3590_v10  ;;  %v3437_v55 = vsel %vm1210_vm3, %v3331_v28, 0.0  ;;  %v3496_v45 = vadd.f32 %v3464_v8, %v3415_v7 }
 0xa6f   : > { %v3591_v24 = vpack.c.bf16 %v3575_v12, %v3575_v12  ;;  %v3433_v33 = vrot.slane %v3432_v42, 2  ;;  %v3438_v58 = vrot.slane %v3437_v55, 4  ;;  %v3585_v0 = vpack.c.bf16 %v3569_v2, %v3569_v2  ;;  %v3540_v46 = vpop.permute.xlu1 %3539  ;;  %v3528_v20 = vpop.permute.xlu0 %3527 }
 0xa70   : > { %v3493_v52 = vadd.f32 %v5314_v21, %v3394_v51  ;;  %v3658_v31 = vrot.slane %v3637_v48, 7  ;;  %v3576_v41 = vmul.f32 %v3540_v46, %v3496_v45  ;;  %v3570_v14 = vmul.f32 %v3528_v20, %v5482_v49 }
 0xa71   : > { %v3638_v13 = vunpack.c.l.b16 %v3591_v24  ;;  %v3434_v63 = vadd.f32 %v3433_v33, %v3432_v42  ;;  %v3439_v37 = vadd.f32 %v3438_v58, %v3437_v55  ;;  %v3632_v4 = vunpack.c.l.b16 %v3585_v0 }
 0xa72   : > { %v3573_v36 = vmul.f32 %v3534_v62, %v3493_v52  ;;  %v3592_v18 = vpack.c.bf16 %v3576_v41, %v3576_v41  ;;  %v3586_v53 = vpack.c.bf16 %v3570_v14, %v3570_v14  ;;  %v3421_v8 = vrot.slane %v3420_v43, 1 }
 0xa73   : > { %v3660_v19 = vrot.slane %v3638_v13, 6  ;;  %v3440_v25 = vrot.slane %v3439_v37, 2  ;;  %v3650_v6 = vrot.slane %v3632_v4, 4  ;;  %v3542_v54 = vpop.permute.xlu1 %3541  ;;  %v3530_v26 = vpop.permute.xlu0 %3529  ;;  %v3428_v16 = vrot.slane %v3427_v47, 1 }
 0xa74   : > { %v3589_v61 = vpack.c.bf16 %v3573_v36, %v3573_v36  ;;  %v3639_v23 = vunpack.c.l.b16 %v3592_v18  ;;  %v3633_v29 = vunpack.c.l.b16 %v3586_v53  ;;  %v3422_v3 = vadd.f32 %v3421_v8, %v3420_v43 }
 0xa75   : > { %v3441_v17 = vadd.f32 %v3440_v25, %v3439_v37  ;;  %v3651_v49 = vsel %vm2262_vm7, %v3650_v6, %v3649_v11  ;;  %v3571_v1 = vmul.f32 %v3530_v26, %v5486_v9  ;;  %v3429_v60 = vadd.f32 %v3428_v16, %v3427_v47 }
 0xa76   : > { %v3636_v62 = vunpack.c.l.b16 %v3589_v61  ;;  %v3662_v38 = vrot.slane %v3639_v23, 5  ;;  %v3652_v56 = vrot.slane %v3633_v29, 3  ;;  %v3497_v7 = vadd.f32 %v3465_v15, %v3422_v3 }
 0xa77   : > { %v3587_v40 = vpack.c.bf16 %v3571_v1, %v3571_v1  ;;  %v3544_v22 = vpop.permute.xlu1 %3543  ;;  %v3498_v59 = vadd.f32 %v3466_v30, %v3429_v60  ;;  %v3532_v39 = vpop.permute.xlu0 %3531  ;;  %v3435_v32 = vrot.slane %v3434_v63, 1  ;;  %v3442_v43 = vrot.slane %v3441_v17, 1 }
 0xa78   : > { %v3659_v34 = vsel %vm2253_vm4, %v3658_v31, %v3636_v62  ;;  %v3653_v50 = vsel %vm2265_vm8, %v3652_v56, %v3651_v49  ;;  %v3577_v9 = vmul.f32 %v3542_v54, %v3497_v7  ;;  %v3572_v10 = vmul.f32 %v3532_v39, %v5496_v5  ;;  %v4167_v54 = vld [vmem:[%s5620_s26] ss:$0 sm:$0xff] }
 0xa79   : > { %v3661_v28 = vsel %vm2256_vm5, %v3660_v19, %v3659_v34  ;;  %v3634_v11 = vunpack.c.l.b16 %v3587_v40  ;;  %v3578_v12 = vmul.f32 %v3544_v22, %v3498_v59  ;;  %v3436_v15 = vadd.f32 %v3435_v32, %v3434_v63  ;;  %v4411_v32 = vld [vmem:[%s5621_s28] sm:$0xff]  }
 0xa7a   : > { %v3663_v47 = vsel %vm2259_vm6, %v3662_v38, %v3661_v28  ;;  %v3593_v42 = vpack.c.bf16 %v3577_v9, %v3577_v9  ;;  %v3588_v2 = vpack.c.bf16 %v3572_v10, %v3572_v10  ;;  %v3443_v30 = vadd.f32 %v3442_v43, %v3441_v17 }
 0xa7b   : > { %v3654_v51 = vrot.slane %v3634_v11, 2  ;;  %v3594_v48 = vpack.c.bf16 %v3578_v12, %v3578_v12  ;;  %v3546_v55 = vpop.permute.xlu1 %3545  ;;  %v3499_v45 = vadd.f32 %v3467_v35, %v3436_v15  ;;  %v3468_v5 = vrot.slane %v5314_v21, 7  ;;  %v4173_v15 = vld [vmem:[%s5622_s1] ss:$0 sm:$0xff] }
 0xa7c   : > { %v3640_v24 = vunpack.c.l.b16 %v3593_v42  ;;  %v3635_v33 = vunpack.c.l.b16 %v3588_v2 }
 0xa7d   : > { %v3655_v58 = vsel %vm2268_vm9, %v3654_v51, %v3653_v50  ;;  %v3641_v0 = vunpack.c.l.b16 %v3594_v48  ;;  %v3579_v46 = vmul.f32 %v3546_v55, %v3499_v45  ;;  %v3500_v31 = vadd.f32 %v3468_v5, %v3443_v30  ;;  %v4174_v30 = vld [vmem:[%s5623_s2] ss:$0 sm:$0xff] }
 0xa7e   : > { %v3664_v20 = vrot.slane %v3640_v24, 4  ;;  %v3656_v52 = vrot.slane %v3635_v33, 1  ;;  %v3787_v24 = vld [vmem:[%s5624_s10] sm:$0x3]  ;;  %v4412_v33 = vld [vmem:[%s5621_s28 + $0x8] sm:$0xff]  }
 0xa7f   : > { %v3666_v41 = vrot.slane %v3641_v0, 3  ;;  %v3595_v14 = vpack.c.bf16 %v3579_v46, %v3579_v46  ;;  %v3548_v13 = vpop.permute.xlu1 %3547 }
 0xa80   : > { %v3665_v63 = vsel %vm2262_vm7, %v3664_v20, %v3663_v47  ;;  %v3657_v37 = vsel %vm2271_vm10, %v3656_v52, %v3655_v58  ;;  %v3580_v35 = vmul.f32 %v3548_v13, %v3500_v31  ;;  %v4413_v52 = vld [vmem:[%s4714_s20] sm:$0xff]   ;;  %v4414_v31 = vld [vmem:[%s4714_s20 + $0x8] sm:$0xff]  }
 0xa81   : > { %v3667_v4 = vsel %vm2265_vm8, %v3666_v41, %v3665_v63  ;;  %v3642_v36 = vunpack.c.l.b16 %v3595_v14  ;;  %v4176_v41 = vld [vmem:[%s4709_s27] ss:$0 sm:$0xff] }
 0xa82   : > { %v3596_v21 = vpack.c.bf16 %v3580_v35, %v3580_v35 }
 0xa83   : > { %v3668_v18 = vrot.slane %v3642_v36, 2 }
 0xa84   : > { %v3643_v53 = vunpack.c.l.b16 %v3596_v21 }
 0xa85   : > { %v3669_v8 = vsel %vm2268_vm9, %v3668_v18, %v3667_v4 }
 0xa86   : > { %v3670_v19 = vrot.slane %v3643_v53, 1 }
 0xa88   : > { %v3671_v25 = vsel %vm2271_vm10, %v3670_v19, %v3669_v8 }
 0xa89   : > { %v3672_v6 = vpack.c.b16 %v3671_v25, %v3657_v37 }
 0xa8b   : > { %4309 = vmatmul.mubr.msk.bf16.vlgmr.msra.gmra.mrb[12].mxu1 %vm1210_vm3, %v3672_v6 }
 0xa8c   : > { %4322 = vmatprep.mubr.msk.bf16.mxu1 %vm4558_vm2, %v5611_v27  ;;  %4319 = vmatpush3.bf16.msra.mxu1 %v4411_v32 }
 0xa8d   : > { %4320 = vmatprep.subr.bf16.mxu1 %v5611_v27 }
 0xa90   : > { %4321 = vmatpush3.bf16.msra.mxu1 %v4412_v33 }
 0xa91   : > { %4334 = vmatprep.subr.bf16.mxu1 %v5611_v27 }
 0xb5e   : > { %v3734_v26 = vpop.f32.mrb[12].mxu1 }
 0xb5f   : > { %v3735_v16 = vadd.f32 %v4167_v54, %v3734_v26  ;;  %v4310_v61 = vpop.f32.mrb[13].mxu1 }
 0xb60   : > { %v3737_v23 = vpop.f32.mrb[14].mxu1 }
 0xb61   : > { %v5542_v29 = vadd.f32 %v3735_v16, %v5164_v44  ;;  %v3738_v3 = vadd.f32 %v4167_v54, %v3737_v23  ;;  %v4311_v17 = vpop.f32.mrb[15].mxu1  ;;  %v4180_v54 = vld [vmem:[%s4719_s21] ss:$0 sm:$0xff] }
 0xb63   : > { %v5545_v49 = vadd.f32 %v5162_v57, %v3738_v3  ;;  %v3745_v1 = vsel %vm1048_vm1, %v5542_v29, 0.0 }
 0xb64   : > { %3746 = vadd.xlane.f32.xlu0 %v3745_v1 }
 0xb65   : > { %v3748_v60 = vsel %vm1048_vm1, %v5545_v49, 0.0 }
 0xb66   : > { %3749 = vadd.xlane.f32.xlu1 %v3748_v60  ;;  %v4415_v60 = vld [vmem:[%s5625_s11] sm:$0xff]  }
 0xbf1   : > { %v3747_v62 = vpop.xlane.xlu0 %3746 }
 0xbf2   : > { %v3751_v38 = vmul.f32 0.03125, %v3747_v62 }
 0xbf3   : > { %v3750_v56 = vpop.xlane.xlu1 %3749 }
 0xbf4   : > { %v3753_v44 = vsub.f32 %v5542_v29, %v3751_v38  ;;  %v3752_v7 = vmul.f32 0.03125, %v3750_v56 }
 0xbf6   : > { %v3754_v40 = vsub.f32 %v5545_v49, %v3752_v7  ;;  %v3755_v22 = vmul.f32 %v3753_v44, %v3753_v44 }
 0xbf8   : > { %v3757_v57 = vsel %vm1048_vm1, %v3755_v22, 0.0  ;;  %v3756_v59 = vmul.f32 %v3754_v40, %v3754_v40 }
 0xbf9   : > { %3758 = vadd.xlane.f32.xlu0 %v3757_v57 }
 0xbfa   : > { %v3760_v39 = vsel %vm1048_vm1, %v3756_v59, 0.0 }
 0xbfd   : > { %3761 = vadd.xlane.f32.xlu0 %v3760_v39 }
 0xc86   : > { %v3759_v43 = vpop.xlane.xlu0 %3758 }
 0xc87   : > { %v3763_v34 = vmul.f32 0.03125, %v3759_v43 }
 0xc89   : > { %v3765_v50 = vadd.f32 1e-05, %v3763_v34 }
 0xc8a   : > { %v3762_v9 = vpop.xlane.xlu0 %3761 }
 0xc8b   : > { %4512 = vrsqrt.f32 %v3765_v50  ;;  %v3764_v10 = vmul.f32 0.03125, %v3762_v9 }
 0xc8d   : > { %v3766_v28 = vadd.f32 1e-05, %v3764_v10 }
 0xc8f   : > { %4514 = vrsqrt.f32 %v3766_v28 }
 0xc95   : > { %v4513_v11 = vpop.eup %4512 }
 0xc96   : > { %v3769_v12 = vmul.f32 %v4513_v11, %v3753_v44 }
 0xc98   : > { %v3777_v2 = vmul.f32 %v4173_v15, %v3769_v12 }
 0xc99   : > { %v4515_v47 = vpop.eup %4514 }
 0xc9a   : > { %v3770_v42 = vmul.f32 %v4515_v47, %v3754_v40  ;;  %v3785_v48 = vadd.f32 %v4174_v30, %v3777_v2 }
 0xc9c   : > { %v3778_v51 = vmul.f32 %v4173_v15, %v3770_v42 }
 0xc9e   : > { %v3786_v55 = vadd.f32 %v4174_v30, %v3778_v51 }
 0xca0   : > { %v3788_v45 = vpack.c.bf16 %v3786_v55, %v3785_v48 }
 0xca2   : > { %4313 = vmatpush3.bf16.msra.mxu0 %v3788_v45 }
 0xca3   : > { %4326 = vmatprep.subr.bf16.mxu0 %v5611_v27 }
 0xca5   : > { %4315 = vmatmul.mubr.msk.bf16.vlgmr.msra.gmra.mrb[12].mxu0 %vm964_vm0, %v3787_v24 }
 0xca6   : > { %4330 = vmatprep.mubr.msk.bf16.mxu0 %vm4558_vm2, %v5611_v27  ;;  %4327 = vmatpush3.bf16.msra.mxu0 %v4413_v52 }
 0xca7   : > { %4328 = vmatprep.subr.bf16.mxu0 %v5611_v27 }
 0xcaa   : > { %4329 = vmatpush3.bf16.msra.mxu0 %v4414_v31 }
 0xd78   : > { %v3826_v5 = vpop.f32.mrb[12].mxu0 }
 0xd79   : > { %v3832_v58 = vpack.c.bf16 %v3826_v5, %v3826_v5  ;;  %v4316_v0 = vpop.f32.mrb[13].mxu0 }
 0xd7a   : > { %v3829_v46 = vpop.f32.mrb[14].mxu0 }
 0xd7b   : > { %v4317_v20 = vpop.f32.mrb[15].mxu0  ;;  %4323 = vmatmul.mubr.msk.bf16.vlgmr.msra.gmra.mrb[16].mxu1 %vm1048_vm1, %v3832_v58 }
 0xd7c   : > { %4336 = vmatprep.mubr.msk.bf16.mxu1 %vm4558_vm2, %v5611_v27 }
 0xe4e   : > { %v3893_v14 = vpop.f32.mrb[16].mxu1 }
 0xe4f   : > { %v3894_v13 = vadd.f32 %v4176_v41, %v3893_v14  ;;  %v4324_v63 = vpop.f32.mrb[17].mxu1 }
 0xe50   : > { %v3896_v37 = vpop.f32.mrb[18].mxu1 }
 0xe51   : > { %v3900_v35 = vmul.f32 0.044715, %v3894_v13  ;;  %v4325_v4 = vpop.f32.mrb[19].mxu1  ;;  %v3899_v19 = vmul.f32 0.5, %v3894_v13 }
 0xe53   : > { %v3901_v36 = vmul.f32 %v3900_v35, %v3894_v13 }
 0xe55   : > { %v3902_v21 = vmul.f32 %v3901_v36, %v3894_v13 }
 0xe57   : > { %v3903_v18 = vadd.f32 %v3902_v21, %v3894_v13 }
 0xe59   : > { %v3904_v53 = vmul.f32 0.7978846, %v3903_v18 }
 0xe5b   : > { %4516 = vtanh.f32 %v3904_v53 }
 0xe65   : > { %v4517_v8 = vpop.eup %4516 }
 0xe66   : > { %v3906_v25 = vadd.f32 1.0, %v4517_v8 }
 0xe68   : > { %v3907_v6 = vmul.f32 %v3906_v25, %v3899_v19 }
 0xe6a   : > { %v3908_v27 = vpack.c.bf16 %v3907_v6, %v3907_v6 }
 0xe6c   : > { %4331 = vmatmul.mubr.msk.bf16.vlgmr.msra.gmra.mrb[16].mxu0 %vm1048_vm1, %v3908_v27 }
 0xf3f   : > { %v3969_v26 = vpop.f32.mrb[16].mxu0 }
 0xf40   : > { %v3970_v16 = vadd.f32 %v4180_v54, %v3969_v26  ;;  %v4332_v61 = vpop.f32.mrb[17].mxu0 }
 0xf41   : > { %v3972_v23 = vpop.f32.mrb[18].mxu0 }
 0xf42   : > { %v3977_v3 = vpack.c.bf16 %v3970_v16, %v3970_v16  ;;  %v4333_v17 = vpop.f32.mrb[19].mxu0 }
 0xf44   : > { %v3989_v1 = vsel %vm3987_vm11, %v3977_v3, 0 }
 0xf45   : > { %4335 = vmatpush3.bf16.msra.mxu1 %v3989_v1 }
 0xf48   : > { %4337 = vmatmul.mubr.msk.bf16.vlgmr.msra.gmra.mrb[20].mxu1 %vm3983_vm12, %v4415_v60 }
0x101b   : > { %v4025_v62 = vpop.f32.mrb[20].mxu1 }
0x101c   : > { %v4032_v38 = vadd.f32 %v4025_v62, %v5542_v29  ;;  %v4338_v56 = vpop.f32.mrb[21].mxu1 }
0x101d   : > { %v4028_v44 = vpop.f32.mrb[22].mxu1 }
0x101e   : > { %4034 = vst.msk [vmem:[%s958_s16] sm:$0xff] %vm1048_vm1, %v4032_v38  ;;  %v4033_v7 = vadd.f32 %v4028_v44, %v5545_v49  ;;  %v4339_v40 = vpop.f32.mrb[23].mxu1 }
0x1020   : > { %4035 = vst.msk [vmem:[%s958_s16 + $0x8] sm:$0xff] %vm1048_vm1, %v4033_v7 }
0x1021 PF: > { %s73_s22 = sadd.s32 1, %s4524_s22  }
0x1022   : > { %p70_p4 = scmp.ge.s32.totalorder %s73_s22, 4  }
0x1024   :  { %72 = sbr.rel (!%p70_p4) target bundleno = 50 (0x32), region = 205 }

// kernel: _lambda_.7
= control target key start
LH: loop header
LB: loop body
LE: loop exit
PB: predicated region body
PF: predicated region fallthrough
CT: control target
= control target key end

     0   :  { %s3399_s6 = smov 1   ;;  %s3400_s10 = smov 2   ;;  %s4025_s0 = inlined_call_operand.smem [shape: u32[32], index: -1, kind: input, shape index: {}] }
   0x1   :  { %s3444_s5 = sld [smem:[%s4025_s0]]   ;;  %s3401_s14 = smov 3  }
   0x2   :  { %s3449_s9 = sld [smem:[%s4025_s0 + %s3399_s6]]   ;;  %s3402_s18 = smov 4  }
   0x3   :  { %s3454_s13 = sld [smem:[%s4025_s0 + %s3400_s10]]   ;;  %s3403_s22 = smov 5  }
   0x4   :  { %s3459_s17 = sld [smem:[%s4025_s0 + %s3401_s14]]   ;;  %s3404_s26 = smov 6  }
   0x5   :  { %s3464_s21 = sld [smem:[%s4025_s0 + %s3402_s18]]   ;;  %s3405_s30 = smov 7  }
   0x6   :  { %s3469_s25 = sld [smem:[%s4025_s0 + %s3403_s22]]   ;;  %s3406_s4 = smov 8  }
   0x7   :  { %4041 = sst [smem:[#allocation8_spill]] %s3444_s5  ;;  %s3407_s10 = smov 9  }
   0x8   :  { %s3474_s29 = sld [smem:[%s4025_s0 + %s3404_s26]]   ;;  %s3408_s15 = smov 10  }
   0x9   :  { %s3479_s3 = sld [smem:[%s4025_s0 + %s3405_s30]]   ;;  %s3409_s20 = smov 11  }
   0xa   :  { %4042 = sst [smem:[#allocation9_spill]] %s3459_s17  ;;  %s3410_s26 = smov 12  }
   0xb   :  { %4043 = sst [smem:[#allocation10_spill]] %s3464_s21  ;;  %s3411_s1 = smov 13  }
   0xc   :  { %s3484_s8 = sld [smem:[%s4025_s0 + %s3406_s4]]   ;;  %s3412_s7 = smov 14  }
   0xd   :  { %s3489_s14 = sld [smem:[%s4025_s0 + %s3407_s10]]   ;;  %s3414_s22 = smov 16  }
   0xe   :  { %s3494_s19 = sld [smem:[%s4025_s0 + %s3408_s15]]   ;;  %s3413_s15 = smov 15  }
   0xf   :  { %4044 = sst [smem:[#allocation11_spill]] %s3479_s3  ;;  %s3415_s28 = smov 17  }
  0x10   :  { %s3499_s24 = sld [smem:[%s4025_s0 + %s3409_s20]]  }
  0x11   :  { %s3504_s30 = sld [smem:[%s4025_s0 + %s3410_s26]]  }
  0x12   :  { %s3509_s6 = sld [smem:[%s4025_s0 + %s3411_s1]]  }
  0x13   :  { %s3514_s12 = sld [smem:[%s4025_s0 + %s3412_s7]]   ;;  %s3416_s7 = smov 18  }
  0x14   :  { %s3519_s20 = sld [smem:[%s4025_s0 + %s3413_s15]]   ;;  %s3417_s15 = smov 19  }
  0x15   :  { %s3524_s27 = sld [smem:[%s4025_s0 + %s3414_s22]]   ;;  %s3418_s22 = smov 20  }
  0x16   :  { %s3529_s4 = sld [smem:[%s4025_s0 + %s3415_s28]]   ;;  %s3419_s28 = smov 21  }
  0x17   :  { %s3534_s21 = sld [smem:[%s4025_s0 + %s3416_s7]]   ;;  %s3420_s7 = smov 22  }
  0x18   :  { %s3539_s17 = sld [smem:[%s4025_s0 + %s3417_s15]]   ;;  %s3421_s15 = smov 23  }
  0x1a   :  { %4045 = sst [smem:[#allocation12_spill]] %s3519_s20 }
  0x1b   :  { %4046 = sst [smem:[#allocation13_spill]] %s3524_s27 }
  0x1c   :  { %4047 = sst [smem:[#allocation14_spill]] %s3529_s4 }
  0x1d   :  { %4048 = sst [smem:[#allocation15_spill]] %s3534_s21 }
  0x1e   :  { %4049 = sst [smem:[#allocation16_spill]] %s3539_s17 }
  0x1f   :  { %s3544_s27 = sld [smem:[%s4025_s0 + %s3418_s22]]   ;;  %s3422_s22 = smov 24  }
  0x20   :  { %s3549_s20 = sld [smem:[%s4025_s0 + %s3419_s28]]   ;;  %s3423_s28 = smov 25  }
  0x21   :  { %s3554_s21 = sld [smem:[%s4025_s0 + %s3420_s7]]   ;;  %s3424_s7 = smov 26  }
  0x22   :  { %s3559_s17 = sld [smem:[%s4025_s0 + %s3421_s15]]   ;;  %s3425_s15 = smov 27  }
  0x25   :  { %4050 = sst [smem:[#allocation17_spill]] %s3544_s27 }
  0x26   :  { %4051 = sst [smem:[#allocation18_spill]] %s3549_s20 }
  0x27   :  { %4052 = sst [smem:[#allocation19_spill]] %s3554_s21 }
  0x28   :  { %4053 = sst [smem:[#allocation20_spill]] %s3559_s17 }
  0x29   :  { %s3564_s27 = sld [smem:[%s4025_s0 + %s3422_s22]]   ;;  %s3426_s22 = smov 28  }
  0x2a   :  { %s3569_s20 = sld [smem:[%s4025_s0 + %s3423_s28]]   ;;  %s3427_s28 = smov 29  }
  0x2b   :  { %s3574_s21 = sld [smem:[%s4025_s0 + %s3424_s7]]   ;;  %s3428_s7 = smov 30  }
  0x2c   :  { %s3579_s17 = sld [smem:[%s4025_s0 + %s3425_s15]]   ;;  %s3429_s15 = smov 31  }
  0x2f   :  { %4054 = sst [smem:[#allocation21_spill]] %s3564_s27 }
  0x30   :  { %4055 = sst [smem:[#allocation22_spill]] %s3569_s20 }
  0x31   :  { %4056 = sst [smem:[#allocation23_spill]] %s3574_s21 }
  0x32   :  { %4057 = sst [smem:[#allocation24_spill]] %s3579_s17 }
  0x33   :  { %s3584_s27 = sld [smem:[%s4025_s0 + %s3426_s22]]  }
  0x34   :  { %s3589_s20 = sld [smem:[%s4025_s0 + %s3427_s28]]  }
  0x35   :  { %s3594_s21 = sld [smem:[%s4025_s0 + %s3428_s7]]  }
  0x36   :  { %s3599_s17 = sld [smem:[%s4025_s0 + %s3429_s15]]  }
  0x3c   :  { %4058 = sst [smem:[#allocation25_spill]] %s3599_s17 }
  0x3d   :  { %68 = vsyncpa [#allocation3], 0 }
  0x3e   :  { %70 = vsyncpa [#allocation3 + $0x1], 0 }
  0x3f   :  { %71 = vsyncpa [#allocation4], 0 }
  0x40   :  { %73 = vsyncpa [#allocation4 + $0x1], 0  ;;  %s3601_s22 = smov 0   ;;  %s3603_s23 = smov 0  }
  0x41   :  { %s3605_s26 = smov 0   ;;  %s3607_s28 = smov 0  }
  0x42 LB: > { %s4059_s4 = sld [smem:[#allocation14_spill]]  ;;  %s4060_s3 = sld [smem:[#allocation11_spill]]  ;;  %s3393_s26 = sphi %s3605_s26, %s4097_s26   ;;  %s3389_s23 = sphi %s3603_s23, %s4099_s23   ;;  %s3385_s22 = sphi %s3601_s22, %s4098_s22   ;;  %s3397_s28 = sphi %s3607_s28, %s4095_s28  }
  0x43   : > { %s4061_s5 = sld [smem:[#allocation8_spill]]  ;;  %4062 = sst [smem:[#allocation26_spill]] %s3385_s22 }
  0x44   : > { %4063 = sst [smem:[#allocation27_spill]] %s3393_s26  ;;  %s3622_s0 = sadd.s32 4294967295, %s3397_s28  }
  0x45   : > { %s2858_s1 = sadd.s32 4294967294, %s3397_s28   ;;  %s3626_s2 = sadd.s32 1, %s3397_s28  }
  0x46   : > { %4064 = sst [smem:[#allocation28_spill]] %s3626_s2  ;;  %s86_s7 = sadd.s32 1, %s3393_s26 }
  0x47   : > { %s83_s10 = ssub.s32 %s3397_s28, %s3626_s2  ;;  %p93_p0 = scmp.ne.s32.totalorder %s3393_s26, %s3389_s23 }
  0x48   : > { %p84_p1 = scmp.eq.s32.totalorder %s83_s10, 0  ;;  %p94_p2 = scmp.eq.s32.totalorder %s3397_s28, 0 }
  0x49   : > { %p99_p3 = scmp.ne.s32.totalorder %s3389_s23, %s3385_s22  ;;  %p100_p4 = scmp.eq.s32.totalorder %s3622_s0, 0 }
  0x4a   : > { %s3638_s11 = scalar_select %p84_p1, %s3393_s26, %s86_s7  }
  0x4b   : > { %p3640_p5 = por %p94_p2, %p93_p0  ;;  %p3644_p6 = por %p100_p4, %p99_p3 }
  0x4c   : > { %4065 = sst [smem:[#allocation29_spill]] %s3638_s11  ;;  %p753_p7 = scmp.eq.s32.totalorder %s3622_s0, 1 }
  0x4d   : > { %s4067_s16 = scalar_select %p3644_p6, 1, 0 }
  0x4e   : > { %p759_p8 = scmp.eq.s32.totalorder %s2858_s1, 1  ;;  %p3096_p10 = scmp.lt.s32.totalorder %s3397_s28, 2 }
  0x4f   : > { %p3651_p11 = por %p753_p7, %p93_p0  ;;  %s869_s10 = sand.u32 1, %s3393_s26  }
  0x50   : > { %p3655_p12 = por %p759_p8, %p99_p3  ;;  %s2862_s11 = sshll.u32 %s3397_s28, 6 }
  0x51   : > { %s4068_s18 = scalar_select %p3651_p11, 1, 0 }
  0x52   : > { %s4070_s7 = scalar_select %p3655_p12, 1, 0 }
  0x53   : > { %4069 = sst [smem:[#allocation30_spill]] %s4068_s18  ;;  %s2861_s2 = sshll.u32 %s869_s10, 2 }
  0x54   : > { %s3662_s22 = scalar_lea.hbm %s4061_s5, %s2862_s11  ;;  %s873_s1 = scalar_lea.vmem [#allocation2], %s2861_s2 }
  0x55   : > { %s880_s17 = sshll.u32 %s873_s1, 4  ;;  %p3666_p13 = pnand %p3096_p10, %p3640_p5  ;;  %s3670_s17 = int_to_ptr.vmem [resolvable:$true] %s880_s17 }
  0x56   : > { %s870_s26 = scalar_lea.sflag [#allocation3], %s869_s10  ;;  %s3301_s11 = scalar_lea.hbm %s3662_s22, 64 }
  0x57   : > { %p3302_p2 = scmp.ne.s32.totalorder %s3662_s22, %s3301_s11  ;;  %p3303_p3 = pneg %p3666_p13 }
  0x58   : > { %s3306_s2 = scalar_lea.hbm %s4061_s5, 128  ;;  %p3307_p5 = scmp.lt.u32.totalorder %s3662_s22, %s4061_s5 }
  0x59   : > { %p3304_p4 = pnand %p3303_p3, %p3302_p2  ;;  %p3308_p8 = scmp.lt.u32.totalorder %s3306_s2, %s3301_s11 }
  0x5a   : > { %p3310_p9 = scmp.lt.u32.totalorder %s3301_s11, %s3662_s22 }
  0x5b   : > { %p3305_p7 = pneg %p3304_p4  ;;  %p3309_p10 = por %p3308_p8, %p3307_p5 }
  0x5d   : > { %p3311_p12 = por %p3310_p9, %p3309_p10 }
  0x5f   : > { %p3312_p11 = pnand %p3311_p12, %p3305_p7 }
  0x61   : > { %3315 = shalt.err (!%p3312_p11)
}
  0x62   : > { %s3316_s15 = scalar_lea.vmem %s3670_s17, 64  ;;  %s3430_s10 = smov [#allocation2]  }
  0x63   : > { %p3317_p0 = scmp.ne.s32.totalorder %s3670_s17, %s3316_s15  ;;  %s3321_s1 = sshll.u32 %s3430_s10, 4  ;;  %s3322_s1 = int_to_ptr.vmem [resolvable:$false] %s3321_s1 }
  0x64   : > { %s3323_s5 = scalar_lea.vmem %s3322_s1, 128  ;;  %p3324_p2 = scmp.lt.s32.totalorder %s3670_s17, %s3322_s1 }
  0x65   : > { %p3319_p1 = pnand %p3317_p0, %p3303_p3  ;;  %p3325_p4 = scmp.lt.s32.totalorder %s3323_s5, %s3316_s15 }
  0x67   : > { %p3320_p6 = pneg %p3319_p1  ;;  %p3326_p5 = por %p3325_p4, %p3324_p2 }
  0x69   : > { %p3327_p9 = pnand %p3326_p5, %p3320_p6 }
  0x6b   : > { %3330 = shalt.err (!%p3327_p9)
}
  0x6c   : > { %3091 = dma.hbm_to_vmem [thread:$0]  (!%p3666_p13), %s3662_s22, 64, %s3670_s17, %s870_s26  }
  0x6d   : > { %p4072_p11 = scmp.lt.s32.totalorder %s3397_s28, 3  ;;  %p4073_p12 = scmp.ge.s32.totalorder %s3397_s28, 1 }
  0x6f   : > { %p886_p0 = pnand %p4073_p12, %p4072_p11 }
  0x70   : > { %s3700_s11 = sand.u32 (!%p886_p0), 1, %s3389_s23   ;;  %p4074_p6 = scmp.ne.s32.totalorder (!%p886_p0), %s4067_s16, 0 }
  0x71   : > { %889 = sbr.rel (%p886_p0) target bundleno = 4062 (0xfde), region = 144  ;;  %s2864_s5 = sshll.u32 (!%p886_p0), %s3700_s11, 2 }
  0x72   : > { %s892_s2 = scalar_lea.sflag (!%p886_p0), [#allocation3], %s3700_s11  ;;  %s895_s18 = scalar_lea.vmem (!%p886_p0), [#allocation2], %s2864_s5 }
  0x78   : > { %3376 = dma.done.wait (%p4074_p6), %s892_s2, 64  }
  0x79   : > { %3378 = vsyncadd (%p4074_p6), %s892_s2, 4294967232  ;;  %v3431_v0 = vmov 0.0   ;;  %vm3432_vm0 = vmmov 0   ;;  %vm981_vm1 = vcmask 1043456   ;;  %vm977_vm2 = vcmask 31744   ;;  %s4075_s17 = sld [smem:[#allocation16_spill]] }
  0x7a   : > { %2998 = vmatprep.subr.mxu0 %v3431_v0  ;;  %3000 = vmatprep.mubr.msk.f32.mxu0 %vm3432_vm0, %v3431_v0  ;;  %v975_v1 = vld [vmem:[%s895_s18] sm:$0xf]  ;;  %vm1057_vm3 = vcmask 519168   ;;  %v3168_v13 = vld [vmem:[%s4060_s3 + $0x14] ss:$8 sps:$4 sm:$0xff]   ;;  %v3433_v15 = vmov 0   ;;  %v1097_v46 = vlaneseq }
  0x7b   : > { %v976_v2 = vld [vmem:[%s3449_s9] sm:$0xf]  ;;  %2999 = vmatpush3.msk.msra.mxu0 %vm981_vm1, %v975_v1  ;;  %v3165_v11 = vld [vmem:[%s4060_s3 + $0x4] ss:$8 sps:$4 sm:$0xff]   ;;  %v3170_v14 = vld [vmem:[%s4060_s3 + $0x10] ss:$8 sps:$4 sm:$0xff]   ;;  %1183 = vmatprep.mubr.bf16.mxu1 %v3433_v15 }
  0x7c   : > { %3001 = vmatmul.mubr.msk.f32.vlgmr.msra.gmra.mrb[0].mxu0 %vm977_vm2, %v976_v2  ;;  %v3167_v12 = vld [vmem:[%s4060_s3] ss:$8 sps:$4 sm:$0xff]   ;;  %1151 = vmatprep.subr.bf16.mxu1 %v3165_v11  ;;  %v3171_v16 = vld [vmem:[%s4060_s3 + $0x24] ss:$8 sps:$4 sm:$0xff]   ;;  %v3174_v18 = vld [vmem:[%s4060_s3 + $0x34] ss:$8 sps:$4 sm:$0xff]  }
  0x7d   : > { %1152 = vmatpush1.bf16.msra.mxu1 %v3167_v12  ;;  %1338 = vmatprep.mubr.bf16.mxu0 %v3433_v15  ;;  %v3173_v17 = vld [vmem:[%s4060_s3 + $0x20] ss:$8 sps:$4 sm:$0xff]   ;;  %v3176_v19 = vld [vmem:[%s4060_s3 + $0x30] ss:$8 sps:$4 sm:$0xff]   ;;  %v3179_v21 = vld [vmem:[%s3489_s14 + $0x4] ss:$8 sps:$4 sm:$0xff]  }
  0x7e   : > { %1153 = vmatprep.subr.bf16.mxu1 %v3168_v13  ;;  %v3177_v20 = vld [vmem:[%s3489_s14] ss:$8 sps:$4 sm:$0xff]   ;;  %v3182_v22 = vld [vmem:[%s3489_s14 + $0x14] ss:$8 sps:$4 sm:$0xff]   ;;  %1306 = vmatprep.subr.bf16.mxu0 %v3179_v21  ;;  %v3180_v23 = vld [vmem:[%s3489_s14 + $0x10] ss:$8 sps:$4 sm:$0xff]  }
  0x7f   : > { %1307 = vmatpush1.bf16.msra.mxu0 %v3177_v20  ;;  %v2868_v28 = vld [vmem:[%s3469_s25] ss:$0 sm:$0xff]  ;;  %vm1147_vm4 = vcmask 523264   ;;  %v3185_v34 = vld [vmem:[%s3489_s14 + $0x24] ss:$8 sps:$4 sm:$0xff]   ;;  %v3755_v47 = vshrl.u32 %v1097_v46, 7 }
  0x80   : > { %1308 = vmatprep.subr.bf16.mxu0 %v3182_v22  ;;  %v2869_v30 = vld [vmem:[%s3474_s29] ss:$0 sm:$0xff]  ;;  %v3188_v36 = vld [vmem:[%s3489_s14 + $0x34] ss:$8 sps:$4 sm:$0xff]   ;;  %v3186_v37 = vld [vmem:[%s3489_s14 + $0x30] ss:$8 sps:$4 sm:$0xff]  }
  0x81   : > { %1154 = vmatpush1.bf16.msra.mxu1 %v3170_v14  ;;  %v3183_v35 = vld [vmem:[%s3489_s14 + $0x20] ss:$8 sps:$4 sm:$0xff]   ;;  %v3191_v38 = vld [vmem:[%s3489_s14 + $0x44] ss:$8 sps:$4 sm:$0xff]   ;;  %v3194_v40 = vld [vmem:[%s3489_s14 + $0x54] ss:$8 sps:$4 sm:$0xff]  }
  0x82   : > { %1155 = vmatprep.subr.bf16.mxu1 %v3171_v16  ;;  %v3189_v39 = vld [vmem:[%s3489_s14 + $0x40] ss:$8 sps:$4 sm:$0xff]   ;;  %v3192_v41 = vld [vmem:[%s3489_s14 + $0x50] ss:$8 sps:$4 sm:$0xff]   ;;  %v3197_v42 = vld [vmem:[%s3489_s14 + $0x64] ss:$8 sps:$4 sm:$0xff]  }
  0x83   : > { %1309 = vmatpush1.bf16.msra.mxu0 %v3180_v23  ;;  %v3195_v43 = vld [vmem:[%s3489_s14 + $0x60] ss:$8 sps:$4 sm:$0xff]   ;;  %v3200_v44 = vld [vmem:[%s3489_s14 + $0x74] ss:$8 sps:$4 sm:$0xff]   ;;  %v3198_v45 = vld [vmem:[%s3489_s14 + $0x70] ss:$8 sps:$4 sm:$0xff]  }
  0x84   : > { %1310 = vmatprep.subr.bf16.mxu0 %v3185_v34  ;;  %v3758_v48 = vsub.s32 0, %v3755_v47  ;;  %v3761_v49 = vld [vmem:[%s3484_s8] sm:$0x3]  ;;  %v3775_v63 = vsub.s32 1, %v3755_v47  ;;  %v1463_v12 = vsub.s32 3, %v3755_v47  ;;  %v3202_v16 = vld [vmem:[%s3509_s6 + $0x8] sm:$0xff]  }
  0x85   : > { %1156 = vmatpush1.bf16.msra.mxu1 %v3173_v17  ;;  %v1214_v62 = vld [vmem:[%s3494_s19] sm:$0x3]  ;;  %v3203_v17 = vld [vmem:[%s3509_s6 + $0x10] sm:$0xff]   ;;  %v3206_v21 = vld [vmem:[%s3509_s6 + $0x28] sm:$0xff]   ;;  %vm1617_vm5 = vcmask 1041409   ;;  %vm1620_vm6 = vcmask 1042434  }
  0x86   : > { %1157 = vmatprep.subr.bf16.mxu1 %v3174_v18  ;;  %v1100_v50 = vrot.slane %v3761_v49, %v3758_v48  ;;  %v1223_v1 = vrot.slane %v1214_v62, %v3775_v63  ;;  %v3201_v14 = vld [vmem:[%s3509_s6] sm:$0xff]   ;;  %v3204_v18 = vld [vmem:[%s3509_s6 + $0x18] sm:$0xff]   ;;  %v1219_v20 = vrot.slane %v1214_v62, %v3758_v48  ;;  %v3207_v23 = vld [vmem:[%s3509_s6 + $0x30] sm:$0xff]   ;;  %vm1623_vm7 = vcmask 1043459   ;;  %s4076_s22 = sld [smem:[#allocation12_spill]]  ;;  %s4077_s26 = sld [smem:[#allocation13_spill]] }
  0x87   : > { %1311 = vmatpush1.bf16.msra.mxu0 %v3183_v35  ;;  %s4078_s16 = sld [smem:[#allocation15_spill]]  ;;  %s4079_s15 = sld [smem:[#allocation17_spill]]  ;;  %vm2482_vm8 = vcmask 1041408   ;;  %vm2695_vm9 = vcmask 1040384   ;;  %vm2691_vm10 = vcmask 7168  }
  0x88   : > { %1312 = vmatprep.subr.bf16.mxu0 %v3188_v36  ;;  %s4080_s10 = sld [smem:[#allocation20_spill]]  ;;  %s4081_s1 = sld [smem:[#allocation18_spill]] }
  0x89   : > { %1158 = vmatpush1.bf16.msra.mxu1 %v3176_v19  ;;  %v3205_v19 = vld [vmem:[%s3509_s6 + $0x20] sm:$0xff]   ;;  %s4082_s2 = sld [smem:[#allocation19_spill]]  ;;  %s4083_s18 = sld [smem:[#allocation21_spill]] }
  0x8a   : > { %3003 = vmatprep.subr.bf16.mxu1 %v3431_v0 }
  0x8b   : > { %1313 = vmatpush1.bf16.msra.mxu0 %v3186_v37 }
  0x8c   : > { %1314 = vmatprep.subr.bf16.mxu0 %v3191_v38 }
  0x8f   : > { %1315 = vmatpush1.bf16.msra.mxu0 %v3189_v39 }
  0x90   : > { %1316 = vmatprep.subr.bf16.mxu0 %v3194_v40 }
  0x93   : > { %1317 = vmatpush1.bf16.msra.mxu0 %v3192_v41 }
  0x94   : > { %1318 = vmatprep.subr.bf16.mxu0 %v3197_v42  ;;  %v1356_v42 = vld [vmem:[%s3499_s24] sm:$0xff] }
  0x97   : > { %1319 = vmatpush1.bf16.msra.mxu0 %v3195_v43 }
  0x98   : > { %1320 = vmatprep.subr.bf16.mxu0 %v3200_v44 }
  0x9b   : > { %1321 = vmatpush1.bf16.msra.mxu0 %v3198_v45 }
  0x9c   : > { %3023 = vmatprep.subr.mxu0 %v3431_v0 }
 0x14f   : > { %v3716_v3 = vpop.f32.mrb[0].mxu0 }
 0x150   : > { %v3002_v4 = vpop.f32.mrb[1].mxu0  ;;  %v1058_v5 = vsel %vm1057_vm3, %v3716_v3, 0.0 }
 0x151   : > { %1059 = vadd.xlane.f32.xlu0 %v1058_v5  ;;  %v1456_v4 = vsub.s32 2, %v3755_v47 }
 0x1de   : > { %v1060_v6 = vpop.xlane.xlu0 %1059 }
 0x1df   : > { %v1062_v7 = vmul.f32 0.015625, %v1060_v6 }
 0x1e1   : > { %v1063_v8 = vsub.f32 %v3716_v3, %v1062_v7 }
 0x1e3   : > { %v1064_v9 = vmul.f32 %v1063_v8, %v1063_v8 }
 0x1e5   : > { %v1065_v10 = vsel %vm1057_vm3, %v1064_v9, 0.0 }
 0x1e6   : > { %1066 = vadd.xlane.f32.xlu0 %v1065_v10 }
 0x273   : > { %v1067_v24 = vpop.xlane.xlu0 %1066 }
 0x274   : > { %v1068_v25 = vmul.f32 0.015625, %v1067_v24 }
 0x276   : > { %v1069_v26 = vadd.f32 1e-05, %v1068_v25  ;;  %v3208_v25 = vld [vmem:[%s3509_s6 + $0x38] sm:$0xff]  }
 0x278   : > { %3261 = vrsqrt.f32 %v1069_v26 }
 0x282   : > { %v3262_v27 = vpop.eup %3261 }
 0x283   : > { %v1071_v29 = vmul.f32 %v3262_v27, %v1063_v8 }
 0x285   : > { %v1078_v31 = vmul.f32 %v2868_v28, %v1071_v29 }
 0x287   : > { %v1085_v32 = vadd.f32 %v2869_v30, %v1078_v31  ;;  %v3434_v30 = vmov 1966171168  }
 0x288   : > { %v1359_v31 = vunpack.c.l.s4 %v3434_v30 }
 0x289   : > { %v1086_v33 = vpack.c.bf16 %v1085_v32, %v1085_v32 }
 0x28b   : > { %2878 = vmatmul.mubr.msk.bf16.vlgmr.msra.gmra.mrb[0].mxu1 %vm1147_vm4, %v1086_v33  ;;  %v1360_v33 = vunpack.c.0.s8 %v1359_v31 }
 0x28c   : > { %3019 = vmatprep.mubr.msk.bf16.mxu1 %vm3432_vm0, %v3431_v0  ;;  %3004 = vmatpush3.bf16.msra.mxu1 %v3201_v14 }
 0x28d   : > { %3005 = vmatprep.subr.bf16.mxu1 %v3431_v0  ;;  %v3803_v36 = vsub.s32 %v1360_v33, %v3755_v47  ;;  %v3248_v47 = vld [vmem:[%s4080_s10 + $0x18] sm:$0xff]  }
 0x290   : > { %3006 = vmatpush3.bf16.msra.mxu1 %v3202_v16 }
 0x291   : > { %3007 = vmatprep.subr.bf16.mxu1 %v3431_v0 }
 0x294   : > { %3008 = vmatpush3.bf16.msra.mxu1 %v3203_v17 }
 0x295   : > { %3009 = vmatprep.subr.bf16.mxu1 %v3431_v0 }
 0x298   : > { %3010 = vmatpush3.bf16.msra.mxu1 %v3204_v18 }
 0x299   : > { %3011 = vmatprep.subr.bf16.mxu1 %v3431_v0 }
 0x29c   : > { %3012 = vmatpush3.bf16.msra.mxu1 %v3205_v19 }
 0x29d   : > { %3013 = vmatprep.subr.bf16.mxu1 %v3431_v0 }
 0x2a0   : > { %3014 = vmatpush3.bf16.msra.mxu1 %v3206_v21 }
 0x2a1   : > { %3015 = vmatprep.subr.bf16.mxu1 %v3431_v0 }
 0x2a4   : > { %3016 = vmatpush3.bf16.msra.mxu1 %v3207_v23 }
 0x2a5   : > { %3017 = vmatprep.subr.bf16.mxu1 %v3431_v0 }
 0x2a8   : > { %3018 = vmatpush3.bf16.msra.mxu1 %v3208_v25 }
 0x35e   : > { %v1185_v51 = vpop.f32.mrb[0].mxu1 }
 0x35f   : > { %v1186_v52 = vadd.f32 %v1185_v51, %v1100_v50  ;;  %v3765_v53 = vpop.f32.mrb[1].mxu1 }
 0x360   : > { %v1189_v54 = vpop.f32.mrb[2].mxu1 }
 0x361   : > { %v1192_v55 = vmul.f32 0.5, %v1186_v52  ;;  %v1190_v56 = vpop.f32.mrb[3].mxu1 }
 0x363   : > { %3263 = vtanh.f32 %v1192_v55  ;;  %v1104_v55 = vrot.slane %v3761_v49, %v3775_v63 }
 0x36d   : > { %v3264_v57 = vpop.eup %3263 }
 0x36e   : > { %v1194_v58 = vadd.f32 1.0, %v3264_v57 }
 0x370   : > { %v1195_v59 = vmul.f32 0.5, %v1194_v58 }
 0x372   : > { %v3767_v60 = vmul.f32 %v1195_v59, %v1186_v52 }
 0x374   : > { %v1197_v61 = vpack.c.bf16 %v3767_v60, %v3767_v60 }
 0x376   : > { %1339 = vmatmul.mubr.bf16.vlgmr.msra.gmra.mrb[4].mxu0 %v1197_v61  ;;  %v1188_v61 = vadd.f32 %v3765_v53, %v1104_v55 }
 0x377   : > { %3025 = vmatprep.mubr.msk.f32.mxu0 %vm3432_vm0, %v3431_v0 }
 0x449   : > { %v1340_v2 = vpop.f32.mrb[4].mxu0 }
 0x44a   : > { %v1342_v5 = vpop.f32.mrb[5].mxu0  ;;  %v1341_v22 = vadd.f32 %v1340_v2, %v1219_v20 }
 0x44b   : > { %v1343_v6 = vadd.f32 %v1342_v5, %v1223_v1  ;;  %v1344_v7 = vpop.f32.mrb[6].mxu0 }
 0x44c   : > { %v1345_v8 = vpop.f32.mrb[7].mxu0  ;;  %v1348_v24 = vand.u32 2147483647, %v1341_v22  ;;  %v1347_v35 = vmax.f32 %v1341_v22, 0.0 }
 0x44d   : > { %v1457_v9 = vrot.slane %v1343_v6, %v1456_v4  ;;  %v1443_v10 = vrot.slane %v1343_v6, %v3758_v48  ;;  %v1450_v11 = vrot.slane %v1343_v6, %v3775_v63  ;;  %v1464_v13 = vrot.slane %v1343_v6, %v1463_v12 }
 0x44e   : > { %v1349_v26 = vsub.f32 0.0, %v1348_v24  ;;  %v1564_v6 = vmul.f32 0.5, %v1188_v61 }
 0x44f   : > { %1459 = vbcast.lane.b32.xlu0 %v1457_v9, 256  ;;  %1445 = vbcast.lane.b32.xlu1 %v1443_v10, 256 }
 0x450   : > { %v1350_v27 = vmul.f32 1.442695, %v1349_v26 }
 0x452   : > { %3265 = vpow2.f32 %v1350_v27 }
 0x453   : > { %1452 = vbcast.lane.b32.xlu1 %v1450_v11, 256 }
 0x457   : > { %1466 = vbcast.lane.b32.xlu1 %v1464_v13, 256 }
 0x45b   : > { %1506 = vbcast.lane.b32.xlu1 %v1450_v11, 264 }
 0x45c   : > { %v3266_v28 = vpop.eup %3265 }
 0x45d   : > { %v1352_v29 = vadd.f32 1.0, %v3266_v28 }
 0x45f   : > { %1510 = vbcast.lane.b32.xlu1 %v1457_v9, 264  ;;  %3267 = vlog2.f32 %v1352_v29 }
 0x463   : > { %1502 = vbcast.lane.b32.xlu1 %v1443_v10, 264 }
 0x467   : > { %1514 = vbcast.lane.b32.xlu1 %v1464_v13, 264 }
 0x469   : > { %v3268_v32 = vpop.eup %3267 }
 0x46a   : > { %v1354_v34 = vmul.f32 0.6931472, %v3268_v32 }
 0x46c   : > { %v1355_v37 = vadd.f32 %v1354_v34, %v1347_v35 }
 0x46e   : > { %v1364_v38 = vrot.slane %v1355_v37, %v3803_v36  ;;  %v1414_v52 = vmul.f32 %v1355_v37, %v3767_v60 }
 0x470   : > { %v1372_v39 = vrot.slane %v1364_v38, %v3803_v36  ;;  %v1365_v40 = vcombine.high %v1364_v38, %v1364_v38  ;;  %v1422_v57 = vrot.slane %v1414_v52, %v3803_v36  ;;  %v2895_v38 = vld [vmem:[%s3504_s30] ss:$0 sm:$0xff] }
 0x472   : > { %v1385_v41 = vrot.slane %v1372_v39, %v3758_v48  ;;  %v1379_v43 = vrot.slane %v1365_v40, %v3803_v36  ;;  %v1380_v46 = vcombine.high %v1372_v39, %v1372_v39  ;;  %v1430_v62 = vrot.slane %v1422_v57, %v3803_v36 }
 0x473   : > { %v1423_v1 = vcombine.high %v1422_v57, %v1422_v57 }
 0x474   : > { %v1402_v44 = vmul.f32 %v1385_v41, %v1356_v42  ;;  %v1389_v45 = vrot.slane %v1379_v43, %v3758_v48  ;;  %v1393_v54 = vrot.slane %v1380_v46, %v3758_v48  ;;  %v1381_v58 = vcombine.high %v1379_v43, %v1379_v43 }
 0x475   : > { %v1471_v8 = vrot.slane %v1430_v62, %v3758_v48  ;;  %v1437_v49 = vrot.slane %v1423_v1, %v3803_v36  ;;  %v1438_v21 = vcombine.high %v1430_v62, %v1430_v62 }
 0x476   : > { %v1406_v50 = vmul.f32 1.442695, %v1402_v44  ;;  %v1403_v51 = vmul.f32 %v1389_v45, %v1356_v42  ;;  %v1404_v59 = vmul.f32 %v1393_v54, %v1356_v42  ;;  %v1397_v2 = vrot.slane %v1381_v58, %v3758_v48 }
 0x477   : > { %v1475_v14 = vrot.slane %v1437_v49, %v3758_v48  ;;  %v1479_v27 = vrot.slane %v1438_v21, %v3758_v48  ;;  %v1439_v33 = vcombine.high %v1437_v49, %v1437_v49 }
 0x478   : > { %3269 = vpow2.f32 %v1406_v50  ;;  %v1408_v56 = vmul.f32 1.442695, %v1403_v51  ;;  %v1410_v5 = vmul.f32 1.442695, %v1404_v59  ;;  %v1405_v10 = vmul.f32 %v1397_v2, %v1356_v42 }
 0x479   : > { %v1483_v43 = vrot.slane %v1439_v33, %v3758_v48  ;;  %v1551_v50 = vmul.f32 %v2895_v38, %v3767_v60 }
 0x47a   : > { %3271 = vpow2.f32 %v1408_v56  ;;  %v1412_v18 = vmul.f32 1.442695, %v1405_v10 }
 0x47b   : > { %3273 = vpow2.f32 %v1410_v5  ;;  %v1553_v2 = vrot.slane %v1551_v50, 1 }
 0x47c   : > { %3275 = vtanh.f32 %v1564_v6 }
 0x47d   : > { %3277 = vpow2.f32 %v1412_v18 }
 0x482   : > { %v3270_v7 = vpop.eup %3269 }
 0x483   : > { %v1492_v13 = vmul.f32 0.0, %v3270_v7 }
 0x484   : > { %v3272_v16 = vpop.eup %3271 }
 0x485   : > { %v3274_v24 = vpop.eup %3273 }
 0x486   : > { %v3276_v26 = vpop.eup %3275 }
 0x487   : > { %v1566_v32 = vadd.f32 1.0, %v3276_v26  ;;  %v3278_v41 = vpop.eup %3277 }
 0x489   : > { %v1567_v42 = vmul.f32 0.5, %v1566_v32 }
 0x48b   : > { %v1568_v57 = vmul.f32 %v1567_v42, %v1188_v61 }
 0x48d   : > { %v1571_v18 = vrot.slane %v1568_v57, 2 }
 0x4c1   : > { %v1446_v9 = vpop.permute.xlu1 %1445  ;;  %v1460_v25 = vpop.permute.xlu0 %1459 }
 0x4c2   : > { %v1488_v11 = vmul.f32 %v1471_v8, %v1446_v9  ;;  %v1490_v30 = vmul.f32 %v1479_v27, %v1460_v25  ;;  %v1570_v9 = vrot.slane %v1568_v57, 1 }
 0x4c4   : > { %v1493_v53 = vadd.f32 %v1492_v13, %v1488_v11 }
 0x4c5   : > { %v1453_v17 = vpop.permute.xlu1 %1452 }
 0x4c6   : > { %v1489_v19 = vmul.f32 %v1475_v14, %v1453_v17  ;;  %v1494_v20 = vmul.f32 %v3272_v16, %v1493_v53  ;;  %v1554_v14 = vrot.slane %v1551_v50, 2 }
 0x4c8   : > { %v1495_v22 = vadd.f32 %v1494_v20, %v1489_v19 }
 0x4c9   : > { %v1467_v23 = vpop.permute.xlu1 %1466 }
 0x4ca   : > { %v1496_v28 = vmul.f32 %v3274_v24, %v1495_v22  ;;  %v1491_v52 = vmul.f32 %v1483_v43, %v1467_v23 }
 0x4cc   : > { %v1497_v35 = vadd.f32 %v1496_v28, %v1490_v30 }
 0x4cd   : > { %v1507_v29 = vpop.permute.xlu1 %1506 }
 0x4ce   : > { %v1517_v31 = vmul.f32 %v1507_v29, %v1495_v22  ;;  %v1498_v46 = vmul.f32 %v3278_v41, %v1497_v35 }
 0x4d0   : > { %v1526_v34 = vrot.slane %v1517_v31, 4  ;;  %v1499_v1 = vadd.f32 %v1498_v46, %v1491_v52  ;;  %v2896_v52 = vld [vmem:[%s3514_s12] ss:$0 sm:$0xff] }
 0x4d1   : > { %v1511_v37 = vpop.permute.xlu1 %1510 }
 0x4d2   : > { %v1527_v39 = vadd.f32 %v1526_v34, %v1517_v31  ;;  %v1518_v40 = vmul.f32 %v1511_v37, %v1497_v35  ;;  %v1555_v31 = vrot.slane %v1551_v50, 3  ;;  %v1572_v34 = vrot.slane %v1568_v57, 3 }
 0x4d4   : > { %v1528_v44 = vrot.slane %v1527_v39, 2  ;;  %v1532_v45 = vrot.slane %v1518_v40, 4 }
 0x4d5   : > { %v1503_v51 = vpop.permute.xlu1 %1502 }
 0x4d6   : > { %v1529_v54 = vadd.f32 %v1528_v44, %v1527_v39  ;;  %v1533_v55 = vadd.f32 %v1532_v45, %v1518_v40  ;;  %v1516_v56 = vmul.f32 %v1503_v51, %v1493_v53 }
 0x4d8   : > { %v1530_v58 = vrot.slane %v1529_v54, 1  ;;  %v1534_v59 = vrot.slane %v1533_v55, 2  ;;  %v1520_v62 = vrot.slane %v1516_v56, 4 }
 0x4d9   : > { %v1515_v5 = vpop.permute.xlu1 %1514 }
 0x4da   : > { %v1531_v6 = vadd.f32 %v1530_v58, %v1529_v54  ;;  %v1535_v7 = vadd.f32 %v1534_v59, %v1533_v55  ;;  %v1521_v8 = vadd.f32 %v1520_v62, %v1516_v56  ;;  %v1519_v49 = vmul.f32 %v1515_v5, %v1499_v1  ;;  %v1716_v62 = vld [vmem:[%s3454_s13] sm:$0xf] }
 0x4dc   : > { %v1561_v10 = vadd.f32 %v1553_v2, %v1531_v6  ;;  %v1536_v11 = vrot.slane %v1535_v7, 1  ;;  %v1522_v60 = vrot.slane %v1521_v8, 2  ;;  %v1538_v13 = vrot.slane %v1519_v49, 4 }
 0x4de   : > { %v1578_v16 = vmul.f32 %v1570_v9, %v1561_v10  ;;  %v1537_v17 = vadd.f32 %v1536_v11, %v1535_v7  ;;  %v1523_v53 = vadd.f32 %v1522_v60, %v1521_v8  ;;  %v1539_v61 = vadd.f32 %v1538_v13, %v1519_v49  ;;  %v3211_v9 = vld [vmem:[%s4059_s4 + $0x4] ss:$8 sps:$4 sm:$0xff]   ;;  %v3209_v10 = vld [vmem:[%s4059_s4] ss:$8 sps:$4 sm:$0xff]   ;;  %v3214_v11 = vld [vmem:[%s4059_s4 + $0x14] ss:$8 sps:$4 sm:$0xff]  }
 0x4df   : > { %v3212_v60 = vld [vmem:[%s4059_s4 + $0x10] ss:$8 sps:$4 sm:$0xff]   ;;  %v3217_v13 = vld [vmem:[%s4059_s4 + $0x24] ss:$8 sps:$4 sm:$0xff]  }
 0x4e0   : > { %v1562_v19 = vadd.f32 %v1554_v14, %v1537_v17  ;;  %v1524_v20 = vrot.slane %v1523_v53, 1  ;;  %v1540_v21 = vrot.slane %v1539_v61, 2  ;;  %v1582_v22 = vpack.c.bf16 %v1578_v16, %v1578_v16  ;;  %v3215_v14 = vld [vmem:[%s4059_s4 + $0x20] ss:$8 sps:$4 sm:$0xff]   ;;  %v3220_v16 = vld [vmem:[%s4059_s4 + $0x34] ss:$8 sps:$4 sm:$0xff]  }
 0x4e1   : > { %v3218_v17 = vld [vmem:[%s4059_s4 + $0x30] ss:$8 sps:$4 sm:$0xff]  }
 0x4e2   : > { %v1579_v23 = vmul.f32 %v1571_v18, %v1562_v19  ;;  %v1525_v24 = vadd.f32 %v1524_v20, %v1523_v53  ;;  %v1541_v25 = vadd.f32 %v1540_v21, %v1539_v61  ;;  %v1613_v29 = vunpack.c.l.b16 %v1582_v22  ;;  %v3221_v53 = vld [vmem:[%s4075_s17] ss:$8 sps:$4 sm:$0xff]   ;;  %v3223_v61 = vld [vmem:[%s4075_s17 + $0x4] ss:$8 sps:$4 sm:$0xff]   ;;  %v3226_v18 = vld [vmem:[%s4075_s17 + $0x14] ss:$8 sps:$4 sm:$0xff]  }
 0x4e3   : > { %2041 = vmatprep.subr.bf16.mxu1 %v3223_v61  ;;  %v3224_v19 = vld [vmem:[%s4075_s17 + $0x10] ss:$8 sps:$4 sm:$0xff]  }
 0x4e4   : > { %v1583_v26 = vpack.c.bf16 %v1579_v23, %v1579_v23  ;;  %v1560_v27 = vadd.f32 %v1551_v50, %v1525_v24  ;;  %v1542_v28 = vrot.slane %v1541_v25, 1  ;;  %v1616_v38 = vrot.slane %v1613_v29, 7  ;;  %v2907_v24 = vld [vmem:[%s4076_s22] ss:$0 sm:$0xff]  ;;  %s4084_s22 = sld [smem:[#allocation22_spill]] }
 0x4e6   : > { %v1577_v30 = vmul.f32 %v1568_v57, %v1560_v27  ;;  %v1543_v32 = vadd.f32 %v1542_v28, %v1541_v25  ;;  %v1614_v33 = vunpack.c.l.b16 %v1583_v26  ;;  %v2908_v26 = vld [vmem:[%s4077_s26] ss:$0 sm:$0xff]  ;;  %s4085_s26 = sld [smem:[#allocation23_spill]] }
 0x4e8   : > { %v1581_v35 = vpack.c.bf16 %v1577_v30, %v1577_v30  ;;  %v1563_v37 = vadd.f32 %v1555_v31, %v1543_v32  ;;  %v1619_v41 = vrot.slane %v1614_v33, 6  ;;  %v3229_v30 = vld [vmem:[%s4075_s17 + $0x24] ss:$8 sps:$4 sm:$0xff]   ;;  %v3227_v31 = vld [vmem:[%s4075_s17 + $0x20] ss:$8 sps:$4 sm:$0xff]  }
 0x4e9   : > { %v3232_v32 = vld [vmem:[%s4075_s17 + $0x34] ss:$8 sps:$4 sm:$0xff]   ;;  %v3230_v33 = vld [vmem:[%s4075_s17 + $0x30] ss:$8 sps:$4 sm:$0xff]  }
 0x4ea   : > { %v1612_v39 = vunpack.c.l.b16 %v1581_v35  ;;  %v1580_v40 = vmul.f32 %v1572_v34, %v1563_v37  ;;  %v3235_v34 = vld [vmem:[%s4075_s17 + $0x44] ss:$8 sps:$4 sm:$0xff]   ;;  %v3233_v35 = vld [vmem:[%s4075_s17 + $0x40] ss:$8 sps:$4 sm:$0xff]   ;;  %v3238_v37 = vld [vmem:[%s4075_s17 + $0x54] ss:$8 sps:$4 sm:$0xff]  }
 0x4ec   : > { %v1584_v42 = vpack.c.bf16 %v1580_v40, %v1580_v40  ;;  %v1618_v43 = vsel %vm1617_vm5, %v1616_v38, %v1612_v39  ;;  %v3236_v38 = vld [vmem:[%s4075_s17 + $0x50] ss:$8 sps:$4 sm:$0xff]   ;;  %v3241_v39 = vld [vmem:[%s4075_s17 + $0x64] ss:$8 sps:$4 sm:$0xff]   ;;  %v3239_v40 = vld [vmem:[%s4075_s17 + $0x60] ss:$8 sps:$4 sm:$0xff]  }
 0x4ed   : > { %v1621_v44 = vsel %vm1620_vm6, %v1619_v41, %v1618_v43  ;;  %v3244_v41 = vld [vmem:[%s4075_s17 + $0x74] ss:$8 sps:$4 sm:$0xff]   ;;  %v3874_v43 = vld [vmem:[%s4078_s16] sm:$0x3]  ;;  %s4086_s16 = sld [smem:[#allocation9_spill]] }
 0x4ee   : > { %v1615_v45 = vunpack.c.l.b16 %v1584_v42  ;;  %v3242_v42 = vld [vmem:[%s4075_s17 + $0x70] ss:$8 sps:$4 sm:$0xff]  }
 0x4f0   : > { %v1622_v46 = vrot.slane %v1615_v45, 5 }
 0x4f2   : > { %v1624_v50 = vsel %vm1623_vm7, %v1622_v46, %v1621_v44  ;;  %v1836_v44 = vrot.slane %v3874_v43, %v3758_v48 }
 0x4f3   : > { %v1625_v51 = vpack.c.b16 %v1624_v50, %v1624_v50 }
 0x4f5   : > { %3020 = vmatmul.mubr.bf16.vlgmr.msra.gmra.mrb[4].mxu1 %v1625_v51 }
 0x4f6   : > { %2073 = vmatprep.mubr.bf16.mxu1 %v3433_v15  ;;  %2042 = vmatpush1.bf16.msra.mxu1 %v3221_v53  ;;  %v3252_v53 = vld [vmem:[%s4080_s10 + $0x38] sm:$0xff]  }
 0x4f7   : > { %2043 = vmatprep.subr.bf16.mxu1 %v3226_v18 }
 0x4fa   : > { %2044 = vmatpush1.bf16.msra.mxu1 %v3224_v19 }
 0x4fb   : > { %2045 = vmatprep.subr.bf16.mxu1 %v3229_v30 }
 0x4fe   : > { %2046 = vmatpush1.bf16.msra.mxu1 %v3227_v31  ;;  %v2091_v31 = vld [vmem:[%s4081_s1] sm:$0xff]  ;;  %s4088_s1 = sld [smem:[#allocation10_spill]] }
 0x4ff   : > { %2047 = vmatprep.subr.bf16.mxu1 %v3232_v32 }
 0x502   : > { %2048 = vmatpush1.bf16.msra.mxu1 %v3230_v33 }
 0x503   : > { %2049 = vmatprep.subr.bf16.mxu1 %v3235_v34 }
 0x506   : > { %2050 = vmatpush1.bf16.msra.mxu1 %v3233_v35 }
 0x507   : > { %2051 = vmatprep.subr.bf16.mxu1 %v3238_v37 }
 0x50a   : > { %2052 = vmatpush1.bf16.msra.mxu1 %v3236_v38  ;;  %v1840_v38 = vrot.slane %v3874_v43, %v3775_v63 }
 0x50b   : > { %2053 = vmatprep.subr.bf16.mxu1 %v3241_v39 }
 0x50e   : > { %2054 = vmatpush1.bf16.msra.mxu1 %v3239_v40 }
 0x50f   : > { %2055 = vmatprep.subr.bf16.mxu1 %v3244_v41 }
 0x512   : > { %2056 = vmatpush1.bf16.msra.mxu1 %v3242_v42 }
 0x513   : > { %3048 = vmatprep.subr.bf16.mxu1 %v3431_v0 }
 0x5c8   : > { %v1709_v54 = vpop.f32.mrb[4].mxu1 }
 0x5c9   : > { %v1710_v55 = vadd.f32 %v2896_v52, %v1709_v54  ;;  %v3021_v56 = vpop.f32.mrb[5].mxu1 }
 0x5ca   : > { %v1712_v57 = vpop.f32.mrb[6].mxu1 }
 0x5cb   : > { %v1715_v58 = vadd.f32 %v1710_v55, %v3716_v3  ;;  %v3022_v59 = vpop.f32.mrb[7].mxu1 }
 0x5cd   : > { %3024 = vmatpush3.msk.msra.mxu0 %vm981_vm1, %v1715_v58 }
 0x5ce   : > { %3026 = vmatmul.mubr.msk.f32.vlgmr.msra.gmra.mrb[2].mxu0 %vm977_vm2, %v1716_v62  ;;  %1886 = vmatprep.subr.bf16.mxu0 %v3211_v9  ;;  %v1949_v62 = vld [vmem:[%s4079_s15] sm:$0x3]  ;;  %s4087_s15 = sld [smem:[#allocation24_spill]] }
 0x5cf   : > { %1918 = vmatprep.mubr.bf16.mxu0 %v3433_v15  ;;  %1887 = vmatpush1.bf16.msra.mxu0 %v3209_v10  ;;  %v3245_v10 = vld [vmem:[%s4080_s10] sm:$0xff]  }
 0x5d0   : > { %1888 = vmatprep.subr.bf16.mxu0 %v3214_v11 }
 0x5d3   : > { %1889 = vmatpush1.bf16.msra.mxu0 %v3212_v60 }
 0x5d4   : > { %1890 = vmatprep.subr.bf16.mxu0 %v3217_v13  ;;  %v3246_v13 = vld [vmem:[%s4080_s10 + $0x8] sm:$0xff]  }
 0x5d7   : > { %1891 = vmatpush1.bf16.msra.mxu0 %v3215_v14  ;;  %v3247_v14 = vld [vmem:[%s4080_s10 + $0x10] sm:$0xff]  }
 0x5d8   : > { %1892 = vmatprep.subr.bf16.mxu0 %v3220_v16  ;;  %v3251_v16 = vld [vmem:[%s4080_s10 + $0x30] sm:$0xff]  }
 0x5db   : > { %1893 = vmatpush1.bf16.msra.mxu0 %v3218_v17  ;;  %v1954_v17 = vrot.slane %v1949_v62, %v3758_v48 }
 0x5dc   : > { %3028 = vmatprep.subr.bf16.mxu0 %v3431_v0 }
 0x6a1   : > { %v3836_v1 = vpop.f32.mrb[2].mxu0 }
 0x6a2   : > { %v1795_v2 = vsel %vm1057_vm3, %v3836_v1, 0.0  ;;  %v3027_v5 = vpop.f32.mrb[3].mxu0 }
 0x6a3   : > { %1796 = vadd.xlane.f32.xlu1 %v1795_v2  ;;  %v1958_v2 = vrot.slane %v1949_v62, %v3775_v63 }
 0x730   : > { %v1797_v3 = vpop.xlane.xlu1 %1796 }
 0x731   : > { %v1798_v6 = vmul.f32 0.015625, %v1797_v3 }
 0x733   : > { %v1799_v7 = vsub.f32 %v3836_v1, %v1798_v6 }
 0x735   : > { %v1800_v8 = vmul.f32 %v1799_v7, %v1799_v7 }
 0x737   : > { %v1801_v49 = vsel %vm1057_vm3, %v1800_v8, 0.0 }
 0x738   : > { %1802 = vadd.xlane.f32.xlu0 %v1801_v49 }
 0x7c5   : > { %v1803_v20 = vpop.xlane.xlu0 %1802 }
 0x7c6   : > { %v1804_v21 = vmul.f32 0.015625, %v1803_v20 }
 0x7c8   : > { %v1805_v22 = vadd.f32 1e-05, %v1804_v21 }
 0x7ca   : > { %3279 = vrsqrt.f32 %v1805_v22 }
 0x7d4   : > { %v3280_v23 = vpop.eup %3279 }
 0x7d5   : > { %v1807_v25 = vmul.f32 %v3280_v23, %v1799_v7 }
 0x7d7   : > { %v1814_v27 = vmul.f32 %v2907_v24, %v1807_v25 }
 0x7d9   : > { %v1821_v28 = vadd.f32 %v2908_v26, %v1814_v27 }
 0x7db   : > { %v1822_v29 = vpack.c.bf16 %v1821_v28, %v1821_v28 }
 0x7dd   : > { %2917 = vmatmul.mubr.msk.bf16.vlgmr.msra.gmra.mrb[8].mxu0 %vm1147_vm4, %v1822_v29 }
 0x7de   : > { %3044 = vmatprep.mubr.msk.bf16.mxu0 %vm3432_vm0, %v3431_v0  ;;  %3029 = vmatpush3.bf16.msra.mxu0 %v3245_v10 }
 0x7df   : > { %3030 = vmatprep.subr.bf16.mxu0 %v3431_v0 }
 0x7e2   : > { %3031 = vmatpush3.bf16.msra.mxu0 %v3246_v13 }
 0x7e3   : > { %3032 = vmatprep.subr.bf16.mxu0 %v3431_v0 }
 0x7e6   : > { %3033 = vmatpush3.bf16.msra.mxu0 %v3247_v14 }
 0x7e7   : > { %3034 = vmatprep.subr.bf16.mxu0 %v3431_v0 }
 0x7ea   : > { %3035 = vmatpush3.bf16.msra.mxu0 %v3248_v47 }
 0x7eb   : > { %3036 = vmatprep.subr.bf16.mxu0 %v3431_v0 }
 0x8b0   : > { %v1920_v45 = vpop.f32.mrb[8].mxu0 }
 0x8b1   : > { %v1921_v46 = vadd.f32 %v1920_v45, %v1836_v44  ;;  %v3878_v50 = vpop.f32.mrb[9].mxu0 }
 0x8b2   : > { %v1924_v51 = vpop.f32.mrb[10].mxu0  ;;  %v3922_v44 = vadd.f32 %v3878_v50, %v1840_v38 }
 0x8b3   : > { %v1927_v52 = vmul.f32 0.5, %v1921_v46  ;;  %v1925_v54 = vpop.f32.mrb[11].mxu0 }
 0x8b4   : > { %v2299_v54 = vmul.f32 0.5, %v3922_v44 }
 0x8b5   : > { %3281 = vtanh.f32 %v1927_v52 }
 0x8bf   : > { %v3282_v55 = vpop.eup %3281 }
 0x8c0   : > { %v1929_v56 = vadd.f32 1.0, %v3282_v55 }
 0x8c2   : > { %v1930_v57 = vmul.f32 0.5, %v1929_v56 }
 0x8c4   : > { %v3880_v58 = vmul.f32 %v1930_v57, %v1921_v46 }
 0x8c6   : > { %v1932_v59 = vpack.c.bf16 %v3880_v58, %v3880_v58 }
 0x8c8   : > { %2074 = vmatmul.mubr.bf16.vlgmr.msra.gmra.mrb[8].mxu1 %v1932_v59 }
 0x8c9   : > { %3050 = vmatprep.mubr.msk.bf16.mxu1 %vm3432_vm0, %v3431_v0 }
 0x99b   : > { %v2075_v5 = vpop.f32.mrb[8].mxu1 }
 0x99c   : > { %v2077_v3 = vpop.f32.mrb[9].mxu1  ;;  %v2076_v61 = vadd.f32 %v2075_v5, %v1954_v17 }
 0x99d   : > { %v2078_v6 = vadd.f32 %v2077_v3, %v1958_v2  ;;  %v2079_v7 = vpop.f32.mrb[10].mxu1 }
 0x99e   : > { %v2080_v8 = vpop.f32.mrb[11].mxu1  ;;  %v2083_v18 = vand.u32 2147483647, %v2076_v61  ;;  %v2082_v25 = vmax.f32 %v2076_v61, 0.0 }
 0x99f   : > { %v2185_v49 = vrot.slane %v2078_v6, %v3775_v63  ;;  %v2178_v9 = vrot.slane %v2078_v6, %v3758_v48  ;;  %v2192_v11 = vrot.slane %v2078_v6, %v1456_v4  ;;  %v2199_v60 = vrot.slane %v2078_v6, %v1463_v12  ;;  %v3249_v4 = vld [vmem:[%s4080_s10 + $0x20] sm:$0xff]   ;;  %v3250_v12 = vld [vmem:[%s4080_s10 + $0x28] sm:$0xff]  }
 0x9a0   : > { %3037 = vmatpush3.bf16.msra.mxu0 %v3249_v4  ;;  %v2084_v19 = vsub.f32 0.0, %v2083_v18 }
 0x9a1   : > { %2187 = vbcast.lane.b32.xlu1 %v2185_v49, 256  ;;  %2180 = vbcast.lane.b32.xlu0 %v2178_v9, 256 }
 0x9a2   : > { %3038 = vmatprep.subr.bf16.mxu0 %v3431_v0  ;;  %v2085_v20 = vmul.f32 1.442695, %v2084_v19 }
 0x9a4   : > { %3039 = vmatpush3.bf16.msra.mxu0 %v3250_v12  ;;  %3283 = vpow2.f32 %v2085_v20 }
 0x9a5   : > { %2194 = vbcast.lane.b32.xlu1 %v2192_v11, 256  ;;  %2201 = vbcast.lane.b32.xlu0 %v2199_v60, 256 }
 0x9a6   : > { %3040 = vmatprep.subr.bf16.mxu0 %v3431_v0 }
 0x9a8   : > { %3041 = vmatpush3.bf16.msra.mxu0 %v3251_v16 }
 0x9a9   : > { %2241 = vbcast.lane.b32.xlu1 %v2185_v49, 264  ;;  %2245 = vbcast.lane.b32.xlu0 %v2192_v11, 264 }
 0x9aa   : > { %3042 = vmatprep.subr.bf16.mxu0 %v3431_v0 }
 0x9ac   : > { %3043 = vmatpush3.bf16.msra.mxu0 %v3252_v53 }
 0x9ad   : > { %2237 = vbcast.lane.b32.xlu1 %v2178_v9, 264  ;;  %2249 = vbcast.lane.b32.xlu0 %v2199_v60, 264 }
 0x9ae   : > { %3066 = vmatprep.subr.bf16.mxu0 %v3431_v0  ;;  %v3284_v21 = vpop.eup %3283 }
 0x9af   : > { %v2087_v22 = vadd.f32 1.0, %v3284_v21 }
 0x9b1   : > { %3285 = vlog2.f32 %v2087_v22 }
 0x9bb   : > { %v3286_v23 = vpop.eup %3285 }
 0x9bc   : > { %v2089_v24 = vmul.f32 0.6931472, %v3286_v23 }
 0x9be   : > { %v2090_v26 = vadd.f32 %v2089_v24, %v2082_v25 }
 0x9c0   : > { %v2099_v27 = vrot.slane %v2090_v26, %v3803_v36  ;;  %v2149_v42 = vmul.f32 %v2090_v26, %v3880_v58  ;;  %v2934_v26 = vld [vmem:[%s4082_s2] ss:$0 sm:$0xff]  ;;  %s4089_s2 = sld [smem:[#allocation25_spill]] }
 0x9c2   : > { %v2107_v28 = vrot.slane %v2099_v27, %v3803_v36  ;;  %v2100_v29 = vcombine.high %v2099_v27, %v2099_v27  ;;  %v2157_v52 = vrot.slane %v2149_v42, %v3803_v36 }
 0x9c4   : > { %v2120_v30 = vrot.slane %v2107_v28, %v3758_v48  ;;  %v2114_v32 = vrot.slane %v2100_v29, %v3803_v36  ;;  %v2115_v34 = vcombine.high %v2107_v28, %v2107_v28  ;;  %v2158_v43 = vcombine.high %v2157_v52, %v2157_v52 }
 0x9c5   : > { %v2165_v56 = vrot.slane %v2157_v52, %v3803_v36 }
 0x9c6   : > { %v2137_v33 = vmul.f32 %v2120_v30, %v2091_v31  ;;  %v2124_v35 = vrot.slane %v2114_v32, %v3758_v48  ;;  %v2116_v39 = vcombine.high %v2114_v32, %v2114_v32  ;;  %v2128_v40 = vrot.slane %v2115_v34, %v3758_v48 }
 0x9c7   : > { %v2172_v50 = vrot.slane %v2158_v43, %v3803_v36  ;;  %v2206_v62 = vrot.slane %v2165_v56, %v3758_v48  ;;  %v2173_v49 = vcombine.high %v2165_v56, %v2165_v56 }
 0x9c8   : > { %v2141_v37 = vmul.f32 1.442695, %v2137_v33  ;;  %v2138_v41 = vmul.f32 %v2124_v35, %v2091_v31  ;;  %v2132_v45 = vrot.slane %v2116_v39, %v3758_v48  ;;  %v2139_v46 = vmul.f32 %v2128_v40, %v2091_v31 }
 0x9c9   : > { %v2210_v7 = vrot.slane %v2172_v50, %v3758_v48  ;;  %v2174_v14 = vcombine.high %v2172_v50, %v2172_v50  ;;  %v2214_v36 = vrot.slane %v2173_v49, %v3758_v48 }
 0x9ca   : > { %3287 = vpow2.f32 %v2141_v37  ;;  %v2143_v51 = vmul.f32 1.442695, %v2138_v41  ;;  %v2140_v55 = vmul.f32 %v2132_v45, %v2091_v31  ;;  %v2145_v63 = vmul.f32 1.442695, %v2139_v46 }
 0x9cb   : > { %v2218_v19 = vrot.slane %v2174_v14, %v3758_v48  ;;  %v2286_v37 = vmul.f32 %v2934_v26, %v3880_v58 }
 0x9cc   : > { %3289 = vpow2.f32 %v2143_v51  ;;  %v2147_v59 = vmul.f32 1.442695, %v2140_v55 }
 0x9cd   : > { %3291 = vtanh.f32 %v2299_v54  ;;  %v2288_v54 = vrot.slane %v2286_v37, 1 }
 0x9ce   : > { %3293 = vpow2.f32 %v2145_v63 }
 0x9cf   : > { %3295 = vpow2.f32 %v2147_v59 }
 0x9d4   : > { %v3288_v57 = vpop.eup %3287 }
 0x9d5   : > { %v2227_v6 = vmul.f32 0.0, %v3288_v57 }
 0x9d6   : > { %v3290_v9 = vpop.eup %3289 }
 0x9d7   : > { %v3292_v47 = vpop.eup %3291 }
 0x9d8   : > { %v3294_v12 = vpop.eup %3293  ;;  %v2301_v18 = vadd.f32 1.0, %v3292_v47 }
 0x9d9   : > { %v3296_v23 = vpop.eup %3295 }
 0x9da   : > { %v2302_v31 = vmul.f32 0.5, %v2301_v18 }
 0x9dc   : > { %v2303_v42 = vmul.f32 %v2302_v31, %v3922_v44 }
 0x9de   : > { %v2305_v57 = vrot.slane %v2303_v42, 1  ;;  %v2306_v44 = vrot.slane %v2303_v42, 2 }
 0xa13   : > { %v2188_v2 = vpop.permute.xlu1 %2187  ;;  %v2181_v5 = vpop.permute.xlu0 %2180 }
 0xa14   : > { %v2223_v3 = vmul.f32 %v2206_v62, %v2181_v5  ;;  %v2224_v60 = vmul.f32 %v2210_v7, %v2188_v2  ;;  %v2289_v2 = vrot.slane %v2286_v37, 2 }
 0xa16   : > { %v2228_v8 = vadd.f32 %v2227_v6, %v2223_v3 }
 0xa17   : > { %v2195_v10 = vpop.permute.xlu1 %2194  ;;  %v2202_v11 = vpop.permute.xlu0 %2201 }
 0xa18   : > { %v2229_v13 = vmul.f32 %v3290_v9, %v2228_v8  ;;  %v2225_v17 = vmul.f32 %v2214_v36, %v2195_v10  ;;  %v2226_v24 = vmul.f32 %v2218_v19, %v2202_v11  ;;  %v2290_v11 = vrot.slane %v2286_v37, 3 }
 0xa19   : > { %v2307_v36 = vrot.slane %v2303_v42, 3 }
 0xa1a   : > { %v2230_v4 = vadd.f32 %v2229_v13, %v2224_v60 }
 0xa1b   : > { %v2242_v16 = vpop.permute.xlu1 %2241  ;;  %v2246_v20 = vpop.permute.xlu0 %2245 }
 0xa1c   : > { %v2252_v53 = vmul.f32 %v2242_v16, %v2230_v4  ;;  %v2231_v61 = vmul.f32 %v3294_v12, %v2230_v4 }
 0xa1e   : > { %v2261_v21 = vrot.slane %v2252_v53, 4  ;;  %v2232_v22 = vadd.f32 %v2231_v61, %v2225_v17 }
 0xa1f   : > { %v2238_v25 = vpop.permute.xlu1 %2237  ;;  %v2250_v38 = vpop.permute.xlu0 %2249 }
 0xa20   : > { %v2262_v27 = vadd.f32 %v2261_v21, %v2252_v53  ;;  %v2253_v28 = vmul.f32 %v2246_v20, %v2232_v22  ;;  %v2251_v29 = vmul.f32 %v2238_v25, %v2228_v8  ;;  %v2233_v30 = vmul.f32 %v3296_v23, %v2232_v22 }
 0xa22   : > { %v2263_v32 = vrot.slane %v2262_v27, 2  ;;  %v2267_v33 = vrot.slane %v2253_v28, 4  ;;  %v2255_v34 = vrot.slane %v2251_v29, 4  ;;  %v2234_v35 = vadd.f32 %v2233_v30, %v2226_v24 }
 0xa24   : > { %v2264_v48 = vadd.f32 %v2263_v32, %v2262_v27  ;;  %v2268_v39 = vadd.f32 %v2267_v33, %v2253_v28  ;;  %v2256_v40 = vadd.f32 %v2255_v34, %v2251_v29  ;;  %v2254_v41 = vmul.f32 %v2250_v38, %v2234_v35  ;;  %v2935_v27 = vld [vmem:[%s4083_s18] ss:$0 sm:$0xff]  ;;  %s4090_s18 = sld [smem:[#allocation30_spill]] }
 0xa26   : > { %v2265_v45 = vrot.slane %v2264_v48, 1  ;;  %v2269_v46 = vrot.slane %v2268_v39, 2  ;;  %v2257_v51 = vrot.slane %v2256_v40, 2  ;;  %v2273_v52 = vrot.slane %v2254_v41, 4 }
 0xa28   : > { %v2266_v55 = vadd.f32 %v2265_v45, %v2264_v48  ;;  %v2270_v63 = vadd.f32 %v2269_v46, %v2268_v39  ;;  %v2258_v43 = vadd.f32 %v2257_v51, %v2256_v40  ;;  %v2274_v56 = vadd.f32 %v2273_v52, %v2254_v41  ;;  %v2944_v45 = vld [vmem:[%s4084_s22] ss:$0 sm:$0xff]  ;;  %s2959_s22 = sshll.u32 %s3622_s0, 6 }
 0xa29   : > { %v2945_v51 = vld [vmem:[%s4085_s26] ss:$0 sm:$0xff]  ;;  %s973_s26 = scalar_lea.vmem [#allocation5], %s2864_s5  ;;  %s3984_s3 = scalar_lea.hbm %s4089_s2, %s2959_s22 }
 0xa2a   : > { %v2296_v59 = vadd.f32 %v2288_v54, %v2266_v55  ;;  %v2271_v50 = vrot.slane %v2270_v63, 1  ;;  %v2259_v58 = vrot.slane %v2258_v43, 1  ;;  %v2275_v62 = vrot.slane %v2274_v56, 2  ;;  %p4091_p1 = scmp.ne.s32.totalorder %s4090_s18, 0  ;;  %s3435_s5 = smov [#allocation5]  }
 0xa2b   : > { %s3335_s4 = sshll.u32 %s3435_s5, 4  ;;  %s3336_s4 = int_to_ptr.vmem [resolvable:$false] %s3335_s4 }
 0xa2c   : > { %v2313_v5 = vmul.f32 %v2305_v57, %v2296_v59  ;;  %v2272_v3 = vadd.f32 %v2271_v50, %v2270_v63  ;;  %v2260_v6 = vadd.f32 %v2259_v58, %v2258_v43  ;;  %v2276_v7 = vadd.f32 %v2275_v62, %v2274_v56  ;;  %v2477_v43 = vld [vmem:[%s4086_s16] sm:$0x1]  ;;  %v3254_v57 = vld [vmem:[%s4087_s15 + $0x8] sm:$0xff]   ;;  %v3255_v59 = vld [vmem:[%s4087_s15 + $0x10] sm:$0xff]   ;;  %s2757_s16 = sshll.u32 %s973_s26, 4  ;;  %s3337_s22 = scalar_lea.vmem %s3336_s4, 128  ;;  %s3986_s16 = int_to_ptr.vmem [resolvable:$true] %s2757_s16 }
 0xa2d   : > { %v3253_v56 = vld [vmem:[%s4087_s15] sm:$0xff]   ;;  %v3256_v50 = vld [vmem:[%s4087_s15 + $0x18] sm:$0xff]   ;;  %s3331_s0 = scalar_lea.vmem %s3986_s16, 64  ;;  %p3338_p8 = scmp.lt.s32.totalorder %s3986_s16, %s3336_s4 }
 0xa2e   : > { %v2317_v8 = vpack.c.bf16 %v2313_v5, %v2313_v5  ;;  %v2297_v49 = vadd.f32 %v2289_v2, %v2272_v3  ;;  %v2295_v9 = vadd.f32 %v2286_v37, %v2260_v6  ;;  %v2277_v10 = vrot.slane %v2276_v7, 1  ;;  %v3257_v6 = vld [vmem:[%s3589_s20] sm:$0xff]   ;;  %p3332_p13 = scmp.ne.s32.totalorder %s3986_s16, %s3331_s0  ;;  %p3339_p10 = scmp.lt.s32.totalorder %s3337_s22, %s3331_s0 }
 0xa30   : > { %v2348_v60 = vunpack.c.l.b16 %v2317_v8  ;;  %v2314_v13 = vmul.f32 %v2306_v44, %v2297_v49  ;;  %v2312_v14 = vmul.f32 %v2303_v42, %v2295_v9  ;;  %v2278_v47 = vadd.f32 %v2277_v10, %v2276_v7  ;;  %v3258_v7 = vld [vmem:[%s3589_s20 + $0x8] sm:$0xff]   ;;  %v3259_v44 = vld [vmem:[%s3589_s20 + $0x10] sm:$0xff]   ;;  %v3260_v8 = vld [vmem:[%s3589_s20 + $0x18] sm:$0xff]   ;;  %p3333_p3 = pnand %p3332_p13, %p4091_p1  ;;  %p3340_p2 = por %p3339_p10, %p3338_p8 }
 0xa31   : > { %v2535_v49 = vld [vmem:[%s3584_s27] sm:$0x1] }
 0xa32   : > { %v2318_v4 = vpack.c.bf16 %v2314_v13, %v2314_v13  ;;  %v2316_v12 = vpack.c.bf16 %v2312_v14, %v2312_v14  ;;  %v2298_v16 = vadd.f32 %v2290_v11, %v2278_v47  ;;  %v2351_v17 = vrot.slane %v2348_v60, 7  ;;  %p3334_p7 = pneg %p3333_p3 }
 0xa34   : > { %v2349_v53 = vunpack.c.l.b16 %v2318_v4  ;;  %v2347_v61 = vunpack.c.l.b16 %v2316_v12  ;;  %v2315_v18 = vmul.f32 %v2307_v36, %v2298_v16  ;;  %p3341_p4 = pnand %p3340_p2, %p3334_p7 }
 0xa36   : > { %v2353_v19 = vrot.slane %v2349_v53, 6  ;;  %v2319_v20 = vpack.c.bf16 %v2315_v18, %v2315_v18  ;;  %v2352_v21 = vsel %vm1617_vm5, %v2351_v17, %v2347_v61  ;;  %v2621_v18 = vld [vmem:[%s3594_s21] sm:$0x1] }
 0xa38   : > { %v2350_v22 = vunpack.c.l.b16 %v2319_v20  ;;  %v2354_v23 = vsel %vm1620_vm6, %v2353_v19, %v2352_v21 }
 0xa3a   : > { %v2355_v24 = vrot.slane %v2350_v22, 5  ;;  %v2697_v22 = vsel %vm2695_vm9, 65535, %v3433_v15 }
 0xa3c   : > { %v2356_v25 = vsel %vm1623_vm7, %v2355_v24, %v2354_v23 }
 0xa3d   : > { %v2357_v26 = vpack.c.b16 %v2356_v25, %v2356_v25 }
 0xa3f   : > { %3045 = vmatmul.mubr.bf16.vlgmr.msra.gmra.mrb[12].mxu0 %v2357_v26 }
 0xa40   : > { %3074 = vmatprep.mubr.msk.bf16.mxu0 %vm3432_vm0, %v3431_v0  ;;  %3067 = vmatpush3.bf16.msra.mxu0 %v3257_v6 }
 0xa41   : > { %3068 = vmatprep.subr.bf16.mxu0 %v3431_v0 }
 0xa44   : > { %3069 = vmatpush3.bf16.msra.mxu0 %v3258_v7 }
 0xa45   : > { %3070 = vmatprep.subr.bf16.mxu0 %v3431_v0 }
 0xa48   : > { %3071 = vmatpush3.bf16.msra.mxu0 %v3259_v44 }
 0xa49   : > { %3072 = vmatprep.subr.bf16.mxu0 %v3431_v0 }
 0xa4c   : > { %3073 = vmatpush3.bf16.msra.mxu0 %v3260_v8 }
 0xb12   : > { %v2441_v28 = vpop.f32.mrb[12].mxu0 }
 0xb13   : > { %v2442_v29 = vadd.f32 %v2935_v27, %v2441_v28  ;;  %v3046_v30 = vpop.f32.mrb[13].mxu0  ;;  %v2689_v27 = vld [vmem:[%s4088_s1] sm:$0x3]  ;;  %s2744_s1 = scalar_lea.sflag [#allocation4], %s3700_s11 }
 0xb14   : > { %v2444_v31 = vpop.f32.mrb[14].mxu0 }
 0xb15   : > { %v3943_v32 = vadd.f32 %v2442_v29, %v3836_v1  ;;  %v3047_v33 = vpop.f32.mrb[15].mxu0 }
 0xb17   : > { %v2450_v34 = vsel %vm1057_vm3, %v3943_v32, 0.0 }
 0xb18   : > { %2451 = vadd.xlane.f32.xlu1 %v2450_v34 }
 0xba5   : > { %v2452_v35 = vpop.xlane.xlu1 %2451 }
 0xba6   : > { %v2453_v37 = vmul.f32 0.015625, %v2452_v35 }
 0xba8   : > { %v2454_v38 = vsub.f32 %v3943_v32, %v2453_v37 }
 0xbaa   : > { %v2455_v48 = vmul.f32 %v2454_v38, %v2454_v38 }
 0xbac   : > { %v2456_v39 = vsel %vm1057_vm3, %v2455_v48, 0.0 }
 0xbad   : > { %2457 = vadd.xlane.f32.xlu0 %v2456_v39 }
 0xc3a   : > { %v2458_v40 = vpop.xlane.xlu0 %2457 }
 0xc3b   : > { %v2459_v41 = vmul.f32 0.015625, %v2458_v40 }
 0xc3d   : > { %v2460_v1 = vadd.f32 1e-05, %v2459_v41 }
 0xc3f   : > { %3297 = vrsqrt.f32 %v2460_v1 }
 0xc49   : > { %v3298_v42 = vpop.eup %3297 }
 0xc4a   : > { %v2462_v46 = vmul.f32 %v3298_v42, %v2454_v38 }
 0xc4c   : > { %v2469_v52 = vmul.f32 %v2944_v45, %v2462_v46 }
 0xc4e   : > { %v2476_v54 = vadd.f32 %v2945_v51, %v2469_v52 }
 0xc50   : > { %v2478_v55 = vpack.c.bf16 %v2476_v54, %v2476_v54 }
 0xc52   : > { %v2484_v63 = vsel %vm2482_vm8, %v2478_v55, 0 }
 0xc53   : > { %3049 = vmatpush3.bf16.msra.mxu1 %v2484_v63 }
 0xc54   : > { %3054 = vmatprep.subr.bf16.mxu1 %v3431_v0 }
 0xc56   : > { %3051 = vmatmul.mubr.msk.bf16.vlgmr.msra.gmra.mrb[12].mxu1 %vm977_vm2, %v2477_v43 }
 0xc57   : > { %3055 = vmatpush3.bf16.msra.mxu1 %v3253_v56  ;;  %3062 = vmatprep.mubr.msk.bf16.mxu1 %vm3432_vm0, %v3431_v0 }
 0xc58   : > { %3056 = vmatprep.subr.bf16.mxu1 %v3431_v0 }
 0xc5b   : > { %3057 = vmatpush3.bf16.msra.mxu1 %v3254_v57 }
 0xc5c   : > { %3058 = vmatprep.subr.bf16.mxu1 %v3431_v0 }
 0xc5f   : > { %3059 = vmatpush3.bf16.msra.mxu1 %v3255_v59 }
 0xc60   : > { %3060 = vmatprep.subr.bf16.mxu1 %v3431_v0 }
 0xc63   : > { %3061 = vmatpush3.bf16.msra.mxu1 %v3256_v50 }
 0xc64   : > { %3078 = vmatprep.subr.bf16.mxu1 %v3431_v0 }
 0xd29   : > { %v2520_v58 = vpop.f32.mrb[12].mxu1 }
 0xd2a   : > { %v2526_v62 = vpack.c.bf16 %v2520_v58, %v2520_v58  ;;  %v3052_v2 = vpop.f32.mrb[13].mxu1 }
 0xd2b   : > { %v2523_v5 = vpop.f32.mrb[14].mxu1 }
 0xd2c   : > { %v3053_v3 = vpop.f32.mrb[15].mxu1  ;;  %3063 = vmatmul.mubr.msk.bf16.vlgmr.msra.gmra.mrb[16].mxu1 %vm1147_vm4, %v2526_v62 }
 0xd2d   : > { %3080 = vmatprep.mubr.msk.bf16.mxu1 %vm3432_vm0, %v3431_v0 }
 0xdff   : > { %v2597_v9 = vpop.f32.mrb[16].mxu1 }
 0xe00   : > { %v2598_v10 = vadd.f32 %v2597_v9, %v2535_v49  ;;  %v3064_v11 = vpop.f32.mrb[17].mxu1 }
 0xe01   : > { %v2600_v60 = vpop.f32.mrb[18].mxu1 }
 0xe02   : > { %v2604_v13 = vmul.f32 0.044715, %v2598_v10  ;;  %v3065_v14 = vpop.f32.mrb[19].mxu1  ;;  %v2603_v17 = vmul.f32 0.5, %v2598_v10 }
 0xe04   : > { %v2605_v47 = vmul.f32 %v2604_v13, %v2598_v10 }
 0xe06   : > { %v2606_v36 = vmul.f32 %v2605_v47, %v2598_v10 }
 0xe08   : > { %v2607_v4 = vadd.f32 %v2606_v36, %v2598_v10 }
 0xe0a   : > { %v2608_v12 = vmul.f32 0.7978846, %v2607_v4 }
 0xe0c   : > { %3299 = vtanh.f32 %v2608_v12 }
 0xe16   : > { %v3300_v16 = vpop.eup %3299 }
 0xe17   : > { %v2610_v53 = vadd.f32 1.0, %v3300_v16 }
 0xe19   : > { %v2611_v61 = vmul.f32 %v2610_v53, %v2603_v17 }
 0xe1b   : > { %v2612_v0 = vpack.c.bf16 %v2611_v61, %v2611_v61 }
 0xe1d   : > { %3075 = vmatmul.mubr.msk.bf16.vlgmr.msra.gmra.mrb[16].mxu0 %vm1147_vm4, %v2612_v0 }
 0xef0   : > { %v2683_v19 = vpop.f32.mrb[16].mxu0 }
 0xef1   : > { %v2684_v20 = vadd.f32 %v2683_v19, %v2621_v18  ;;  %v3076_v21 = vpop.f32.mrb[17].mxu0 }
 0xef2   : > { %v2686_v23 = vpop.f32.mrb[18].mxu0 }
 0xef3   : > { %v2690_v24 = vpack.c.bf16 %v2684_v20, %v2684_v20  ;;  %v3077_v25 = vpop.f32.mrb[19].mxu0 }
 0xef5   : > { %v2699_v26 = vand.u32 %v2697_v22, %v2690_v24 }
 0xef7   : > { %3079 = vmatpush3.bf16.msra.mxu1 %v2699_v26 }
 0xefa   : > { %3081 = vmatmul.mubr.msk.bf16.vlgmr.msra.gmra.mrb[20].mxu1 %vm2691_vm10, %v2689_v27 }
 0xfcd   : > { %v2735_v28 = vpop.f32.mrb[20].mxu1 }
 0xfce   : > { %v2741_v29 = vadd.f32 %v2735_v28, %v3943_v32  ;;  %v3082_v30 = vpop.f32.mrb[21].mxu1 }
 0xfcf   : > { %v2738_v15 = vpop.f32.mrb[22].mxu1 }
 0xfd0   : > { %v3083_v31 = vpop.f32.mrb[23].mxu1  ;;  %2742 = vst.msk [vmem:[%s973_s26] sm:$0xf] %vm1057_vm3, %v2741_v29 }
 0xfd1   : > { %3344 = shalt.err (!%p3341_p4)
}
 0xfd2   : > { %s3345_s11 = scalar_lea.hbm %s3984_s3, 64  ;;  %s3349_s26 = scalar_lea.hbm %s4089_s2, 128 }
 0xfd3   : > { %p3346_p5 = scmp.ne.s32.totalorder %s3984_s3, %s3345_s11  ;;  %p3350_p12 = scmp.lt.u32.totalorder %s3984_s3, %s4089_s2 }
 0xfd4   : > { %p3351_p0 = scmp.lt.u32.totalorder %s3349_s26, %s3345_s11  ;;  %p3353_p13 = scmp.lt.u32.totalorder %s3345_s11, %s3984_s3 }
 0xfd5   : > { %p3347_p9 = pnand %p3346_p5, %p4091_p1 }
 0xfd6   : > { %p3352_p6 = por %p3351_p0, %p3350_p12 }
 0xfd7   : > { %p3348_p11 = pneg %p3347_p9 }
 0xfd8   : > { %p3354_p3 = por %p3353_p13, %p3352_p6 }
 0xfda   : > { %p3355_p7 = pnand %p3354_p3, %p3348_p11 }
 0xfdc   : > { %3358 = shalt.err (!%p3355_p7)
}
 0xfdd   : > { %3086 = dma.vmem_to_hbm [thread:$0]  (%p4091_p1), %s3986_s16, 64, %s3984_s3, %s2744_s1  }
 0xfde PF: > { %s4092_s4 = sld [smem:[#allocation26_spill]]  ;;  %p4093_p8 = scmp.ne.s32.totalorder %s4070_s7, 0 }
 0xfdf   : > { %p4094_p10 = scmp.ge.s32.totalorder %s3397_s28, 2 }
 0xfe1   : > { %p3093_p2 = pnand %p4094_p10, %p4093_p8 }
 0xfe4   : > { %s2769_s0 = sand.u32 1, %s4092_s4  }
 0xfe5   : > { %s2770_s5 = scalar_lea.sflag [#allocation4], %s2769_s0 }
 0xfe6   : > { %3380 = dma.done.wait (!%p3093_p2), %s2770_s5, 64  }
 0xfe7   : > { %3382 = vsyncadd (!%p3093_p2), %s2770_s5, 4294967232  ;;  %s4095_s28 = sld [smem:[#allocation28_spill]]  ;;  %s4096_s11 = sld [smem:[#allocation27_spill]] }
 0xfe8   : > { %s4097_s26 = sld [smem:[#allocation29_spill]]  ;;  %s4098_s22 = smov %s3389_s23 }
 0xfed   : > { %p76_p4 = scmp.ge.s32.totalorder %s4095_s28, 4   ;;  %s4099_s23 = smov %s4096_s11 }
 0xfef   :  { %78 = sbr.rel (!%p76_p4) target bundleno = 66 (0x42), region = 220 }
 0xff6   :  { %2775 = vsyncpa [#allocation3], 1 }
 0xff7   :  { %2777 = vsyncpa [#allocation3 + $0x1], 1 }
 0xff8   :  { %2778 = vsyncpa [#allocation4], 1 }
 0xff9   :  { %2780 = vsyncpa [#allocation4 + $0x1], 1 }

</bundles_post_ra>
